<compile_context>
chip_gen: v7x
topology: tpu7x:2x2x1
jax: 0.10.0
libtpu: 0.0.40
codegen_flags: <defaults>
</compile_context>

<pallas_src>
import functools
import math

import jax
import jax.numpy as jnp
from jax import lax
from jax.experimental import pallas as pl
from jax.experimental.pallas import tpu as pltpu

LN_EPS = 1e-5
MASK_VALUE = -1e30  # large-but-finite; exp() of (mask - rowmax) underflows to 0


def _nbytes(x):
    return math.prod(x.shape) * x.dtype.itemsize


def _round_up(x, m):
    return ((x + m - 1) // m) * m


def _pick_tile(dim, candidates):
    for c in candidates:
        if dim % c == 0:
            return c
    return dim


def _vmem_limit(estimate_bytes):
    # 25% headroom, at least the 16 MiB default, capped below physical VMEM.
    return int(min(max(estimate_bytes * 5 // 4, 16 << 20), 100 << 20))


def _layernorm(x, g, b):
    mu = jnp.mean(x, axis=-1, keepdims=True)
    var = jnp.mean((x - mu) ** 2, axis=-1, keepdims=True)
    return (x - mu) * lax.rsqrt(var + LN_EPS) * g + b


def _gelu_new(x):
    # GPT-2 "gelu_new" (tanh approximation)
    return 0.5 * x * (1.0 + jnp.tanh(math.sqrt(2.0 / math.pi) * (x + 0.044715 * x ** 3)))


# ----------------------------- transformer block -----------------------------
def make_gpt2_block_kernel(n_head, apply_ln_f):
    def gpt2_block_kernel(h_ref, ln1_g, ln1_b, wqkv, bqkv, wproj, bproj,
                          ln2_g, ln2_b, wfc, bfc, wfc2, bfc2, lnf_g, lnf_b,
                          out_ref):
        x = h_ref[...]                       # (S, D) f32 residual stream
        S, D = x.shape
        hd = D // n_head

        # ---- causal self-attention (attention_mask=None inside GPTBlockPipe) ----
        xn = _layernorm(x, ln1_g[...], ln1_b[...])
        qkv = (jnp.dot(xn.astype(jnp.bfloat16), wqkv[...],
                       preferred_element_type=jnp.float32) + bqkv[...])
        q = qkv[:, 0 * D:1 * D].reshape(S, n_head, hd)
        k = qkv[:, 1 * D:2 * D].reshape(S, n_head, hd)
        v = qkv[:, 2 * D:3 * D].reshape(S, n_head, hd)

        scores = jnp.einsum('qhd,khd->hqk',
                            q.astype(jnp.bfloat16), k.astype(jnp.bfloat16),
                            preferred_element_type=jnp.float32) * (1.0 / math.sqrt(hd))
        qi = lax.broadcasted_iota(jnp.int32, (S, S), 0)
        ki = lax.broadcasted_iota(jnp.int32, (S, S), 1)
        causal = (ki <= qi)[None, :, :]      # (1, S, S)
        scores = jnp.where(causal, scores, MASK_VALUE)
        scores = scores - jnp.max(scores, axis=-1, keepdims=True)
        p = jnp.exp(scores)
        p = p * pl.reciprocal(jnp.sum(p, axis=-1, keepdims=True), approx=True)

        ctx = jnp.einsum('hqk,khd->qhd',
                         p.astype(jnp.bfloat16), v.astype(jnp.bfloat16),
                         preferred_element_type=jnp.float32).reshape(S, D)
        attn_out = (jnp.dot(ctx.astype(jnp.bfloat16), wproj[...],
                            preferred_element_type=jnp.float32) + bproj[...])
        h1 = x + attn_out

        # ---- MLP ----
        h1n = _layernorm(h1, ln2_g[...], ln2_b[...])
        ff = (jnp.dot(h1n.astype(jnp.bfloat16), wfc[...],
                      preferred_element_type=jnp.float32) + bfc[...])
        ff = _gelu_new(ff)
        ff = (jnp.dot(ff.astype(jnp.bfloat16), wfc2[...],
                      preferred_element_type=jnp.float32) + bfc2[...])
        h2 = h1 + ff

        if apply_ln_f:                        # ln_f fused into the last block
            h2 = _layernorm(h2, lnf_g[...], lnf_b[...])
        out_ref[...] = h2

    return gpt2_block_kernel


def gpt2_block(h, p, ln_f, n_head, apply_ln_f):
    B, S, D = h.shape
    weights = [p['ln1_g'], p['ln1_b'], p['wqkv'], p['bqkv'], p['wproj'], p['bproj'],
               p['ln2_g'], p['ln2_b'], p['wfc'], p['bfc'], p['wfc2'], p['bfc2'],
               ln_f[0], ln_f[1]]
    in_specs = [pl.BlockSpec((None, S, D), lambda b: (b, 0, 0))]
    in_specs += [pl.BlockSpec(w.shape, lambda b: (0, 0)) for w in weights]

    w_bytes = sum(_nbytes(w) for w in weights)
    act_bytes = 4 * (16 * S * D + 2 * n_head * S * S + 4 * S * D)   # rough live-set bound
    io_bytes = 2 * 2 * S * D * 4                                    # double-buffered in/out
    vmem = _vmem_limit(2 * w_bytes + act_bytes + io_bytes)

    return pl.pallas_call(
        make_gpt2_block_kernel(n_head, apply_ln_f),
        out_shape=jax.ShapeDtypeStruct((B, S, D), jnp.float32),
        grid_spec=pltpu.PrefetchScalarGridSpec(
            num_scalar_prefetch=0, grid=(B,),
            in_specs=in_specs,
            out_specs=pl.BlockSpec((None, S, D), lambda b: (b, 0, 0))),
        compiler_params=pltpu.CompilerParams(
            dimension_semantics=("parallel",),
            vmem_limit_bytes=vmem),
    )(h, *weights)


# ------------------------- GPTOutputPipe: lm_head -----------------------------
def lm_head_kernel(a_ref, w_ref, o_ref, acc_ref):
    @pl.when(pl.program_id(2) == 0)
    def _():
        acc_ref[...] = jnp.zeros_like(acc_ref)

    acc_ref[...] += jnp.dot(a_ref[...], w_ref[...],
                            preferred_element_type=jnp.float32)

    @pl.when(pl.program_id(2) == pl.num_programs(2) - 1)
    def _():
        o_ref[...] = acc_ref[...]


def lm_head(h2d_bf16, w_bf16):
    """Tiled MXU matmul: (M, D) @ (D, Vp) -> (M, Vp) f32 logits. Vp % 128 == 0."""
    M, D = h2d_bf16.shape
    Vp = w_bf16.shape[1]
    tm = _pick_tile(M, (256, 128, 64, 32, 16, 8))
    tn = _pick_tile(Vp, (512, 384, 256, 128))
    tk = _pick_tile(D, (512, 256, 128))
    grid = (M // tm, Vp // tn, D // tk)

    est = 2 * (tm * tk + tk * tn) * 2 + 2 * tm * tn * 4 + tm * tn * 4
    return pl.pallas_call(
        lm_head_kernel,
        out_shape=jax.ShapeDtypeStruct((M, Vp), jnp.float32),
        grid_spec=pltpu.PrefetchScalarGridSpec(
            num_scalar_prefetch=0, grid=grid,
            in_specs=[pl.BlockSpec((tm, tk), lambda i, j, k: (i, k)),
                      pl.BlockSpec((tk, tn), lambda i, j, k: (k, j))],
            out_specs=pl.BlockSpec((tm, tn), lambda i, j, k: (i, j)),
            scratch_shapes=[pltpu.VMEM((tm, tn), jnp.float32)]),
        compiler_params=pltpu.CompilerParams(
            dimension_semantics=("parallel", "parallel", "arbitrary"),
            vmem_limit_bytes=_vmem_limit(est)),
    )(h2d_bf16, w_bf16)


# ------------------------------- parameters ----------------------------------
def init_params(key, *, n_layers, vocab, max_pos, d_model):
    scale = 0.02
    keys = jax.random.split(key, 3 + n_layers)
    vocab_pad = _round_up(vocab, 128)
    lm_w = jax.random.normal(keys[2], (d_model, vocab)) * scale
    lm_w = jnp.pad(lm_w, ((0, 0), (0, vocab_pad - vocab))).astype(jnp.bfloat16)
    params = {
        'wte': (jax.random.normal(keys[0], (vocab, d_model)) * scale).astype(jnp.float32),
        'wpe': (jax.random.normal(keys[1], (max_pos, d_model)) * scale).astype(jnp.float32),
        'lm_w': lm_w,                                      # [D, V_pad], bf16, lane-dense
        'ln_f_g': jnp.ones((1, d_model), jnp.float32),
        'ln_f_b': jnp.zeros((1, d_model), jnp.float32),
        'blocks': [],
    }
    for i in range(n_layers):
        bk = jax.random.split(keys[3 + i], 4)
        params['blocks'].append({
            'ln1_g': jnp.ones((1, d_model), jnp.float32),
            'ln1_b': jnp.zeros((1, d_model), jnp.float32),
            'wqkv': (jax.random.normal(bk[0], (d_model, 3 * d_model)) * scale).astype(jnp.bfloat16),
            'bqkv': jnp.zeros((1, 3 * d_model), jnp.float32),
            'wproj': (jax.random.normal(bk[1], (d_model, d_model)) * scale).astype(jnp.bfloat16),
            'bproj': jnp.zeros((1, d_model), jnp.float32),
            'ln2_g': jnp.ones((1, d_model), jnp.float32),
            'ln2_b': jnp.zeros((1, d_model), jnp.float32),
            'wfc': (jax.random.normal(bk[2], (d_model, 4 * d_model)) * scale).astype(jnp.bfloat16),
            'bfc': jnp.zeros((1, 4 * d_model), jnp.float32),
            'wfc2': (jax.random.normal(bk[3], (4 * d_model, d_model)) * scale).astype(jnp.bfloat16),
            'bfc2': jnp.zeros((1, d_model), jnp.float32),
        })
    return params


# ------------------------------- forward pass ---------------------------------
def gpt_forward(input_ids, attention_mask, params, *, n_head, vocab):
    """Embedding -> blocks (+fused ln_f) -> lm_head (GPTOutputPipe). Returns logits."""
    del attention_mask  # blocks use causal masking only (attention_mask=None in the pipe)
    B, S = input_ids.shape
    D = params['wte'].shape[1]

    # GPTEmbeddingPipe (gather is glue; dropout = identity)
    pos = jnp.arange(S, dtype=jnp.int32)
    h = jnp.take(params['wte'], input_ids, axis=0) + jnp.take(params['wpe'], pos, axis=0)[None]

    # GPTBlockPipe x n_layers; last block applies ln_f (fused)
    ln_f = (params['ln_f_g'], params['ln_f_b'])
    n_blocks = len(params['blocks'])
    for li, blk in enumerate(params['blocks']):
        h = gpt2_block(h, blk, ln_f, n_head, apply_ln_f=(li == n_blocks - 1))

    # GPTOutputPipe: lm_head (no bias for gpt2); vocab padded to x128, pad sliced off
    h2d = h.reshape(B * S, D).astype(jnp.bfloat16)
    logits_padded = lm_head(h2d, params['lm_w'])
    return logits_padded.reshape(B, S, -1)[:, :, :vocab]


# ------------------------- pure-JAX reference (for check) ---------------------
def _block_ref(x, p, ln_f, n_head, apply_ln_f):
    S, D = x.shape
    hd = D // n_head
    xn = _layernorm(x, p['ln1_g'], p['ln1_b'])
    qkv = jnp.dot(xn.astype(jnp.bfloat16), p['wqkv'],
                  preferred_element_type=jnp.float32) + p['bqkv']
    q = qkv[:, :D].reshape(S, n_head, hd)
    k = qkv[:, D:2 * D].reshape(S, n_head, hd)
    v = qkv[:, 2 * D:].reshape(S, n_head, hd)
    s = jnp.einsum('qhd,khd->hqk', q, k) / math.sqrt(hd)
    causal = jnp.tril(jnp.ones((S, S), bool))[None]
    s = jnp.where(causal, s, MASK_VALUE)
    pa = jax.nn.softmax(s, axis=-1)
    ctx = jnp.einsum('hqk,khd->qhd', pa, v).reshape(S, D)
    attn = jnp.dot(ctx.astype(jnp.bfloat16), p['wproj'],
                   preferred_element_type=jnp.float32) + p['bproj']
    h1 = x + attn
    h1n = _layernorm(h1, p['ln2_g'], p['ln2_b'])
    ff = jnp.dot(h1n.astype(jnp.bfloat16), p['wfc'],
                 preferred_element_type=jnp.float32) + p['bfc']
    ff = _gelu_new(ff)
    ff = jnp.dot(ff.astype(jnp.bfloat16), p['wfc2'],
                 preferred_element_type=jnp.float32) + p['bfc2']
    h2 = h1 + ff
    if apply_ln_f:
        h2 = _layernorm(h2, ln_f[0], ln_f[1])
    return h2


def gpt_forward_ref(input_ids, params, *, n_head, vocab):
    B, S = input_ids.shape
    D = params['wte'].shape[1]
    pos = jnp.arange(S, dtype=jnp.int32)
    h = jnp.take(params['wte'], input_ids, axis=0) + jnp.take(params['wpe'], pos, axis=0)[None]
    ln_f = (params['ln_f_g'], params['ln_f_b'])
    nb = len(params['blocks'])
    for li, blk in enumerate(params['blocks']):
        h = jax.vmap(lambda xb: _block_ref(xb, blk, ln_f, n_head, li == nb - 1))(h)
    logits = jnp.dot(h.reshape(B * S, D).astype(jnp.bfloat16), params['lm_w'],
                     preferred_element_type=jnp.float32)
    return logits.reshape(B, S, -1)[:, :, :vocab]


if __name__ == "__main__":
    B, S, D, H = 2, 8, 32, 4
    V, MAX_POS, N_LAYERS = 64, 16, 2

    key = jax.random.PRNGKey(0)
    k_ids, k_params = jax.random.split(key)
    input_ids = jax.random.randint(k_ids, (B, S), 0, V, dtype=jnp.int32)
    attention_mask = jnp.ones((B, S), jnp.float32)  # carried through, unused by blocks
    params = init_params(k_params, n_layers=N_LAYERS, vocab=V, max_pos=MAX_POS, d_model=D)

    fwd = jax.jit(functools.partial(gpt_forward, n_head=H, vocab=V))
    logits = fwd(input_ids, attention_mask, params)
    jax.block_until_ready(logits)

    assert logits.shape == (B, S, V) and logits.dtype == jnp.float32
    assert bool(jnp.all(jnp.isfinite(logits)))

    ref = jax.jit(functools.partial(gpt_forward_ref, n_head=H, vocab=V))(input_ids, params)
    max_err = float(jnp.max(jnp.abs(logits - ref)))
    assert max_err < 3e-2, f"max abs error vs reference too large: {max_err}"
    print("KERNEL_OK")
</pallas_src>

<mosaic_0001>
module attributes {stable_mosaic.version = 11 : i64} {
  func.func @lm_head_kernel(%arg0: i32, %arg1: i32, %arg2: i32, %arg3: memref<16x32xbf16, #tpu.memory_space<vmem>>, %arg4: memref<32x128xbf16, #tpu.memory_space<vmem>>, %arg5: memref<16x128xf32, #tpu.memory_space<vmem>>, %arg6: memref<16x128xf32, #tpu.memory_space<vmem>>) attributes {dimension_semantics = [#tpu.dimension_semantics<parallel>, #tpu.dimension_semantics<parallel>, #tpu.dimension_semantics<arbitrary>], iteration_bounds = array<i64: 1, 1, 1>, scalar_prefetch = 0 : i64, scratch_operands = 1 : i64, tpu.core_type = #tpu.core_type<tc>, window_params = [{transform_indices = @transform_0, window_bounds = array<i64: 16, 32>}, {transform_indices = @transform_1, window_bounds = array<i64: 32, 128>}, {transform_indices = @transform_2, window_bounds = array<i64: 16, 128>}]} {
    %c0_i32 = arith.constant 0 : i32
    %0 = arith.cmpi eq, %arg2, %c0_i32 : i32
    %1 = arith.extui %0 : i1 to i32
    %c0_i32_0 = arith.constant 0 : i32
    %2 = arith.cmpi ne, %1, %c0_i32_0 : i32
    scf.if %2 {
      %cst_10 = arith.constant 0.000000e+00 : f32
      %12 = vector.broadcast %cst_10 : f32 to vector<16x128xf32>
      %c0_11 = arith.constant 0 : index
      %c0_12 = arith.constant 0 : index
      %13 = vector.load %arg6[%c0_11, %c0_12] : memref<16x128xf32, #tpu.memory_space<vmem>>, vector<16x128xf32>
      tpu.vector_store %arg6[%c0_11, %c0_12], %12 {strides = array<i32>} : memref<16x128xf32, #tpu.memory_space<vmem>>, vector<16x128xf32>,
    } else {
    }
    %c0 = arith.constant 0 : index
    %c0_1 = arith.constant 0 : index
    %3 = vector.load %arg6[%c0, %c0_1] : memref<16x128xf32, #tpu.memory_space<vmem>>, vector<16x128xf32>
    %c0_2 = arith.constant 0 : index
    %c0_3 = arith.constant 0 : index
    %4 = vector.load %arg3[%c0_2, %c0_3] : memref<16x32xbf16, #tpu.memory_space<vmem>>, vector<16x32xbf16>
    %c0_4 = arith.constant 0 : index
    %c0_5 = arith.constant 0 : index
    %5 = vector.load %arg4[%c0_4, %c0_5] : memref<32x128xbf16, #tpu.memory_space<vmem>>, vector<32x128xbf16>
    %cst = arith.constant dense<0.000000e+00> : vector<16x128xf32>
    %6 = tpu.matmul %4, %5, %cst {dimension_numbers = #tpu.dot_dimension_numbers<[1], [0], [0], [1], [0, 0, 1, 1], [], []>} : vector<16x32xbf16>, vector<32x128xbf16>, vector<16x128xf32> -> vector<16x128xf32>
    %7 = arith.addf %3, %6 : vector<16x128xf32>
    %c0_6 = arith.constant 0 : index
    %c0_7 = arith.constant 0 : index
    %8 = vector.load %arg6[%c0_6, %c0_7] : memref<16x128xf32, #tpu.memory_space<vmem>>, vector<16x128xf32>
    tpu.vector_store %arg6[%c0_6, %c0_7], %7 {strides = array<i32>} : memref<16x128xf32, #tpu.memory_space<vmem>>, vector<16x128xf32>,
    %c0_i32_8 = arith.constant 0 : i32
    %9 = arith.cmpi eq, %arg2, %c0_i32_8 : i32
    %10 = arith.extui %9 : i1 to i32
    %c0_i32_9 = arith.constant 0 : i32
    %11 = arith.cmpi ne, %10, %c0_i32_9 : i32
    scf.if %11 {
      %c0_10 = arith.constant 0 : index
      %c0_11 = arith.constant 0 : index
      %12 = vector.load %arg6[%c0_10, %c0_11] : memref<16x128xf32, #tpu.memory_space<vmem>>, vector<16x128xf32>
      %c0_12 = arith.constant 0 : index
      %c0_13 = arith.constant 0 : index
      %13 = vector.load %arg5[%c0_12, %c0_13] : memref<16x128xf32, #tpu.memory_space<vmem>>, vector<16x128xf32>
      tpu.vector_store %arg5[%c0_12, %c0_13], %12 {strides = array<i32>} : memref<16x128xf32, #tpu.memory_space<vmem>>, vector<16x128xf32>,
    } else {
    }
    return
  }
  func.func @transform_0(%arg0: i32, %arg1: i32, %arg2: i32) -> (i32, i32) {
    %c0_i32 = arith.constant 0 : i32
    return %arg0, %arg2 : i32, i32
  }
  func.func @transform_1(%arg0: i32, %arg1: i32, %arg2: i32) -> (i32, i32) {
    %c0_i32 = arith.constant 0 : i32
    return %arg2, %arg1 : i32, i32
  }
  func.func @transform_2(%arg0: i32, %arg1: i32, %arg2: i32) -> (i32, i32) {
    %c0_i32 = arith.constant 0 : i32
    return %arg0, %arg1 : i32, i32
  }
}

module attributes {stable_mosaic.version = 11 : i64} {
  func.func @gpt2_block_kernel(%arg0: i32, %arg1: memref<1x8x32xf32, #tpu.memory_space<vmem>>, %arg2: memref<1x32xf32, #tpu.memory_space<vmem>>, %arg3: memref<1x32xf32, #tpu.memory_space<vmem>>, %arg4: memref<32x96xbf16, #tpu.memory_space<vmem>>, %arg5: memref<1x96xf32, #tpu.memory_space<vmem>>, %arg6: memref<32x32xbf16, #tpu.memory_space<vmem>>, %arg7: memref<1x32xf32, #tpu.memory_space<vmem>>, %arg8: memref<1x32xf32, #tpu.memory_space<vmem>>, %arg9: memref<1x32xf32, #tpu.memory_space<vmem>>, %arg10: memref<32x128xbf16, #tpu.memory_space<vmem>>, %arg11: memref<1x128xf32, #tpu.memory_space<vmem>>, %arg12: memref<128x32xbf16, #tpu.memory_space<vmem>>, %arg13: memref<1x32xf32, #tpu.memory_space<vmem>>, %arg14: memref<1x32xf32, #tpu.memory_space<vmem>>, %arg15: memref<1x32xf32, #tpu.memory_space<vmem>>, %arg16: memref<1x8x32xf32, #tpu.memory_space<vmem>>) attributes {dimension_semantics = [#tpu.dimension_semantics<parallel>], iteration_bounds = array<i64: 2>, scalar_prefetch = 0 : i64, scratch_operands = 0 : i64, tpu.core_type = #tpu.core_type<tc>, window_params = [{transform_indices = @transform_0, window_bounds = array<i64: 1, 8, 32>}, {pipeline_mode = #tpu.pipeline_mode<synchronous>, transform_indices = @transform_1, window_bounds = array<i64: 1, 32>}, {pipeline_mode = #tpu.pipeline_mode<synchronous>, transform_indices = @transform_2, window_bounds = array<i64: 1, 32>}, {pipeline_mode = #tpu.pipeline_mode<synchronous>, transform_indices = @transform_3, window_bounds = array<i64: 32, 96>}, {pipeline_mode = #tpu.pipeline_mode<synchronous>, transform_indices = @transform_4, window_bounds = array<i64: 1, 96>}, {pipeline_mode = #tpu.pipeline_mode<synchronous>, transform_indices = @transform_5, window_bounds = array<i64: 32, 32>}, {pipeline_mode = #tpu.pipeline_mode<synchronous>, transform_indices = @transform_6, window_bounds = array<i64: 1, 32>}, {pipeline_mode = #tpu.pipeline_mode<synchronous>, transform_indices = @transform_7, window_bounds = array<i64: 1, 32>}, {pipeline_mode = #tpu.pipeline_mode<synchronous>, transform_indices = @transform_8, window_bounds = array<i64: 1, 32>}, {pipeline_mode = #tpu.pipeline_mode<synchronous>, transform_indices = @transform_9, window_bounds = array<i64: 32, 128>}, {pipeline_mode = #tpu.pipeline_mode<synchronous>, transform_indices = @transform_10, window_bounds = array<i64: 1, 128>}, {pipeline_mode = #tpu.pipeline_mode<synchronous>, transform_indices = @transform_11, window_bounds = array<i64: 128, 32>}, {pipeline_mode = #tpu.pipeline_mode<synchronous>, transform_indices = @transform_12, window_bounds = array<i64: 1, 32>}, {pipeline_mode = #tpu.pipeline_mode<synchronous>, transform_indices = @transform_13, window_bounds = array<i64: 1, 32>}, {pipeline_mode = #tpu.pipeline_mode<synchronous>, transform_indices = @transform_14, window_bounds = array<i64: 1, 32>}, {transform_indices = @transform_15, window_bounds = array<i64: 1, 8, 32>}]} {
    %c0 = arith.constant 0 : index
    %c0_0 = arith.constant 0 : index
    %c0_1 = arith.constant 0 : index
    %0 = vector.load %arg1[%c0, %c0_0, %c0_1] : memref<1x8x32xf32, #tpu.memory_space<vmem>>, vector<1x8x32xf32>
    %1 = vector.shape_cast %0 : vector<1x8x32xf32> to vector<8x32xf32>
    %c0_2 = arith.constant 0 : index
    %c0_3 = arith.constant 0 : index
    %2 = vector.load %arg2[%c0_2, %c0_3] : memref<1x32xf32, #tpu.memory_space<vmem>>, vector<1x32xf32>
    %c0_4 = arith.constant 0 : index
    %c0_5 = arith.constant 0 : index
    %3 = vector.load %arg3[%c0_4, %c0_5] : memref<1x32xf32, #tpu.memory_space<vmem>>, vector<1x32xf32>
    %cst = arith.constant dense<0.000000e+00> : vector<8xf32>
    %4 = vector.multi_reduction <add>, %1, %cst [1] : vector<8x32xf32> to vector<8xf32>
    %5 = vector.shape_cast %4 : vector<8xf32> to vector<8x1xf32>
    %cst_6 = arith.constant 3.200000e+01 : f32
    %6 = vector.broadcast %cst_6 : f32 to vector<8x1xf32>
    %7 = arith.divf %5, %6 : vector<8x1xf32>
    %8 = vector.broadcast %7 : vector<8x1xf32> to vector<8x32xf32>
    %9 = arith.subf %1, %8 : vector<8x32xf32>
    %10 = arith.mulf %9, %9 : vector<8x32xf32>
    %cst_7 = arith.constant dense<0.000000e+00> : vector<8xf32>
    %11 = vector.multi_reduction <add>, %10, %cst_7 [1] : vector<8x32xf32> to vector<8xf32>
    %12 = vector.shape_cast %11 : vector<8xf32> to vector<8x1xf32>
    %cst_8 = arith.constant 3.200000e+01 : f32
    %13 = vector.broadcast %cst_8 : f32 to vector<8x1xf32>
    %14 = arith.divf %12, %13 : vector<8x1xf32>
    %15 = vector.broadcast %7 : vector<8x1xf32> to vector<8x32xf32>
    %16 = arith.subf %1, %15 : vector<8x32xf32>
    %cst_9 = arith.constant 9.99999974E-6 : f32
    %17 = vector.broadcast %cst_9 : f32 to vector<8x1xf32>
    %18 = arith.addf %14, %17 : vector<8x1xf32>
    %19 = math.rsqrt %18 : vector<8x1xf32>
    %20 = vector.broadcast %19 : vector<8x1xf32> to vector<8x32xf32>
    %21 = arith.mulf %16, %20 : vector<8x32xf32>
    %22 = vector.broadcast %2 : vector<1x32xf32> to vector<8x32xf32>
    %23 = arith.mulf %21, %22 : vector<8x32xf32>
    %24 = vector.broadcast %3 : vector<1x32xf32> to vector<8x32xf32>
    %25 = arith.addf %23, %24 : vector<8x32xf32>
    %26 = arith.truncf %25 : vector<8x32xf32> to vector<8x32xbf16>
    %c0_10 = arith.constant 0 : index
    %c0_11 = arith.constant 0 : index
    %27 = vector.load %arg4[%c0_10, %c0_11] : memref<32x96xbf16, #tpu.memory_space<vmem>>, vector<32x96xbf16>
    %cst_12 = arith.constant dense<0.000000e+00> : vector<8x96xf32>
    %28 = tpu.matmul %26, %27, %cst_12 {dimension_numbers = #tpu.dot_dimension_numbers<[1], [0], [0], [1], [0, 0, 1, 1], [], []>} : vector<8x32xbf16>, vector<32x96xbf16>, vector<8x96xf32> -> vector<8x96xf32>
    %c0_13 = arith.constant 0 : index
    %c0_14 = arith.constant 0 : index
    %29 = vector.load %arg5[%c0_13, %c0_14] : memref<1x96xf32, #tpu.memory_space<vmem>>, vector<1x96xf32>
    %30 = vector.broadcast %29 : vector<1x96xf32> to vector<8x96xf32>
    %31 = arith.addf %28, %30 : vector<8x96xf32>
    %32 = vector.extract_strided_slice %31 {offsets = [0, 0], sizes = [8, 32], strides = [1, 1]} : vector<8x96xf32> to vector<8x32xf32>
    %33 = vector.shape_cast %32 : vector<8x32xf32> to vector<8x4x8xf32>
    %34 = vector.extract_strided_slice %31 {offsets = [0, 32], sizes = [8, 32], strides = [1, 1]} : vector<8x96xf32> to vector<8x32xf32>
    %35 = vector.shape_cast %34 : vector<8x32xf32> to vector<8x4x8xf32>
    %36 = vector.extract_strided_slice %31 {offsets = [0, 64], sizes = [8, 32], strides = [1, 1]} : vector<8x96xf32> to vector<8x32xf32>
    %37 = vector.shape_cast %36 : vector<8x32xf32> to vector<8x4x8xf32>
    %38 = arith.truncf %33 : vector<8x4x8xf32> to vector<8x4x8xbf16>
    %39 = arith.truncf %35 : vector<8x4x8xf32> to vector<8x4x8xbf16>
    "tpu.trace_start"() <{level = 10 : i32, message = "qhd,khd->hqk"}> : () -> ()
    %cst_15 = arith.constant dense<0.000000e+00> : vector<4x8x8xf32>
    %40 = tpu.matmul %38, %39, %cst_15 {dimension_numbers = #tpu.dot_dimension_numbers<[2], [2], [0], [0], [0, 1, 0, 0, 1, 0], [1], [1]>} : vector<8x4x8xbf16>, vector<8x4x8xbf16>, vector<4x8x8xf32> -> vector<4x8x8xf32>
    "tpu.trace_stop"() : () -> ()
    %cst_16 = arith.constant 0.353553385 : f32
    %41 = vector.broadcast %cst_16 : f32 to vector<4x8x8xf32>
    %42 = arith.mulf %40, %41 : vector<4x8x8xf32>
    %43 = tpu.iota {dimensions = array<i32: 0>} : vector<8x8xi32>
    %44 = tpu.iota {dimensions = array<i32: 1>} : vector<8x8xi32>
    %45 = arith.cmpi sle, %44, %43 : vector<8x8xi32>
    %46 = vector.shape_cast %45 : vector<8x8xi1> to vector<1x8x8xi1>
    %cst_17 = arith.constant -1.000000e+30 : f32
    %47 = vector.shape_cast %46 : vector<1x8x8xi1> to vector<1x8x8xi1>
    %48 = vector.broadcast %47 : vector<1x8x8xi1> to vector<4x8x8xi1>
    %49 = vector.broadcast %cst_17 : f32 to vector<4x8x8xf32>
    %50 = arith.select %48, %42, %49 : vector<4x8x8xi1>, vector<4x8x8xf32>
    %cst_18 = arith.constant dense<0xFF800000> : vector<4x8xf32>
    %51 = vector.multi_reduction <maximumf>, %50, %cst_18 [2] : vector<4x8x8xf32> to vector<4x8xf32>
    %52 = vector.shape_cast %51 : vector<4x8xf32> to vector<4x8x1xf32>
    %53 = vector.broadcast %52 : vector<4x8x1xf32> to vector<4x8x8xf32>
    %54 = arith.subf %50, %53 : vector<4x8x8xf32>
    %55 = math.exp %54 : vector<4x8x8xf32>
    %cst_19 = arith.constant dense<0.000000e+00> : vector<4x8xf32>
    %56 = vector.multi_reduction <add>, %55, %cst_19 [2] : vector<4x8x8xf32> to vector<4x8xf32>
    %57 = vector.shape_cast %56 : vector<4x8xf32> to vector<4x8x1xf32>
    %58 = tpu.reciprocal %57 {approx = true} : vector<4x8x1xf32> -> vector<4x8x1xf32>
    %59 = vector.broadcast %58 : vector<4x8x1xf32> to vector<4x8x8xf32>
    %60 = arith.mulf %55, %59 : vector<4x8x8xf32>
    %61 = arith.truncf %60 : vector<4x8x8xf32> to vector<4x8x8xbf16>
    %62 = arith.truncf %37 : vector<8x4x8xf32> to vector<8x4x8xbf16>
    "tpu.trace_start"() <{level = 10 : i32, message = "hqk,khd->qhd"}> : () -> ()
    %cst_20 = arith.constant dense<0.000000e+00> : vector<4x8x8xf32>
    %63 = tpu.matmul %62, %61, %cst_20 {dimension_numbers = #tpu.dot_dimension_numbers<[0], [2], [2], [1], [0, 1, 0, 2, 1, 1], [1], [0]>} : vector<8x4x8xbf16>, vector<4x8x8xbf16>, vector<4x8x8xf32> -> vector<4x8x8xf32>
    %64 = tpu.transpose %63, [2, 0, 1] : vector<4x8x8xf32> -> vector<8x4x8xf32>
    "tpu.trace_stop"() : () -> ()
    %65 = vector.shape_cast %64 : vector<8x4x8xf32> to vector<8x32xf32>
    %66 = arith.truncf %65 : vector<8x32xf32> to vector<8x32xbf16>
    %c0_21 = arith.constant 0 : index
    %c0_22 = arith.constant 0 : index
    %67 = vector.load %arg6[%c0_21, %c0_22] : memref<32x32xbf16, #tpu.memory_space<vmem>>, vector<32x32xbf16>
    %cst_23 = arith.constant dense<0.000000e+00> : vector<8x32xf32>
    %68 = tpu.matmul %66, %67, %cst_23 {dimension_numbers = #tpu.dot_dimension_numbers<[1], [0], [0], [1], [0, 0, 1, 1], [], []>} : vector<8x32xbf16>, vector<32x32xbf16>, vector<8x32xf32> -> vector<8x32xf32>
    %c0_24 = arith.constant 0 : index
    %c0_25 = arith.constant 0 : index
    %69 = vector.load %arg7[%c0_24, %c0_25] : memref<1x32xf32, #tpu.memory_space<vmem>>, vector<1x32xf32>
    %70 = vector.broadcast %69 : vector<1x32xf32> to vector<8x32xf32>
    %71 = arith.addf %68, %70 : vector<8x32xf32>
    %72 = arith.addf %1, %71 : vector<8x32xf32>
    %c0_26 = arith.constant 0 : index
    %c0_27 = arith.constant 0 : index
    %73 = vector.load %arg8[%c0_26, %c0_27] : memref<1x32xf32, #tpu.memory_space<vmem>>, vector<1x32xf32>
    %c0_28 = arith.constant 0 : index
    %c0_29 = arith.constant 0 : index
    %74 = vector.load %arg9[%c0_28, %c0_29] : memref<1x32xf32, #tpu.memory_space<vmem>>, vector<1x32xf32>
    %cst_30 = arith.constant dense<0.000000e+00> : vector<8xf32>
    %75 = vector.multi_reduction <add>, %72, %cst_30 [1] : vector<8x32xf32> to vector<8xf32>
    %76 = vector.shape_cast %75 : vector<8xf32> to vector<8x1xf32>
    %cst_31 = arith.constant 3.200000e+01 : f32
    %77 = vector.broadcast %cst_31 : f32 to vector<8x1xf32>
    %78 = arith.divf %76, %77 : vector<8x1xf32>
    %79 = vector.broadcast %78 : vector<8x1xf32> to vector<8x32xf32>
    %80 = arith.subf %72, %79 : vector<8x32xf32>
    %81 = arith.mulf %80, %80 : vector<8x32xf32>
    %cst_32 = arith.constant dense<0.000000e+00> : vector<8xf32>
    %82 = vector.multi_reduction <add>, %81, %cst_32 [1] : vector<8x32xf32> to vector<8xf32>
    %83 = vector.shape_cast %82 : vector<8xf32> to vector<8x1xf32>
    %cst_33 = arith.constant 3.200000e+01 : f32
    %84 = vector.broadcast %cst_33 : f32 to vector<8x1xf32>
    %85 = arith.divf %83, %84 : vector<8x1xf32>
    %86 = vector.broadcast %78 : vector<8x1xf32> to vector<8x32xf32>
    %87 = arith.subf %72, %86 : vector<8x32xf32>
    %cst_34 = arith.constant 9.99999974E-6 : f32
    %88 = vector.broadcast %cst_34 : f32 to vector<8x1xf32>
    %89 = arith.addf %85, %88 : vector<8x1xf32>
    %90 = math.rsqrt %89 : vector<8x1xf32>
    %91 = vector.broadcast %90 : vector<8x1xf32> to vector<8x32xf32>
    %92 = arith.mulf %87, %91 : vector<8x32xf32>
    %93 = vector.broadcast %73 : vector<1x32xf32> to vector<8x32xf32>
    %94 = arith.mulf %92, %93 : vector<8x32xf32>
    %95 = vector.broadcast %74 : vector<1x32xf32> to vector<8x32xf32>
    %96 = arith.addf %94, %95 : vector<8x32xf32>
    %97 = arith.truncf %96 : vector<8x32xf32> to vector<8x32xbf16>
    %c0_35 = arith.constant 0 : index
    %c0_36 = arith.constant 0 : index
    %98 = vector.load %arg10[%c0_35, %c0_36] : memref<32x128xbf16, #tpu.memory_space<vmem>>, vector<32x128xbf16>
    %cst_37 = arith.constant dense<0.000000e+00> : vector<8x128xf32>
    %99 = tpu.matmul %97, %98, %cst_37 {dimension_numbers = #tpu.dot_dimension_numbers<[1], [0], [0], [1], [0, 0, 1, 1], [], []>} : vector<8x32xbf16>, vector<32x128xbf16>, vector<8x128xf32> -> vector<8x128xf32>
    %c0_38 = arith.constant 0 : index
    %c0_39 = arith.constant 0 : index
    %100 = vector.load %arg11[%c0_38, %c0_39] : memref<1x128xf32, #tpu.memory_space<vmem>>, vector<1x128xf32>
    %101 = vector.broadcast %100 : vector<1x128xf32> to vector<8x128xf32>
    %102 = arith.addf %99, %101 : vector<8x128xf32>
    %cst_40 = arith.constant 5.000000e-01 : f32
    %103 = vector.broadcast %cst_40 : f32 to vector<8x128xf32>
    %104 = arith.mulf %103, %102 : vector<8x128xf32>
    %105 = arith.mulf %102, %102 : vector<8x128xf32>
    %106 = arith.mulf %102, %105 : vector<8x128xf32>
    %cst_41 = arith.constant 4.471500e-02 : f32
    %107 = vector.broadcast %cst_41 : f32 to vector<8x128xf32>
    %108 = arith.mulf %107, %106 : vector<8x128xf32>
    %109 = arith.addf %102, %108 : vector<8x128xf32>
    %cst_42 = arith.constant 0.797884583 : f32
    %110 = vector.broadcast %cst_42 : f32 to vector<8x128xf32>
    %111 = arith.mulf %110, %109 : vector<8x128xf32>
    %112 = math.tanh %111 : vector<8x128xf32>
    %cst_43 = arith.constant 1.000000e+00 : f32
    %113 = vector.broadcast %cst_43 : f32 to vector<8x128xf32>
    %114 = arith.addf %113, %112 : vector<8x128xf32>
    %115 = arith.mulf %104, %114 : vector<8x128xf32>
    %116 = arith.truncf %115 : vector<8x128xf32> to vector<8x128xbf16>
    %c0_44 = arith.constant 0 : index
    %c0_45 = arith.constant 0 : index
    %117 = vector.load %arg12[%c0_44, %c0_45] : memref<128x32xbf16, #tpu.memory_space<vmem>>, vector<128x32xbf16>
    %cst_46 = arith.constant dense<0.000000e+00> : vector<8x32xf32>
    %118 = tpu.matmul %116, %117, %cst_46 {dimension_numbers = #tpu.dot_dimension_numbers<[1], [0], [0], [1], [0, 0, 1, 1], [], []>} : vector<8x128xbf16>, vector<128x32xbf16>, vector<8x32xf32> -> vector<8x32xf32>
    %c0_47 = arith.constant 0 : index
    %c0_48 = arith.constant 0 : index
    %119 = vector.load %arg13[%c0_47, %c0_48] : memref<1x32xf32, #tpu.memory_space<vmem>>, vector<1x32xf32>
    %120 = vector.broadcast %119 : vector<1x32xf32> to vector<8x32xf32>
    %121 = arith.addf %118, %120 : vector<8x32xf32>
    %122 = arith.addf %72, %121 : vector<8x32xf32>
    %c0_49 = arith.constant 0 : index
    %c0_50 = arith.constant 0 : index
    %c0_51 = arith.constant 0 : index
    %123 = vector.load %arg16[%c0_49, %c0_50, %c0_51] : memref<1x8x32xf32, #tpu.memory_space<vmem>>, vector<1x8x32xf32>
    %124 = vector.shape_cast %123 : vector<1x8x32xf32> to vector<8x32xf32>
    %125 = vector.shape_cast %122 : vector<8x32xf32> to vector<1x8x32xf32>
    tpu.vector_store %arg16[%c0_49, %c0_50, %c0_51], %125 {strides = array<i32>} : memref<1x8x32xf32, #tpu.memory_space<vmem>>, vector<1x8x32xf32>,
    return
  }
  func.func @transform_0(%arg0: i32) -> (i32, i32, i32) {
    %c0_i32 = arith.constant 0 : i32
    %c0_i32_0 = arith.constant 0 : i32
    %c0_i32_1 = arith.constant 0 : i32
    return %arg0, %c0_i32, %c0_i32_0 : i32, i32, i32
  }
  func.func @transform_1(%arg0: i32) -> (i32, i32) {
    %c0_i32 = arith.constant 0 : i32
    %c0_i32_0 = arith.constant 0 : i32
    %c0_i32_1 = arith.constant 0 : i32
    return %c0_i32, %c0_i32_0 : i32, i32
  }
  func.func @transform_2(%arg0: i32) -> (i32, i32) {
    %c0_i32 = arith.constant 0 : i32
    %c0_i32_0 = arith.constant 0 : i32
    %c0_i32_1 = arith.constant 0 : i32
    return %c0_i32, %c0_i32_0 : i32, i32
  }
  func.func @transform_3(%arg0: i32) -> (i32, i32) {
    %c0_i32 = arith.constant 0 : i32
    %c0_i32_0 = arith.constant 0 : i32
    %c0_i32_1 = arith.constant 0 : i32
    return %c0_i32, %c0_i32_0 : i32, i32
  }
  func.func @transform_4(%arg0: i32) -> (i32, i32) {
    %c0_i32 = arith.constant 0 : i32
    %c0_i32_0 = arith.constant 0 : i32
    %c0_i32_1 = arith.constant 0 : i32
    return %c0_i32, %c0_i32_0 : i32, i32
  }
  func.func @transform_5(%arg0: i32) -> (i32, i32) {
    %c0_i32 = arith.constant 0 : i32
    %c0_i32_0 = arith.constant 0 : i32
    %c0_i32_1 = arith.constant 0 : i32
    return %c0_i32, %c0_i32_0 : i32, i32
  }
  func.func @transform_6(%arg0: i32) -> (i32, i32) {
    %c0_i32 = arith.constant 0 : i32
    %c0_i32_0 = arith.constant 0 : i32
    %c0_i32_1 = arith.constant 0 : i32
    return %c0_i32, %c0_i32_0 : i32, i32
  }
  func.func @transform_7(%arg0: i32) -> (i32, i32) {
    %c0_i32 = arith.constant 0 : i32
    %c0_i32_0 = arith.constant 0 : i32
    %c0_i32_1 = arith.constant 0 : i32
    return %c0_i32, %c0_i32_0 : i32, i32
  }
  func.func @transform_8(%arg0: i32) -> (i32, i32) {
    %c0_i32 = arith.constant 0 : i32
    %c0_i32_0 = arith.constant 0 : i32
    %c0_i32_1 = arith.constant 0 : i32
    return %c0_i32, %c0_i32_0 : i32, i32
  }
  func.func @transform_9(%arg0: i32) -> (i32, i32) {
    %c0_i32 = arith.constant 0 : i32
    %c0_i32_0 = arith.constant 0 : i32
    %c0_i32_1 = arith.constant 0 : i32
    return %c0_i32, %c0_i32_0 : i32, i32
  }
  func.func @transform_10(%arg0: i32) -> (i32, i32) {
    %c0_i32 = arith.constant 0 : i32
    %c0_i32_0 = arith.constant 0 : i32
    %c0_i32_1 = arith.constant 0 : i32
    return %c0_i32, %c0_i32_0 : i32, i32
  }
  func.func @transform_11(%arg0: i32) -> (i32, i32) {
    %c0_i32 = arith.constant 0 : i32
    %c0_i32_0 = arith.constant 0 : i32
    %c0_i32_1 = arith.constant 0 : i32
    return %c0_i32, %c0_i32_0 : i32, i32
  }
  func.func @transform_12(%arg0: i32) -> (i32, i32) {
    %c0_i32 = arith.constant 0 : i32
    %c0_i32_0 = arith.constant 0 : i32
    %c0_i32_1 = arith.constant 0 : i32
    return %c0_i32, %c0_i32_0 : i32, i32
  }
  func.func @transform_13(%arg0: i32) -> (i32, i32) {
    %c0_i32 = arith.constant 0 : i32
    %c0_i32_0 = arith.constant 0 : i32
    %c0_i32_1 = arith.constant 0 : i32
    return %c0_i32, %c0_i32_0 : i32, i32
  }
  func.func @transform_14(%arg0: i32) -> (i32, i32) {
    %c0_i32 = arith.constant 0 : i32
    %c0_i32_0 = arith.constant 0 : i32
    %c0_i32_1 = arith.constant 0 : i32
    return %c0_i32, %c0_i32_0 : i32, i32
  }
  func.func @transform_15(%arg0: i32) -> (i32, i32, i32) {
    %c0_i32 = arith.constant 0 : i32
    %c0_i32_0 = arith.constant 0 : i32
    %c0_i32_1 = arith.constant 0 : i32
    return %arg0, %c0_i32, %c0_i32_0 : i32, i32, i32
  }
}

module attributes {stable_mosaic.version = 11 : i64} {
  func.func @gpt2_block_kernel(%arg0: i32, %arg1: memref<1x8x32xf32, #tpu.memory_space<vmem>>, %arg2: memref<1x32xf32, #tpu.memory_space<vmem>>, %arg3: memref<1x32xf32, #tpu.memory_space<vmem>>, %arg4: memref<32x96xbf16, #tpu.memory_space<vmem>>, %arg5: memref<1x96xf32, #tpu.memory_space<vmem>>, %arg6: memref<32x32xbf16, #tpu.memory_space<vmem>>, %arg7: memref<1x32xf32, #tpu.memory_space<vmem>>, %arg8: memref<1x32xf32, #tpu.memory_space<vmem>>, %arg9: memref<1x32xf32, #tpu.memory_space<vmem>>, %arg10: memref<32x128xbf16, #tpu.memory_space<vmem>>, %arg11: memref<1x128xf32, #tpu.memory_space<vmem>>, %arg12: memref<128x32xbf16, #tpu.memory_space<vmem>>, %arg13: memref<1x32xf32, #tpu.memory_space<vmem>>, %arg14: memref<1x32xf32, #tpu.memory_space<vmem>>, %arg15: memref<1x32xf32, #tpu.memory_space<vmem>>, %arg16: memref<1x8x32xf32, #tpu.memory_space<vmem>>) attributes {dimension_semantics = [#tpu.dimension_semantics<parallel>], iteration_bounds = array<i64: 2>, scalar_prefetch = 0 : i64, scratch_operands = 0 : i64, tpu.core_type = #tpu.core_type<tc>, window_params = [{transform_indices = @transform_0, window_bounds = array<i64: 1, 8, 32>}, {pipeline_mode = #tpu.pipeline_mode<synchronous>, transform_indices = @transform_1, window_bounds = array<i64: 1, 32>}, {pipeline_mode = #tpu.pipeline_mode<synchronous>, transform_indices = @transform_2, window_bounds = array<i64: 1, 32>}, {pipeline_mode = #tpu.pipeline_mode<synchronous>, transform_indices = @transform_3, window_bounds = array<i64: 32, 96>}, {pipeline_mode = #tpu.pipeline_mode<synchronous>, transform_indices = @transform_4, window_bounds = array<i64: 1, 96>}, {pipeline_mode = #tpu.pipeline_mode<synchronous>, transform_indices = @transform_5, window_bounds = array<i64: 32, 32>}, {pipeline_mode = #tpu.pipeline_mode<synchronous>, transform_indices = @transform_6, window_bounds = array<i64: 1, 32>}, {pipeline_mode = #tpu.pipeline_mode<synchronous>, transform_indices = @transform_7, window_bounds = array<i64: 1, 32>}, {pipeline_mode = #tpu.pipeline_mode<synchronous>, transform_indices = @transform_8, window_bounds = array<i64: 1, 32>}, {pipeline_mode = #tpu.pipeline_mode<synchronous>, transform_indices = @transform_9, window_bounds = array<i64: 32, 128>}, {pipeline_mode = #tpu.pipeline_mode<synchronous>, transform_indices = @transform_10, window_bounds = array<i64: 1, 128>}, {pipeline_mode = #tpu.pipeline_mode<synchronous>, transform_indices = @transform_11, window_bounds = array<i64: 128, 32>}, {pipeline_mode = #tpu.pipeline_mode<synchronous>, transform_indices = @transform_12, window_bounds = array<i64: 1, 32>}, {pipeline_mode = #tpu.pipeline_mode<synchronous>, transform_indices = @transform_13, window_bounds = array<i64: 1, 32>}, {pipeline_mode = #tpu.pipeline_mode<synchronous>, transform_indices = @transform_14, window_bounds = array<i64: 1, 32>}, {transform_indices = @transform_15, window_bounds = array<i64: 1, 8, 32>}]} {
    %c0 = arith.constant 0 : index
    %c0_0 = arith.constant 0 : index
    %c0_1 = arith.constant 0 : index
    %0 = vector.load %arg1[%c0, %c0_0, %c0_1] : memref<1x8x32xf32, #tpu.memory_space<vmem>>, vector<1x8x32xf32>
    %1 = vector.shape_cast %0 : vector<1x8x32xf32> to vector<8x32xf32>
    %c0_2 = arith.constant 0 : index
    %c0_3 = arith.constant 0 : index
    %2 = vector.load %arg2[%c0_2, %c0_3] : memref<1x32xf32, #tpu.memory_space<vmem>>, vector<1x32xf32>
    %c0_4 = arith.constant 0 : index
    %c0_5 = arith.constant 0 : index
    %3 = vector.load %arg3[%c0_4, %c0_5] : memref<1x32xf32, #tpu.memory_space<vmem>>, vector<1x32xf32>
    %cst = arith.constant dense<0.000000e+00> : vector<8xf32>
    %4 = vector.multi_reduction <add>, %1, %cst [1] : vector<8x32xf32> to vector<8xf32>
    %5 = vector.shape_cast %4 : vector<8xf32> to vector<8x1xf32>
    %cst_6 = arith.constant 3.200000e+01 : f32
    %6 = vector.broadcast %cst_6 : f32 to vector<8x1xf32>
    %7 = arith.divf %5, %6 : vector<8x1xf32>
    %8 = vector.broadcast %7 : vector<8x1xf32> to vector<8x32xf32>
    %9 = arith.subf %1, %8 : vector<8x32xf32>
    %10 = arith.mulf %9, %9 : vector<8x32xf32>
    %cst_7 = arith.constant dense<0.000000e+00> : vector<8xf32>
    %11 = vector.multi_reduction <add>, %10, %cst_7 [1] : vector<8x32xf32> to vector<8xf32>
    %12 = vector.shape_cast %11 : vector<8xf32> to vector<8x1xf32>
    %cst_8 = arith.constant 3.200000e+01 : f32
    %13 = vector.broadcast %cst_8 : f32 to vector<8x1xf32>
    %14 = arith.divf %12, %13 : vector<8x1xf32>
    %15 = vector.broadcast %7 : vector<8x1xf32> to vector<8x32xf32>
    %16 = arith.subf %1, %15 : vector<8x32xf32>
    %cst_9 = arith.constant 9.99999974E-6 : f32
    %17 = vector.broadcast %cst_9 : f32 to vector<8x1xf32>
    %18 = arith.addf %14, %17 : vector<8x1xf32>
    %19 = math.rsqrt %18 : vector<8x1xf32>
    %20 = vector.broadcast %19 : vector<8x1xf32> to vector<8x32xf32>
    %21 = arith.mulf %16, %20 : vector<8x32xf32>
    %22 = vector.broadcast %2 : vector<1x32xf32> to vector<8x32xf32>
    %23 = arith.mulf %21, %22 : vector<8x32xf32>
    %24 = vector.broadcast %3 : vector<1x32xf32> to vector<8x32xf32>
    %25 = arith.addf %23, %24 : vector<8x32xf32>
    %26 = arith.truncf %25 : vector<8x32xf32> to vector<8x32xbf16>
    %c0_10 = arith.constant 0 : index
    %c0_11 = arith.constant 0 : index
    %27 = vector.load %arg4[%c0_10, %c0_11] : memref<32x96xbf16, #tpu.memory_space<vmem>>, vector<32x96xbf16>
    %cst_12 = arith.constant dense<0.000000e+00> : vector<8x96xf32>
    %28 = tpu.matmul %26, %27, %cst_12 {dimension_numbers = #tpu.dot_dimension_numbers<[1], [0], [0], [1], [0, 0, 1, 1], [], []>} : vector<8x32xbf16>, vector<32x96xbf16>, vector<8x96xf32> -> vector<8x96xf32>
    %c0_13 = arith.constant 0 : index
    %c0_14 = arith.constant 0 : index
    %29 = vector.load %arg5[%c0_13, %c0_14] : memref<1x96xf32, #tpu.memory_space<vmem>>, vector<1x96xf32>
    %30 = vector.broadcast %29 : vector<1x96xf32> to vector<8x96xf32>
    %31 = arith.addf %28, %30 : vector<8x96xf32>
    %32 = vector.extract_strided_slice %31 {offsets = [0, 0], sizes = [8, 32], strides = [1, 1]} : vector<8x96xf32> to vector<8x32xf32>
    %33 = vector.shape_cast %32 : vector<8x32xf32> to vector<8x4x8xf32>
    %34 = vector.extract_strided_slice %31 {offsets = [0, 32], sizes = [8, 32], strides = [1, 1]} : vector<8x96xf32> to vector<8x32xf32>
    %35 = vector.shape_cast %34 : vector<8x32xf32> to vector<8x4x8xf32>
    %36 = vector.extract_strided_slice %31 {offsets = [0, 64], sizes = [8, 32], strides = [1, 1]} : vector<8x96xf32> to vector<8x32xf32>
    %37 = vector.shape_cast %36 : vector<8x32xf32> to vector<8x4x8xf32>
    %38 = arith.truncf %33 : vector<8x4x8xf32> to vector<8x4x8xbf16>
    %39 = arith.truncf %35 : vector<8x4x8xf32> to vector<8x4x8xbf16>
    "tpu.trace_start"() <{level = 10 : i32, message = "qhd,khd->hqk"}> : () -> ()
    %cst_15 = arith.constant dense<0.000000e+00> : vector<4x8x8xf32>
    %40 = tpu.matmul %38, %39, %cst_15 {dimension_numbers = #tpu.dot_dimension_numbers<[2], [2], [0], [0], [0, 1, 0, 0, 1, 0], [1], [1]>} : vector<8x4x8xbf16>, vector<8x4x8xbf16>, vector<4x8x8xf32> -> vector<4x8x8xf32>
    "tpu.trace_stop"() : () -> ()
    %cst_16 = arith.constant 0.353553385 : f32
    %41 = vector.broadcast %cst_16 : f32 to vector<4x8x8xf32>
    %42 = arith.mulf %40, %41 : vector<4x8x8xf32>
    %43 = tpu.iota {dimensions = array<i32: 0>} : vector<8x8xi32>
    %44 = tpu.iota {dimensions = array<i32: 1>} : vector<8x8xi32>
    %45 = arith.cmpi sle, %44, %43 : vector<8x8xi32>
    %46 = vector.shape_cast %45 : vector<8x8xi1> to vector<1x8x8xi1>
    %cst_17 = arith.constant -1.000000e+30 : f32
    %47 = vector.shape_cast %46 : vector<1x8x8xi1> to vector<1x8x8xi1>
    %48 = vector.broadcast %47 : vector<1x8x8xi1> to vector<4x8x8xi1>
    %49 = vector.broadcast %cst_17 : f32 to vector<4x8x8xf32>
    %50 = arith.select %48, %42, %49 : vector<4x8x8xi1>, vector<4x8x8xf32>
    %cst_18 = arith.constant dense<0xFF800000> : vector<4x8xf32>
    %51 = vector.multi_reduction <maximumf>, %50, %cst_18 [2] : vector<4x8x8xf32> to vector<4x8xf32>
    %52 = vector.shape_cast %51 : vector<4x8xf32> to vector<4x8x1xf32>
    %53 = vector.broadcast %52 : vector<4x8x1xf32> to vector<4x8x8xf32>
    %54 = arith.subf %50, %53 : vector<4x8x8xf32>
    %55 = math.exp %54 : vector<4x8x8xf32>
    %cst_19 = arith.constant dense<0.000000e+00> : vector<4x8xf32>
    %56 = vector.multi_reduction <add>, %55, %cst_19 [2] : vector<4x8x8xf32> to vector<4x8xf32>
    %57 = vector.shape_cast %56 : vector<4x8xf32> to vector<4x8x1xf32>
    %58 = tpu.reciprocal %57 {approx = true} : vector<4x8x1xf32> -> vector<4x8x1xf32>
    %59 = vector.broadcast %58 : vector<4x8x1xf32> to vector<4x8x8xf32>
    %60 = arith.mulf %55, %59 : vector<4x8x8xf32>
    %61 = arith.truncf %60 : vector<4x8x8xf32> to vector<4x8x8xbf16>
    %62 = arith.truncf %37 : vector<8x4x8xf32> to vector<8x4x8xbf16>
    "tpu.trace_start"() <{level = 10 : i32, message = "hqk,khd->qhd"}> : () -> ()
    %cst_20 = arith.constant dense<0.000000e+00> : vector<4x8x8xf32>
    %63 = tpu.matmul %62, %61, %cst_20 {dimension_numbers = #tpu.dot_dimension_numbers<[0], [2], [2], [1], [0, 1, 0, 2, 1, 1], [1], [0]>} : vector<8x4x8xbf16>, vector<4x8x8xbf16>, vector<4x8x8xf32> -> vector<4x8x8xf32>
    %64 = tpu.transpose %63, [2, 0, 1] : vector<4x8x8xf32> -> vector<8x4x8xf32>
    "tpu.trace_stop"() : () -> ()
    %65 = vector.shape_cast %64 : vector<8x4x8xf32> to vector<8x32xf32>
    %66 = arith.truncf %65 : vector<8x32xf32> to vector<8x32xbf16>
    %c0_21 = arith.constant 0 : index
    %c0_22 = arith.constant 0 : index
    %67 = vector.load %arg6[%c0_21, %c0_22] : memref<32x32xbf16, #tpu.memory_space<vmem>>, vector<32x32xbf16>
    %cst_23 = arith.constant dense<0.000000e+00> : vector<8x32xf32>
    %68 = tpu.matmul %66, %67, %cst_23 {dimension_numbers = #tpu.dot_dimension_numbers<[1], [0], [0], [1], [0, 0, 1, 1], [], []>} : vector<8x32xbf16>, vector<32x32xbf16>, vector<8x32xf32> -> vector<8x32xf32>
    %c0_24 = arith.constant 0 : index
    %c0_25 = arith.constant 0 : index
    %69 = vector.load %arg7[%c0_24, %c0_25] : memref<1x32xf32, #tpu.memory_space<vmem>>, vector<1x32xf32>
    %70 = vector.broadcast %69 : vector<1x32xf32> to vector<8x32xf32>
    %71 = arith.addf %68, %70 : vector<8x32xf32>
    %72 = arith.addf %1, %71 : vector<8x32xf32>
    %c0_26 = arith.constant 0 : index
    %c0_27 = arith.constant 0 : index
    %73 = vector.load %arg8[%c0_26, %c0_27] : memref<1x32xf32, #tpu.memory_space<vmem>>, vector<1x32xf32>
    %c0_28 = arith.constant 0 : index
    %c0_29 = arith.constant 0 : index
    %74 = vector.load %arg9[%c0_28, %c0_29] : memref<1x32xf32, #tpu.memory_space<vmem>>, vector<1x32xf32>
    %cst_30 = arith.constant dense<0.000000e+00> : vector<8xf32>
    %75 = vector.multi_reduction <add>, %72, %cst_30 [1] : vector<8x32xf32> to vector<8xf32>
    %76 = vector.shape_cast %75 : vector<8xf32> to vector<8x1xf32>
    %cst_31 = arith.constant 3.200000e+01 : f32
    %77 = vector.broadcast %cst_31 : f32 to vector<8x1xf32>
    %78 = arith.divf %76, %77 : vector<8x1xf32>
    %79 = vector.broadcast %78 : vector<8x1xf32> to vector<8x32xf32>
    %80 = arith.subf %72, %79 : vector<8x32xf32>
    %81 = arith.mulf %80, %80 : vector<8x32xf32>
    %cst_32 = arith.constant dense<0.000000e+00> : vector<8xf32>
    %82 = vector.multi_reduction <add>, %81, %cst_32 [1] : vector<8x32xf32> to vector<8xf32>
    %83 = vector.shape_cast %82 : vector<8xf32> to vector<8x1xf32>
    %cst_33 = arith.constant 3.200000e+01 : f32
    %84 = vector.broadcast %cst_33 : f32 to vector<8x1xf32>
    %85 = arith.divf %83, %84 : vector<8x1xf32>
    %86 = vector.broadcast %78 : vector<8x1xf32> to vector<8x32xf32>
    %87 = arith.subf %72, %86 : vector<8x32xf32>
    %cst_34 = arith.constant 9.99999974E-6 : f32
    %88 = vector.broadcast %cst_34 : f32 to vector<8x1xf32>
    %89 = arith.addf %85, %88 : vector<8x1xf32>
    %90 = math.rsqrt %89 : vector<8x1xf32>
    %91 = vector.broadcast %90 : vector<8x1xf32> to vector<8x32xf32>
    %92 = arith.mulf %87, %91 : vector<8x32xf32>
    %93 = vector.broadcast %73 : vector<1x32xf32> to vector<8x32xf32>
    %94 = arith.mulf %92, %93 : vector<8x32xf32>
    %95 = vector.broadcast %74 : vector<1x32xf32> to vector<8x32xf32>
    %96 = arith.addf %94, %95 : vector<8x32xf32>
    %97 = arith.truncf %96 : vector<8x32xf32> to vector<8x32xbf16>
    %c0_35 = arith.constant 0 : index
    %c0_36 = arith.constant 0 : index
    %98 = vector.load %arg10[%c0_35, %c0_36] : memref<32x128xbf16, #tpu.memory_space<vmem>>, vector<32x128xbf16>
    %cst_37 = arith.constant dense<0.000000e+00> : vector<8x128xf32>
    %99 = tpu.matmul %97, %98, %cst_37 {dimension_numbers = #tpu.dot_dimension_numbers<[1], [0], [0], [1], [0, 0, 1, 1], [], []>} : vector<8x32xbf16>, vector<32x128xbf16>, vector<8x128xf32> -> vector<8x128xf32>
    %c0_38 = arith.constant 0 : index
    %c0_39 = arith.constant 0 : index
    %100 = vector.load %arg11[%c0_38, %c0_39] : memref<1x128xf32, #tpu.memory_space<vmem>>, vector<1x128xf32>
    %101 = vector.broadcast %100 : vector<1x128xf32> to vector<8x128xf32>
    %102 = arith.addf %99, %101 : vector<8x128xf32>
    %cst_40 = arith.constant 5.000000e-01 : f32
    %103 = vector.broadcast %cst_40 : f32 to vector<8x128xf32>
    %104 = arith.mulf %103, %102 : vector<8x128xf32>
    %105 = arith.mulf %102, %102 : vector<8x128xf32>
    %106 = arith.mulf %102, %105 : vector<8x128xf32>
    %cst_41 = arith.constant 4.471500e-02 : f32
    %107 = vector.broadcast %cst_41 : f32 to vector<8x128xf32>
    %108 = arith.mulf %107, %106 : vector<8x128xf32>
    %109 = arith.addf %102, %108 : vector<8x128xf32>
    %cst_42 = arith.constant 0.797884583 : f32
    %110 = vector.broadcast %cst_42 : f32 to vector<8x128xf32>
    %111 = arith.mulf %110, %109 : vector<8x128xf32>
    %112 = math.tanh %111 : vector<8x128xf32>
    %cst_43 = arith.constant 1.000000e+00 : f32
    %113 = vector.broadcast %cst_43 : f32 to vector<8x128xf32>
    %114 = arith.addf %113, %112 : vector<8x128xf32>
    %115 = arith.mulf %104, %114 : vector<8x128xf32>
    %116 = arith.truncf %115 : vector<8x128xf32> to vector<8x128xbf16>
    %c0_44 = arith.constant 0 : index
    %c0_45 = arith.constant 0 : index
    %117 = vector.load %arg12[%c0_44, %c0_45] : memref<128x32xbf16, #tpu.memory_space<vmem>>, vector<128x32xbf16>
    %cst_46 = arith.constant dense<0.000000e+00> : vector<8x32xf32>
    %118 = tpu.matmul %116, %117, %cst_46 {dimension_numbers = #tpu.dot_dimension_numbers<[1], [0], [0], [1], [0, 0, 1, 1], [], []>} : vector<8x128xbf16>, vector<128x32xbf16>, vector<8x32xf32> -> vector<8x32xf32>
    %c0_47 = arith.constant 0 : index
    %c0_48 = arith.constant 0 : index
    %119 = vector.load %arg13[%c0_47, %c0_48] : memref<1x32xf32, #tpu.memory_space<vmem>>, vector<1x32xf32>
    %120 = vector.broadcast %119 : vector<1x32xf32> to vector<8x32xf32>
    %121 = arith.addf %118, %120 : vector<8x32xf32>
    %122 = arith.addf %72, %121 : vector<8x32xf32>
    %c0_49 = arith.constant 0 : index
    %c0_50 = arith.constant 0 : index
    %123 = vector.load %arg14[%c0_49, %c0_50] : memref<1x32xf32, #tpu.memory_space<vmem>>, vector<1x32xf32>
    %c0_51 = arith.constant 0 : index
    %c0_52 = arith.constant 0 : index
    %124 = vector.load %arg15[%c0_51, %c0_52] : memref<1x32xf32, #tpu.memory_space<vmem>>, vector<1x32xf32>
    %cst_53 = arith.constant dense<0.000000e+00> : vector<8xf32>
    %125 = vector.multi_reduction <add>, %122, %cst_53 [1] : vector<8x32xf32> to vector<8xf32>
    %126 = vector.shape_cast %125 : vector<8xf32> to vector<8x1xf32>
    %cst_54 = arith.constant 3.200000e+01 : f32
    %127 = vector.broadcast %cst_54 : f32 to vector<8x1xf32>
    %128 = arith.divf %126, %127 : vector<8x1xf32>
    %129 = vector.broadcast %128 : vector<8x1xf32> to vector<8x32xf32>
    %130 = arith.subf %122, %129 : vector<8x32xf32>
    %131 = arith.mulf %130, %130 : vector<8x32xf32>
    %cst_55 = arith.constant dense<0.000000e+00> : vector<8xf32>
    %132 = vector.multi_reduction <add>, %131, %cst_55 [1] : vector<8x32xf32> to vector<8xf32>
    %133 = vector.shape_cast %132 : vector<8xf32> to vector<8x1xf32>
    %cst_56 = arith.constant 3.200000e+01 : f32
    %134 = vector.broadcast %cst_56 : f32 to vector<8x1xf32>
    %135 = arith.divf %133, %134 : vector<8x1xf32>
    %136 = vector.broadcast %128 : vector<8x1xf32> to vector<8x32xf32>
    %137 = arith.subf %122, %136 : vector<8x32xf32>
    %cst_57 = arith.constant 9.99999974E-6 : f32
    %138 = vector.broadcast %cst_57 : f32 to vector<8x1xf32>
    %139 = arith.addf %135, %138 : vector<8x1xf32>
    %140 = math.rsqrt %139 : vector<8x1xf32>
    %141 = vector.broadcast %140 : vector<8x1xf32> to vector<8x32xf32>
    %142 = arith.mulf %137, %141 : vector<8x32xf32>
    %143 = vector.broadcast %123 : vector<1x32xf32> to vector<8x32xf32>
    %144 = arith.mulf %142, %143 : vector<8x32xf32>
    %145 = vector.broadcast %124 : vector<1x32xf32> to vector<8x32xf32>
    %146 = arith.addf %144, %145 : vector<8x32xf32>
    %c0_58 = arith.constant 0 : index
    %c0_59 = arith.constant 0 : index
    %c0_60 = arith.constant 0 : index
    %147 = vector.load %arg16[%c0_58, %c0_59, %c0_60] : memref<1x8x32xf32, #tpu.memory_space<vmem>>, vector<1x8x32xf32>
    %148 = vector.shape_cast %147 : vector<1x8x32xf32> to vector<8x32xf32>
    %149 = vector.shape_cast %146 : vector<8x32xf32> to vector<1x8x32xf32>
    tpu.vector_store %arg16[%c0_58, %c0_59, %c0_60], %149 {strides = array<i32>} : memref<1x8x32xf32, #tpu.memory_space<vmem>>, vector<1x8x32xf32>,
    return
  }
  func.func @transform_0(%arg0: i32) -> (i32, i32, i32) {
    %c0_i32 = arith.constant 0 : i32
    %c0_i32_0 = arith.constant 0 : i32
    %c0_i32_1 = arith.constant 0 : i32
    return %arg0, %c0_i32, %c0_i32_0 : i32, i32, i32
  }
  func.func @transform_1(%arg0: i32) -> (i32, i32) {
    %c0_i32 = arith.constant 0 : i32
    %c0_i32_0 = arith.constant 0 : i32
    %c0_i32_1 = arith.constant 0 : i32
    return %c0_i32, %c0_i32_0 : i32, i32
  }
  func.func @transform_2(%arg0: i32) -> (i32, i32) {
    %c0_i32 = arith.constant 0 : i32
    %c0_i32_0 = arith.constant 0 : i32
    %c0_i32_1 = arith.constant 0 : i32
    return %c0_i32, %c0_i32_0 : i32, i32
  }
  func.func @transform_3(%arg0: i32) -> (i32, i32) {
    %c0_i32 = arith.constant 0 : i32
    %c0_i32_0 = arith.constant 0 : i32
    %c0_i32_1 = arith.constant 0 : i32
    return %c0_i32, %c0_i32_0 : i32, i32
  }
  func.func @transform_4(%arg0: i32) -> (i32, i32) {
    %c0_i32 = arith.constant 0 : i32
    %c0_i32_0 = arith.constant 0 : i32
    %c0_i32_1 = arith.constant 0 : i32
    return %c0_i32, %c0_i32_0 : i32, i32
  }
  func.func @transform_5(%arg0: i32) -> (i32, i32) {
    %c0_i32 = arith.constant 0 : i32
    %c0_i32_0 = arith.constant 0 : i32
    %c0_i32_1 = arith.constant 0 : i32
    return %c0_i32, %c0_i32_0 : i32, i32
  }
  func.func @transform_6(%arg0: i32) -> (i32, i32) {
    %c0_i32 = arith.constant 0 : i32
    %c0_i32_0 = arith.constant 0 : i32
    %c0_i32_1 = arith.constant 0 : i32
    return %c0_i32, %c0_i32_0 : i32, i32
  }
  func.func @transform_7(%arg0: i32) -> (i32, i32) {
    %c0_i32 = arith.constant 0 : i32
    %c0_i32_0 = arith.constant 0 : i32
    %c0_i32_1 = arith.constant 0 : i32
    return %c0_i32, %c0_i32_0 : i32, i32
  }
  func.func @transform_8(%arg0: i32) -> (i32, i32) {
    %c0_i32 = arith.constant 0 : i32
    %c0_i32_0 = arith.constant 0 : i32
    %c0_i32_1 = arith.constant 0 : i32
    return %c0_i32, %c0_i32_0 : i32, i32
  }
  func.func @transform_9(%arg0: i32) -> (i32, i32) {
    %c0_i32 = arith.constant 0 : i32
    %c0_i32_0 = arith.constant 0 : i32
    %c0_i32_1 = arith.constant 0 : i32
    return %c0_i32, %c0_i32_0 : i32, i32
  }
  func.func @transform_10(%arg0: i32) -> (i32, i32) {
    %c0_i32 = arith.constant 0 : i32
    %c0_i32_0 = arith.constant 0 : i32
    %c0_i32_1 = arith.constant 0 : i32
    return %c0_i32, %c0_i32_0 : i32, i32
  }
  func.func @transform_11(%arg0: i32) -> (i32, i32) {
    %c0_i32 = arith.constant 0 : i32
    %c0_i32_0 = arith.constant 0 : i32
    %c0_i32_1 = arith.constant 0 : i32
    return %c0_i32, %c0_i32_0 : i32, i32
  }
  func.func @transform_12(%arg0: i32) -> (i32, i32) {
    %c0_i32 = arith.constant 0 : i32
    %c0_i32_0 = arith.constant 0 : i32
    %c0_i32_1 = arith.constant 0 : i32
    return %c0_i32, %c0_i32_0 : i32, i32
  }
  func.func @transform_13(%arg0: i32) -> (i32, i32) {
    %c0_i32 = arith.constant 0 : i32
    %c0_i32_0 = arith.constant 0 : i32
    %c0_i32_1 = arith.constant 0 : i32
    return %c0_i32, %c0_i32_0 : i32, i32
  }
  func.func @transform_14(%arg0: i32) -> (i32, i32) {
    %c0_i32 = arith.constant 0 : i32
    %c0_i32_0 = arith.constant 0 : i32
    %c0_i32_1 = arith.constant 0 : i32
    return %c0_i32, %c0_i32_0 : i32, i32
  }
  func.func @transform_15(%arg0: i32) -> (i32, i32, i32) {
    %c0_i32 = arith.constant 0 : i32
    %c0_i32_0 = arith.constant 0 : i32
    %c0_i32_1 = arith.constant 0 : i32
    return %arg0, %c0_i32, %c0_i32_0 : i32, i32, i32
  }
}

</mosaic_0001>

<bundles_post_ra>
// kernel: gpt_forward.5
= control target key start
LH: loop header
LB: loop body
LE: loop exit
PB: predicated region body
PF: predicated region fallthrough
CT: control target
= control target key end

     0   :  { %v163_v1 = vmov 0.0   ;;  %vm164_vm0 = vmmov 0   ;;  %s204_s0 = inlined_call_operand.vmem [shape: bf16[16,32], index: 0, kind: input, shape index: {}]   ;;  %s205_s1 = inlined_call_operand.vmem [shape: bf16[32,128], index: 1, kind: input, shape index: {}]   ;;  %s206_s2 = inlined_call_operand.hbm [shape: f32[16,128], index: 2, kind: output, shape index: {}]  }
   0x1   :  { %v136_v0 = vld [vmem:[%s205_s1] sm:$0xff]   ;;  %123 = vmatprep.subr.bf16.mxu0 %v163_v1  ;;  %v137_v2 = vld [vmem:[%s205_s1 + $0x8] sm:$0xff]   ;;  %127 = vmatprep.mubr.msk.bf16.mxu0 %vm164_vm0, %v163_v1 }
   0x2   :  { %124 = vmatpush3.bf16.msra.mxu0 %v136_v0 }
   0x3   :  { %125 = vmatprep.subr.bf16.mxu0 %v163_v1 }
   0x4   :  { %7 = vsyncpa [#allocation4], 0  ;;  %v138_v3 = vld [vmem:[%s204_s0] sm:$0xff]   ;;  %vm44_vm1 = vcmask 261120   ;;  %s165_s15 = smov [#allocation3]  }
   0x5   :  { %s105_s16 = sshll.u32 %s165_s15, 4  ;;  %s106_s16 = int_to_ptr.vmem [resolvable:$true] %s105_s16 }
   0x6   :  { %126 = vmatpush3.bf16.msra.mxu0 %v137_v2  ;;  %s139_s1 = scalar_lea.vmem %s106_s16, 256  ;;  %p144_p1 = scmp.lt.s32.totalorder %s106_s16, %s106_s16 }
   0x7   :  { %p140_p0 = scmp.ne.s32.totalorder %s106_s16, %s139_s1  ;;  %p145_p2 = scmp.lt.s32.totalorder %s139_s1, %s139_s1 }
   0x9   :  { %128 = vmatmul.mubr.msk.bf16.vlgmr.msra.gmra.mrb[0].mxu0 %vm44_vm1, %v138_v3  ;;  %p146_p3 = por %p145_p2, %p144_p1 }
   0xb   :  { %p147_p4 = pnand %p146_p3, %p140_p0 }
  0xdc   :  { %v82_v4 = vpop.f32.mrb[0].mxu0 }
  0xdd   :  { %98 = vst [vmem:[#allocation3] sm:$0xff] %v82_v4  ;;  %v129_v5 = vpop.f32.mrb[1].mxu0 }
  0xde   :  { %v85_v6 = vpop.f32.mrb[2].mxu0 }
  0xdf   :  { %99 = vst [vmem:[#allocation3 + $0x8] sm:$0xff] %v85_v6  ;;  %v130_v7 = vpop.f32.mrb[3].mxu0 }
  0xe0   :  { %150 = shalt.err (!%p147_p4)
}
  0xe1   :  { %s151_s18 = scalar_lea.hbm %s206_s2, 256 }
  0xe2   :  { %p152_p5 = scmp.ne.s32.totalorder %s206_s2, %s151_s18  ;;  %p155_p6 = scmp.lt.u32.totalorder %s151_s18, %s206_s2 }
  0xe4   :  { %p157_p7 = pnand %p155_p6, %p152_p5 }
  0xe6   :  { %160 = shalt.err (!%p157_p7)
}
  0xe7   :  { %s166_s23 = smov 128   ;;  %s167_s24 = smov 8  }
  0xe8   :  { %111 = dma.vmem_to_hbm [thread:$0]  %s106_s16, 256, %s206_s2, [#allocation4], %s166_s23, %s166_s23, %s167_s24  }
  0xe9   :  { %161 = dma.done.wait [#allocation4], 256  }
  0xea   :  { %162 = vsyncadd [#allocation4], 4294967040 }
  0xeb   :  { %115 = vsyncpa [#allocation4], 1 }

// kernel: gpt_forward.4
= control target key start
LH: loop header
LB: loop body
LE: loop exit
PB: predicated region body
PF: predicated region fallthrough
CT: control target
= control target key end

     0   :  { %s3170_s18 = smov 0   ;;  %s3525_s0 = inlined_call_operand.vmem [shape: f32[2,8,32], index: 0, kind: input, shape index: {}]   ;;  %s3526_s1 = inlined_call_operand.vmem [shape: f32[1,32], index: 1, kind: input, shape index: {}]   ;;  %s3527_s2 = inlined_call_operand.vmem [shape: f32[1,32], index: 2, kind: input, shape index: {}]   ;;  %s3528_s3 = inlined_call_operand.vmem [shape: bf16[32,96], index: 3, kind: input, shape index: {}]   ;;  %s3529_s4 = inlined_call_operand.vmem [shape: f32[1,96], index: 4, kind: input, shape index: {}]   ;;  %s3530_s5 = inlined_call_operand.vmem [shape: bf16[32,32], index: 5, kind: input, shape index: {}]   ;;  %s3531_s6 = inlined_call_operand.vmem [shape: f32[1,32], index: 6, kind: input, shape index: {}]   ;;  %s3532_s7 = inlined_call_operand.vmem [shape: f32[1,32], index: 7, kind: input, shape index: {}]   ;;  %s3533_s8 = inlined_call_operand.vmem [shape: f32[1,32], index: 8, kind: input, shape index: {}]   ;;  %s3534_s9 = inlined_call_operand.vmem [shape: bf16[32,128], index: 9, kind: input, shape index: {}]   ;;  %s3535_s10 = inlined_call_operand.vmem [shape: f32[1,128], index: 10, kind: input, shape index: {}]   ;;  %s3536_s11 = inlined_call_operand.vmem [shape: bf16[128,32], index: 11, kind: input, shape index: {}]   ;;  %s3537_s12 = inlined_call_operand.vmem [shape: f32[1,32], index: 12, kind: input, shape index: {}]   ;;  %s3538_s13 = inlined_call_operand.vmem [shape: f32[1,32], index: 13, kind: input, shape index: {}]   ;;  %s3539_s14 = inlined_call_operand.vmem [shape: f32[1,32], index: 14, kind: input, shape index: {}]   ;;  %s3540_s15 = inlined_call_operand.vmem [shape: f32[2,8,32], index: 15, kind: output, shape index: {}]  }
   0x1 LB: > { %s2833_s19 = sadd.s32 4294967295, %s3075_s18   ;;  %p2837_p0 = scmp.ge.s32.totalorder %s3075_s18, 1  ;;  %s3075_s18 = sphi %s3170_s18, %s25_s18  }
   0x2   : > { %p436_p1 = scmp.lt.s32.totalorder %s3075_s18, 3 }
   0x4   : > { %p437_p2 = pnand %p2837_p0, %p436_p1 }
   0x5   : > { %p482_p3 = scmp.lt.s32.totalorder (!%p437_p2), %s2833_s19, 1  ;;  %vm494_vm0 = vcmask (!%p437_p2), 261120   ;;  %v3030_v7 = vld [vmem:[%s3528_s3] sm:$0xff] (!%p437_p2)   ;;  %v3077_v8 = vmov (!%p437_p2), 0.0   ;;  %vm3078_vm1 = vmmov (!%p437_p2), 0   ;;  %v3031_v9 = vld [vmem:[%s3528_s3 + $0x8] sm:$0xff] (!%p437_p2)   ;;  %v605_v32 = vlaneseq (!%p437_p2) }
   0x6   : > { %440 = sbr.rel (%p437_p2) target bundleno = 3642 (0xe3a), region = 80  ;;  %2917 = vmatprep.subr.bf16.mxu1 (!%p437_p2), %v3077_v8  ;;  %2921 = vmatprep.mubr.msk.bf16.mxu1 (!%p437_p2), %vm3078_vm1, %v3077_v8  ;;  %v2840_v14 = vld [vmem:[%s3526_s1] ss:$0 sm:$0xff] (!%p437_p2)  ;;  %s3079_s22 = smov (!%p437_p2), 104   ;;  %v3083_v30 = vmov (!%p437_p2), 1983009808  }
   0x7   : > { %2918 = vmatpush3.bf16.msra.mxu1 (!%p437_p2), %v3030_v7  ;;  %2937 = vmatprep.subr.bf16.mxu0 (!%p437_p2), %v3077_v8  ;;  %v2841_v16 = vld [vmem:[%s3527_s2] ss:$0 sm:$0xff] (!%p437_p2)  ;;  %s3080_s24 = smov (!%p437_p2), 120   ;;  %s3081_s25 = smov (!%p437_p2), 112   ;;  %v603_v31 = vunpack.c.l.s4 (!%p437_p2), %v3083_v30  ;;  %v3233_v35 = vshrl.u32 (!%p437_p2), %v605_v32, 7  ;;  %vm1328_vm2 = vcmask (!%p437_p2), 1043456  }
   0x8   : > { %2919 = vmatprep.subr.bf16.mxu1 (!%p437_p2), %v3077_v8  ;;  %2939 = vmatprep.mubr.msk.bf16.mxu0 (!%p437_p2), %vm3078_vm1, %v3077_v8  ;;  %v2842_v20 = vld [vmem:[%s3529_s4] ss:$0 sm:$0xff] (!%p437_p2)  ;;  %s3082_s26 = smov (!%p437_p2), 96   ;;  %v3084_v37 = vmov (!%p437_p2), 1934713408   ;;  %s3086_s27 = smov (!%p437_p2), 64  }
   0x9   : > { %v604_v34 = vunpack.c.0.s8 (!%p437_p2), %v603_v31  ;;  %v635_v38 = vunpack.c.l.s4 (!%p437_p2), %v3084_v37  ;;  %vm1324_vm3 = vcmask (!%p437_p2), 64512   ;;  %s3087_s17 = smov (!%p437_p2), 16   ;;  %s3088_s21 = smov (!%p437_p2), 8   ;;  %vm2460_vm5 = vcmask (!%p437_p2), 130048  }
   0xa   : > { %vm2462_vm6 = vcmask (!%p437_p2), 195584  }
   0xb   : > { %2920 = vmatpush3.bf16.msra.mxu1 (!%p437_p2), %v3031_v9  ;;  %v3236_v40 = vsub.s32 (!%p437_p2), %v604_v34, %v3233_v35  ;;  %v636_v42 = vunpack.c.0.s8 (!%p437_p2), %v635_v38 }
   0xc   : > { %2925 = vmatprep.subr.bf16.mxu1 (!%p437_p2), %v3077_v8 }
   0xd   : > { %s3542_s19 = smov (!%p482_p3, %s2833_s19), 1  ;;  %v3242_v49 = vsub.s32 %v636_v42, %v3233_v35 }
   0xe   : > { %s2838_s20 = sshll.u32 %s3542_s19, 3 }
   0xf   : > { %s3186_s23 = scalar_lea.vmem %s3525_s0, %s2838_s20 }
  0x10   : > { %v491_v0 = vld [vmem:[%s3186_s23] sm:$0xff] }
  0x11   : > { %v495_v1 = vsel %vm494_vm0, %v491_v0, 0.0 }
  0x12   : > { %496 = vadd.xlane.f32.xlu0 %v495_v1 }
  0x9f   : > { %v497_v2 = vpop.xlane.xlu0 %496 }
  0xa0   : > { %v499_v3 = vmul.f32 0.03125, %v497_v2 }
  0xa2   : > { %v500_v4 = vsub.f32 %v491_v0, %v499_v3 }
  0xa4   : > { %v501_v5 = vmul.f32 %v500_v4, %v500_v4 }
  0xa6   : > { %v502_v6 = vsel %vm494_vm0, %v501_v5, 0.0 }
  0xa7   : > { %503 = vadd.xlane.f32.xlu0 %v502_v6 }
 0x134   : > { %v504_v10 = vpop.xlane.xlu0 %503 }
 0x135   : > { %v505_v11 = vmul.f32 0.03125, %v504_v10 }
 0x137   : > { %v506_v12 = vadd.f32 1e-05, %v505_v11 }
 0x139   : > { %3044 = vrsqrt.f32 %v506_v12 }
 0x143   : > { %v3045_v13 = vpop.eup %3044 }
 0x144   : > { %v508_v15 = vmul.f32 %v3045_v13, %v500_v4 }
 0x146   : > { %v515_v17 = vmul.f32 %v2840_v14, %v508_v15 }
 0x148   : > { %v522_v18 = vadd.f32 %v2841_v16, %v515_v17 }
 0x14a   : > { %v523_v19 = vpack.c.bf16 %v522_v18, %v522_v18 }
 0x14c   : > { %2922 = vmatmul.mubr.msk.bf16.vlgmr.msra.gmra.mrb[0].mxu1 %vm494_vm0, %v523_v19 }
 0x14d   : > { %2927 = vmatprep.mubr.msk.bf16.mxu1 %vm3078_vm1, %v3077_v8 }
 0x21f   : > { %v584_v21 = vpop.f32.mrb[0].mxu1 }
 0x220   : > { %v3217_v22 = vadd.f32 %v2842_v20, %v584_v21  ;;  %v2923_v23 = vpop.f32.mrb[1].mxu1 }
 0x221   : > { %v587_v24 = vpop.f32.mrb[2].mxu1 }
 0x222   : > { %597 = vrot.lane.b32.xlu0 %v3217_v22, %s3079_s22  ;;  %591 = vrot.lane.b32.xlu1 %v3217_v22, %s3080_s24  ;;  %v2924_v25 = vpop.f32.mrb[3].mxu1  ;;  %s3089_s22 = smov 24   ;;  %s489_s24 = scalar_lea.vmem %s3540_s15, %s2838_s20 }
 0x226   : > { %594 = vrot.lane.b32.xlu1 %v3217_v22, %s3081_s25 }
 0x22a   : > { %668 = vrot.lane.b32.xlu1 %v3217_v22, %s3082_s26 }
 0x294   : > { %v3223_v26 = vpop.permute.xlu1 %591  ;;  %v3229_v28 = vpop.permute.xlu0 %597 }
 0x295   : > { %670 = vrot.lane.b32.xlu1 %v3223_v26, %s3082_s26 }
 0x298   : > { %v3226_v27 = vpop.permute.xlu1 %594 }
 0x299   : > { %672 = vrot.lane.b32.xlu1 %v3226_v27, %s3082_s26 }
 0x29c   : > { %v669_v29 = vpop.permute.xlu1 %668 }
 0x29d   : > { %674 = vrot.lane.b32.xlu1 %v3229_v28, %s3082_s26 }
 0x307   : > { %v671_v33 = vpop.permute.xlu1 %670 }
 0x30b   : > { %v673_v36 = vpop.permute.xlu1 %672 }
 0x30c   : > { %v680_v39 = vcombine.low %v669_v29, %v673_v36  ;;  %v681_v43 = vcombine.high %v669_v29, %v673_v36 }
 0x30e   : > { %v688_v46 = vrot.slane %v680_v39, %v3236_v40  ;;  %v695_v50 = vrot.slane %v681_v43, %v3236_v40 }
 0x30f   : > { %v675_v41 = vpop.permute.xlu1 %674 }
 0x310   : > { %v696_v44 = vcombine.low %v671_v33, %v675_v41  ;;  %v697_v45 = vcombine.high %v671_v33, %v675_v41 }
 0x312   : > { %v704_v47 = vrot.slane %v696_v44, %v3236_v40  ;;  %v711_v48 = vrot.slane %v697_v45, %v3236_v40  ;;  %v3085_v44 = vmov 0  }
 0x314   : > { %v712_v51 = vcombine.low %v688_v46, %v704_v47  ;;  %v713_v52 = vcombine.high %v688_v46, %v704_v47  ;;  %v728_v55 = vcombine.low %v695_v50, %v711_v48  ;;  %v729_v61 = vcombine.high %v695_v50, %v711_v48 }
 0x316   : > { %v720_v53 = vrot.slane %v712_v51, %v3242_v49  ;;  %v727_v54 = vrot.slane %v713_v52, %v3242_v49  ;;  %v736_v60 = vrot.slane %v728_v55, %v3242_v49  ;;  %v743_v1 = vrot.slane %v729_v61, %v3242_v49 }
 0x317   : > { %v600_v61 = vcombine.low %v3217_v22, %v3226_v27 }
 0x318   : > { %v836_v56 = vpack.c.bf16 %v720_v53, %v720_v53  ;;  %v744_v57 = vcombine.high %v720_v53, %v3077_v8  ;;  %v745_v59 = vcombine.high %v727_v54, %v3077_v8  ;;  %v838_v62 = vpack.c.bf16 %v727_v54, %v727_v54 }
 0x319   : > { %v746_v0 = vcombine.high %v736_v60, %v3077_v8  ;;  %v840_v2 = vpack.c.bf16 %v736_v60, %v736_v60  ;;  %v747_v4 = vcombine.high %v743_v1, %v3077_v8  ;;  %v842_v5 = vpack.c.bf16 %v743_v1, %v743_v1 }
 0x31a   : > { %906 = vxpose.xlu1.c.b16.start.end [1/1] (short) (narrow) %v836_v56, 16  ;;  %v837_v58 = vpack.c.bf16 %v744_v57, %v744_v57  ;;  %v839_v63 = vpack.c.bf16 %v745_v59, %v745_v59  ;;  %v608_v1 = vrot.slane %v600_v61, %v3236_v40 }
 0x31b   : > { %v841_v3 = vpack.c.bf16 %v746_v0, %v746_v0  ;;  %v843_v6 = vpack.c.bf16 %v747_v4, %v747_v4  ;;  %v617_v0 = vcombine.high %v3223_v26, %v3229_v28 }
 0x31c   : > { %922 = vxpose.xlu0.c.b16.start.end [1/1] (short) (narrow) %v837_v58, 16 }
 0x31d   : > { %v631_v4 = vrot.slane %v617_v0, %v3236_v40 }
 0x31e   : > { %938 = vxpose.xlu1.c.b16.start.end [1/1] (short) (narrow) %v838_v62, 16  ;;  %v601_v62 = vcombine.high %v3217_v22, %v3226_v27 }
 0x320   : > { %954 = vxpose.xlu0.c.b16.start.end [1/1] (short) (narrow) %v839_v63, 16  ;;  %v616_v63 = vcombine.low %v3223_v26, %v3229_v28 }
 0x322   : > { %970 = vxpose.xlu1.c.b16.start.end [1/1] (short) (narrow) %v840_v2, 16  ;;  %v615_v2 = vrot.slane %v601_v62, %v3236_v40 }
 0x324   : > { %986 = vxpose.xlu0.c.b16.start.end [1/1] (short) (narrow) %v841_v3, 16  ;;  %v624_v3 = vrot.slane %v616_v63, %v3236_v40 }
 0x326   : > { %1002 = vxpose.xlu1.c.b16.start.end [1/1] (short) (narrow) %v842_v5, 16  ;;  %v632_v5 = vcombine.low %v608_v1, %v624_v3 }
 0x328   : > { %1018 = vxpose.xlu0.c.b16.start.end [1/1] (short) (narrow) %v843_v6, 16  ;;  %v633_v6 = vcombine.high %v608_v1, %v624_v3 }
 0x380   : > { %v914_v7 = vpop.trf.xlu1 }
 0x382   : > { %v930_v9 = vpop.trf.xlu0 }
 0x384   : > { %v946_v10 = vpop.trf.xlu1 }
 0x386   : > { %v962_v11 = vpop.trf.xlu0 }
 0x388   : > { %v978_v12 = vpop.trf.xlu1 }
 0x389   : > { %v1034_v14 = vcombine.low %v914_v7, %v978_v12  ;;  %v648_v7 = vcombine.low %v615_v2, %v631_v4 }
 0x38a   : > { %v994_v13 = vpop.trf.xlu0 }
 0x38b   : > { %v1068_v16 = vcombine.low %v930_v9, %v994_v13  ;;  %v1041_v19 = vrot.slane %v1034_v14, %v3236_v40  ;;  %v649_v9 = vcombine.high %v615_v2, %v631_v4 }
 0x38c   : > { %v1010_v15 = vpop.trf.xlu1 }
 0x38d   : > { %v1042_v17 = vcombine.low %v946_v10, %v1010_v15  ;;  %v1075_v23 = vrot.slane %v1068_v16, %v3236_v40 }
 0x38e   : > { %v1026_v18 = vpop.trf.xlu0 }
 0x38f   : > { %v1049_v20 = vrot.slane %v1042_v17, %v3236_v40  ;;  %v1076_v21 = vcombine.low %v962_v11, %v1026_v18  ;;  %v656_v11 = vrot.slane %v648_v7, %v3242_v49 }
 0x391   : > { %v1050_v24 = vcombine.low %v1041_v19, %v1049_v20  ;;  %v1083_v25 = vrot.slane %v1076_v21, %v3236_v40  ;;  %v1051_v29 = vcombine.high %v1041_v19, %v1049_v20  ;;  %v666_v16 = vcombine.high %v656_v11, %v3077_v8 }
 0x393   : > { %v1084_v30 = vcombine.low %v1075_v23, %v1083_v25  ;;  %v1085_v31 = vcombine.high %v1075_v23, %v1083_v25  ;;  %v1058_v33 = vrot.slane %v1050_v24, %v3242_v49  ;;  %v1065_v41 = vrot.slane %v1051_v29, %v3242_v49 }
 0x395   : > { %v1092_v34 = vrot.slane %v1084_v30, %v3242_v49  ;;  %v1099_v36 = vrot.slane %v1085_v31, %v3242_v49  ;;  %v1106_v38 = vshrl.u32 %v1058_v33, 16  ;;  %v1122_v47 = vshrl.u32 %v1065_v41, 16 }
 0x396   : > { %v1066_v48 = vcombine.high %v1058_v33, %v3085_v44  ;;  %v1067_v55 = vcombine.high %v1065_v41, %v3085_v44 }
 0x397   : > { %v1104_v37 = vpack.i.b16 %v1092_v34, %v1058_v33  ;;  %v1107_v39 = vshrl.u32 %v1092_v34, 16  ;;  %v1123_v43 = vshrl.u32 %v1099_v36, 16  ;;  %v1100_v45 = vcombine.high %v1092_v34, %v3085_v44 }
 0x398   : > { %v1120_v46 = vpack.i.b16 %v1099_v36, %v1065_v41  ;;  %v1101_v52 = vcombine.high %v1099_v36, %v3085_v44  ;;  %v1114_v54 = vshrl.u32 %v1066_v48, 16  ;;  %v1130_v59 = vshrl.u32 %v1067_v55, 16 }
 0x399   : > { %1134 = vxpose.xlu1.c.b16.start.end [1/1] (short) (narrow) %v1104_v37, 16  ;;  %v1108_v42 = vpack.i.b16 %v1107_v39, %v1106_v38  ;;  %v1124_v50 = vpack.i.b16 %v1123_v43, %v1122_v47  ;;  %v1115_v51 = vshrl.u32 %v1100_v45, 16  ;;  %v1112_v53 = vpack.i.b16 %v1100_v45, %v1066_v48 }
 0x39a   : > { %v1131_v57 = vshrl.u32 %v1101_v52, 16  ;;  %v1128_v58 = vpack.i.b16 %v1101_v52, %v1067_v55 }
 0x39b   : > { %1150 = vxpose.xlu0.c.b16.start.end [1/1] (short) (narrow) %v1108_v42, 16  ;;  %v1116_v56 = vpack.i.b16 %v1115_v51, %v1114_v54 }
 0x39c   : > { %v1132_v60 = vpack.i.b16 %v1131_v57, %v1130_v59 }
 0x39d   : > { %1198 = vxpose.xlu1.c.b16.start.end [1/1] (short) (narrow) %v1120_v46, 16 }
 0x39f   : > { %1214 = vxpose.xlu0.c.b16.start.end [1/1] (short) (narrow) %v1124_v50, 16 }
 0x3a1   : > { %1166 = vxpose.xlu1.c.b16.start.end [1/1] (short) (narrow) %v1112_v53, 16 }
 0x3a3   : > { %1182 = vxpose.xlu0.c.b16.start.end [1/1] (short) (narrow) %v1116_v56, 16 }
 0x3a5   : > { %1230 = vxpose.xlu1.c.b16.start.end [1/1] (short) (narrow) %v1128_v58, 16 }
 0x3a7   : > { %1246 = vxpose.xlu0.c.b16.start.end [1/1] (short) (narrow) %v1132_v60, 16 }
 0x3a9   : > { %748 = vrot.lane.b32.xlu1 %v3217_v22, %s3086_s27  ;;  %v640_v22 = vrot.slane %v632_v5, %v3242_v49 }
 0x3ab   : > { %v664_v14 = vcombine.high %v640_v22, %v3077_v8  ;;  %v2846_v23 = vpack.c.bf16 %v656_v11, %v640_v22 }
 0x3ad   : > { %752 = vrot.lane.b32.xlu1 %v3226_v27, %s3086_s27  ;;  %v647_v27 = vrot.slane %v633_v6, %v3242_v49  ;;  %v2848_v20 = vpack.c.bf16 %v666_v16, %v664_v14  ;;  %v851_v37 = vrot.slane %v2846_v23, %v3236_v40  ;;  %v1517_v14 = vand.u32 127, %v605_v32 }
 0x3af   : > { %v665_v15 = vcombine.high %v647_v27, %v3077_v8  ;;  %v876_v31 = vrot.slane %v2848_v20, %v3236_v40  ;;  %vm1518_vm4 = vcmp.le.s32.totalorder %v1517_v14, %v3233_v35 }
 0x3b0   : > { %750 = vrot.lane.b32.xlu0 %v3223_v26, %s3086_s27  ;;  %v663_v26 = vrot.slane %v649_v9, %v3242_v49 }
 0x3b2   : > { %v667_v17 = vcombine.high %v663_v26, %v3077_v8  ;;  %v2847_v24 = vpack.c.bf16 %v663_v26, %v647_v27 }
 0x3b4   : > { %v2849_v21 = vpack.c.bf16 %v667_v17, %v665_v15  ;;  %v859_v38 = vrot.slane %v2847_v24, %v3236_v40 }
 0x3b6   : > { %v884_v33 = vrot.slane %v2849_v21, %v3236_v40  ;;  %v860_v50 = vcombine.low %v851_v37, %v859_v38 }
 0x3b8   : > { %v885_v48 = vcombine.low %v876_v31, %v884_v33  ;;  %v867_v56 = vrot.slane %v860_v50, %v3242_v49 }
 0x3ba   : > { %v892_v54 = vrot.slane %v885_v48, %v3242_v49  ;;  %v868_v3 = vcombine.high %v867_v56, %v3085_v44 }
 0x3bc   : > { %v893_v0 = vcombine.high %v892_v54, %v3085_v44  ;;  %v896_v2 = vpack.i.b16 %v892_v54, %v867_v56  ;;  %v898_v9 = vshrl.u32 %v892_v54, 16 }
 0x3be   : > { %v902_v6 = vpack.i.b16 %v893_v0, %v868_v3  ;;  %v904_v26 = vshrl.u32 %v893_v0, 16 }
 0x3ff   : > { %v1142_v10 = vpop.trf.xlu1 }
 0x401   : > { %v1158_v12 = vpop.trf.xlu0 }
 0x403   : > { %v1206_v13 = vpop.trf.xlu1 }
 0x404   : > { %v1262_v29 = vcombine.low %v1142_v10, %v1206_v13  ;;  %v897_v10 = vshrl.u32 %v867_v56, 16 }
 0x405   : > { %v1222_v18 = vpop.trf.xlu0 }
 0x406   : > { %v1287_v34 = vcombine.low %v1158_v12, %v1222_v18  ;;  %v1269_v41 = vrot.slane %v1262_v29, %v3236_v40  ;;  %v899_v27 = vpack.i.b16 %v898_v9, %v897_v10  ;;  %v903_v12 = vshrl.u32 %v868_v3, 16 }
 0x407   : > { %v1174_v19 = vpop.trf.xlu1 }
 0x408   : > { %v1294_v45 = vrot.slane %v1287_v34, %v3236_v40  ;;  %v905_v13 = vpack.i.b16 %v904_v26, %v903_v12 }
 0x409   : > { %v1190_v25 = vpop.trf.xlu0 }
 0x40b   : > { %v1238_v30 = vpop.trf.xlu1 }
 0x40c   : > { %v1270_v36 = vcombine.low %v1174_v19, %v1238_v30 }
 0x40d   : > { %v1254_v39 = vpop.trf.xlu0 }
 0x40e   : > { %v1277_v42 = vrot.slane %v1270_v36, %v3236_v40  ;;  %v1295_v43 = vcombine.low %v1190_v25, %v1254_v39 }
 0x410   : > { %v1278_v46 = vcombine.low %v1269_v41, %v1277_v42  ;;  %v1302_v47 = vrot.slane %v1295_v43, %v3236_v40 }
 0x412   : > { %v1285_v51 = vrot.slane %v1278_v46, %v3242_v49  ;;  %v1303_v52 = vcombine.low %v1294_v45, %v1302_v47 }
 0x414   : > { %v1310_v53 = vrot.slane %v1303_v52, %v3242_v49  ;;  %v1286_v55 = vcombine.high %v1285_v51, %v3085_v44  ;;  %v1315_v59 = vshrl.u32 %v1285_v51, 16 }
 0x416   : > { %v1314_v57 = vpack.i.b16 %v1310_v53, %v1285_v51  ;;  %v1311_v58 = vcombine.high %v1310_v53, %v3085_v44  ;;  %v1316_v60 = vshrl.u32 %v1310_v53, 16  ;;  %v1321_v7 = vshrl.u32 %v1286_v55, 16 }
 0x418   : > { %v1330_v61 = vsel %vm1328_vm2, %v1314_v57, 0  ;;  %v1320_v62 = vpack.i.b16 %v1311_v58, %v1286_v55  ;;  %v1317_v63 = vpack.i.b16 %v1316_v60, %v1315_v59  ;;  %v1322_v4 = vshrl.u32 %v1311_v58, 16 }
 0x419   : > { %2926 = vmatpush3.bf16.msra.mxu1 %v1330_v61 }
 0x41a   : > { %v1422_v1 = vsel %vm1328_vm2, %v1320_v62, 0  ;;  %2931 = vmatprep.subr.bf16.mxu1 %v3077_v8  ;;  %v1376_v5 = vsel %vm1328_vm2, %v1317_v63, 0  ;;  %v1323_v22 = vpack.i.b16 %v1322_v4, %v1321_v7 }
 0x41b   : > { %2938 = vmatpush3.bf16.msra.mxu0 %v1422_v1  ;;  %v749_v48 = vpop.permute.xlu1 %748 }
 0x41c   : > { %2928 = vmatmul.mubr.msk.bf16.vlgmr.msra.gmra.mrb[4].mxu1 %vm1324_vm3, %v896_v2  ;;  %2949 = vmatprep.subr.bf16.mxu0 %v3077_v8  ;;  %v1468_v11 = vsel %vm1328_vm2, %v1323_v22, 0 }
 0x41d   : > { %2932 = vmatpush3.bf16.msra.mxu1 %v1376_v5  ;;  %2933 = vmatprep.mubr.msk.bf16.mxu1 %vm3078_vm1, %v3077_v8 }
 0x41e   : > { %2940 = vmatmul.mubr.msk.bf16.vlgmr.msra.gmra.mrb[0].mxu0 %vm1324_vm3, %v902_v6  ;;  %2943 = vmatprep.subr.bf16.mxu1 %v3077_v8 }
 0x41f   : > { %2951 = vmatprep.mubr.msk.bf16.mxu0 %vm3078_vm1, %v3077_v8  ;;  %v753_v50 = vpop.permute.xlu1 %752 }
 0x420   : > { %v760_v52 = vcombine.low %v749_v48, %v753_v50  ;;  %v761_v55 = vcombine.high %v749_v48, %v753_v50 }
 0x422   : > { %v751_v53 = vpop.permute.xlu0 %750  ;;  %v775_v59 = vrot.slane %v761_v55, %v3236_v40 }
 0x424   : > { %2934 = vmatmul.mubr.msk.bf16.vlgmr.msra.gmra.mrb[8].mxu1 %vm1324_vm3, %v899_v27 }
 0x425   : > { %2944 = vmatpush3.bf16.msra.mxu1 %v1468_v11  ;;  %2945 = vmatprep.mubr.msk.bf16.mxu1 %vm3078_vm1, %v3077_v8 }
 0x426   : > { %2955 = vmatprep.subr.bf16.mxu1 %v3077_v8 }
 0x42c   : > { %2946 = vmatmul.mubr.msk.bf16.vlgmr.msra.gmra.mrb[12].mxu1 %vm1324_vm3, %v905_v13 }
 0x42d   : > { %2957 = vmatprep.mubr.msk.bf16.mxu1 %vm3078_vm1, %v3077_v8 }
 0x4ef   : > { %v1366_v15 = vpop.f32.mrb[4].mxu1 }
 0x4f0   : > { %v1510_v16 = vmul.f32 0.35355338, %v1366_v15  ;;  %v2929_v17 = vpop.f32.mrb[5].mxu1 }
 0x4f1   : > { %v1369_v18 = vpop.f32.mrb[6].mxu1  ;;  %v1458_v19 = vpop.f32.mrb[0].mxu0 }
 0x4f2   : > { %v2930_v20 = vpop.f32.mrb[7].mxu1  ;;  %v2941_v21 = vpop.f32.mrb[1].mxu0  ;;  %v3331_v23 = vsel %vm1518_vm4, %v1510_v16, -1e+30  ;;  %v1512_v45 = vmul.f32 0.35355338, %v1458_v19 }
 0x4f3   : > { %v1461_v24 = vpop.f32.mrb[2].mxu0  ;;  %v1525_v25 = vsel %vm1324_vm3, %v3331_v23, -inf }
 0x4f4   : > { %v2942_v29 = vpop.f32.mrb[3].mxu0  ;;  %1526 = vmax.xlane.f32.xlu1 %v1525_v25  ;;  %v3347_v46 = vsel %vm1518_vm4, %v1512_v45, -1e+30 }
 0x4f5   : > { %v1531_v47 = vsel %vm1324_vm3, %v3347_v46, -inf }
 0x4f7   : > { %v1412_v32 = vpop.f32.mrb[8].mxu1 }
 0x4f8   : > { %v1511_v30 = vmul.f32 0.35355338, %v1412_v32  ;;  %v2935_v31 = vpop.f32.mrb[9].mxu1 }
 0x4f9   : > { %v1415_v33 = vpop.f32.mrb[10].mxu1 }
 0x4fa   : > { %v2936_v34 = vpop.f32.mrb[11].mxu1  ;;  %v3337_v36 = vsel %vm1518_vm4, %v1511_v30, -1e+30 }
 0x4fb   : > { %v1528_v7 = vsel %vm1324_vm3, %v3337_v36, -inf }
 0x4ff   : > { %v1504_v37 = vpop.f32.mrb[12].mxu1 }
 0x500   : > { %v1513_v38 = vmul.f32 0.35355338, %v1504_v37  ;;  %v2947_v39 = vpop.f32.mrb[13].mxu1 }
 0x501   : > { %v1507_v41 = vpop.f32.mrb[14].mxu1 }
 0x502   : > { %v2948_v42 = vpop.f32.mrb[15].mxu1  ;;  %v3341_v43 = vsel %vm1518_vm4, %v1513_v38, -1e+30 }
 0x503   : > { %v1534_v27 = vsel %vm1324_vm3, %v3341_v43, -inf }
 0x505   : > { %754 = vrot.lane.b32.xlu1 %v3229_v28, %s3086_s27  ;;  %v768_v28 = vrot.slane %v760_v52, %v3236_v40 }
 0x529   : > { %1532 = vmax.xlane.f32.xlu1 %v1531_v47 }
 0x581   : > { %v3351_v51 = vpop.xlane.xlu1 %1526 }
 0x585   : > { %v755_v54 = vpop.permute.xlu1 %754 }
 0x586   : > { %v776_v56 = vcombine.low %v751_v53, %v755_v54  ;;  %v777_v57 = vcombine.high %v751_v53, %v755_v54 }
 0x588   : > { %v784_v35 = vrot.slane %v776_v56, %v3236_v40  ;;  %v791_v58 = vrot.slane %v777_v57, %v3236_v40 }
 0x58a   : > { %v792_v60 = vcombine.low %v768_v28, %v784_v35  ;;  %v808_v62 = vcombine.low %v775_v59, %v791_v58  ;;  %v809_v3 = vcombine.high %v775_v59, %v791_v58  ;;  %v793_v9 = vcombine.high %v768_v28, %v784_v35 }
 0x58b   : > { %v1537_v35 = vsub.f32 %v3331_v23, %v3351_v51 }
 0x58c   : > { %v800_v61 = vrot.slane %v792_v60, %v3242_v49  ;;  %v816_v2 = vrot.slane %v808_v62, %v3242_v49  ;;  %v823_v5 = vrot.slane %v809_v3, %v3242_v49  ;;  %v807_v10 = vrot.slane %v793_v9, %v3242_v49 }
 0x58e   : > { %v1573_v63 = vpack.c.bf16 %v800_v61, %v800_v61  ;;  %v824_v0 = vcombine.high %v800_v61, %v3077_v8  ;;  %v1577_v4 = vpack.c.bf16 %v816_v2, %v816_v2  ;;  %v1579_v6 = vpack.c.bf16 %v823_v5, %v823_v5 }
 0x58f   : > { %v1575_v22 = vpack.c.bf16 %v807_v10, %v807_v10  ;;  %v825_v11 = vcombine.high %v807_v10, %v3077_v8  ;;  %v826_v12 = vcombine.high %v816_v2, %v3077_v8  ;;  %v827_v14 = vcombine.high %v823_v5, %v3077_v8 }
 0x590   : > { %1581 = vxpose.xlu0.c.b16.start.end [1/1] (short) (narrow) %v1573_v63, 16  ;;  %v1574_v1 = vpack.c.bf16 %v824_v0, %v824_v0 }
 0x591   : > { %v1576_v26 = vpack.c.bf16 %v825_v11, %v825_v11  ;;  %v1578_v13 = vpack.c.bf16 %v826_v12, %v826_v12  ;;  %v1580_v15 = vpack.c.bf16 %v827_v14, %v827_v14 }
 0x592   : > { %1597 = vxpose.xlu1.c.b16.start.end [1/1] (short) (narrow) %v1574_v1, 16  ;;  %v1541_v1 = vmul.f32 1.442695, %v1537_v35 }
 0x594   : > { %3046 = vpow2.f32 %v1541_v1 }
 0x596   : > { %1645 = vxpose.xlu1.c.b16.start.end [1/1] (short) (narrow) %v1577_v4, 16 }
 0x59a   : > { %1677 = vxpose.xlu1.c.b16.start.end [1/1] (short) (narrow) %v1579_v6, 16 }
 0x59d   : > { %1529 = vmax.xlane.f32.xlu0 %v1528_v7 }
 0x59e   : > { %v3047_v10 = vpop.eup %3046 }
 0x5b6   : > { %v1533_v16 = vpop.xlane.xlu1 %1532 }
 0x5b7   : > { %v1539_v2 = vsub.f32 %v3347_v46, %v1533_v16 }
 0x5b9   : > { %v1545_v7 = vmul.f32 1.442695, %v1539_v2 }
 0x5ca   : > { %1613 = vxpose.xlu0.c.b16.start.end [1/1] (short) (narrow) %v1575_v22, 16  ;;  %v1549_v22 = vsel %vm1324_vm3, %v3047_v10, 0.0 }
 0x5d7   : > { %1535 = vmax.xlane.f32.xlu0 %v1534_v27 }
 0x5f6   : > { %v1589_v17 = vpop.trf.xlu0 }
 0x5f8   : > { %v1605_v18 = vpop.trf.xlu1 }
 0x5fc   : > { %v1653_v20 = vpop.trf.xlu1 }
 0x5fd   : > { %v1709_v29 = vcombine.low %v1589_v17, %v1653_v20 }
 0x5ff   : > { %v1716_v31 = vrot.slane %v1709_v29, %v3236_v40 }
 0x600   : > { %v1685_v25 = vpop.trf.xlu1 }
 0x604   : > { %1629 = vxpose.xlu0.c.b16.start.end [1/1] (short) (narrow) %v1576_v26, 16 }
 0x608   : > { %1661 = vxpose.xlu0.c.b16.start.end [1/1] (short) (narrow) %v1578_v13, 16 }
 0x60c   : > { %1693 = vxpose.xlu0.c.b16.start.end [1/1] (short) (narrow) %v1580_v15, 16 }
 0x62a   : > { %v1530_v19 = vpop.xlane.xlu0 %1529 }
 0x62b   : > { %v1538_v61 = vsub.f32 %v3337_v36, %v1530_v19 }
 0x62d   : > { %v1543_v5 = vmul.f32 1.442695, %v1538_v61 }
 0x62f   : > { %3048 = vpow2.f32 %v1543_v5 }
 0x630   : > { %v1621_v21 = vpop.trf.xlu0  ;;  %3050 = vpow2.f32 %v1545_v7 }
 0x631   : > { %v1717_v32 = vcombine.low %v1621_v21, %v1685_v25 }
 0x633   : > { %v1724_v33 = vrot.slane %v1717_v32, %v3236_v40 }
 0x635   : > { %v1725_v38 = vcombine.low %v1716_v31, %v1724_v33  ;;  %v1726_v53 = vcombine.high %v1716_v31, %v1724_v33 }
 0x637   : > { %v1733_v47 = vrot.slane %v1725_v38, %v3242_v49  ;;  %v1740_v0 = vrot.slane %v1726_v53, %v3242_v49 }
 0x639   : > { %v1781_v54 = vshrl.u32 %v1733_v47, 16  ;;  %v1741_v57 = vcombine.high %v1733_v47, %v3085_v44  ;;  %v1797_v6 = vshrl.u32 %v1740_v0, 16  ;;  %v3049_v46 = vpop.eup %3048  ;;  %v1742_v14 = vcombine.high %v1740_v0, %v3085_v44 }
 0x63a   : > { %v3051_v27 = vpop.eup %3050 }
 0x63b   : > { %v1789_v63 = vshrl.u32 %v1741_v57, 16  ;;  %v1555_v26 = vsel %vm1324_vm3, %v3051_v27, 0.0  ;;  %v1805_v17 = vshrl.u32 %v1742_v14, 16 }
 0x664   : > { %v1536_v24 = vpop.xlane.xlu0 %1535 }
 0x665   : > { %v1540_v23 = vsub.f32 %v3341_v43, %v1536_v24  ;;  %v1552_v43 = vsel %vm1324_vm3, %v3049_v46, 0.0 }
 0x667   : > { %v1547_v9 = vmul.f32 1.442695, %v1540_v23 }
 0x669   : > { %3052 = vpow2.f32 %v1547_v9 }
 0x66a   : > { %v1637_v30 = vpop.trf.xlu0 }
 0x66e   : > { %v1669_v34 = vpop.trf.xlu0 }
 0x66f   : > { %v1743_v37 = vcombine.low %v1605_v18, %v1669_v34 }
 0x671   : > { %v1750_v42 = vrot.slane %v1743_v37, %v3236_v40 }
 0x672   : > { %v1701_v39 = vpop.trf.xlu0 }
 0x673   : > { %v1751_v41 = vcombine.low %v1637_v30, %v1701_v39  ;;  %v3053_v11 = vpop.eup %3052 }
 0x674   : > { %v1558_v12 = vsel %vm1324_vm3, %v3053_v11, 0.0 }
 0x675   : > { %v1758_v45 = vrot.slane %v1751_v41, %v3236_v40 }
 0x677   : > { %v1759_v48 = vcombine.low %v1750_v42, %v1758_v45  ;;  %v1760_v50 = vcombine.high %v1750_v42, %v1758_v45 }
 0x679   : > { %v1767_v52 = vrot.slane %v1759_v48, %v3242_v49  ;;  %v1774_v60 = vrot.slane %v1760_v50, %v3242_v49 }
 0x67b   : > { %v1779_v55 = vpack.i.b16 %v1767_v52, %v1733_v47  ;;  %v1782_v56 = vshrl.u32 %v1767_v52, 16  ;;  %v1775_v28 = vcombine.high %v1767_v52, %v3085_v44  ;;  %v1798_v4 = vshrl.u32 %v1774_v60, 16 }
 0x67c   : > { %v1795_v51 = vpack.i.b16 %v1774_v60, %v1740_v0  ;;  %v1776_v13 = vcombine.high %v1774_v60, %v3085_v44 }
 0x67d   : > { %1809 = vxpose.xlu1.c.b16.start.end [1/1] (short) (narrow) %v1779_v55, 16  ;;  %v1783_v58 = vpack.i.b16 %v1782_v56, %v1781_v54  ;;  %v1790_v59 = vshrl.u32 %v1775_v28, 16  ;;  %v1787_v62 = vpack.i.b16 %v1775_v28, %v1741_v57  ;;  %v1799_v36 = vpack.i.b16 %v1798_v4, %v1797_v6 }
 0x67e   : > { %v1806_v15 = vshrl.u32 %v1776_v13, 16  ;;  %v1803_v16 = vpack.i.b16 %v1776_v13, %v1742_v14 }
 0x67f   : > { %1825 = vxpose.xlu0.c.b16.start.end [1/1] (short) (narrow) %v1783_v58, 16  ;;  %v1791_v3 = vpack.i.b16 %v1790_v59, %v1789_v63 }
 0x680   : > { %v1807_v18 = vpack.i.b16 %v1806_v15, %v1805_v17 }
 0x681   : > { %1841 = vxpose.xlu1.c.b16.start.end [1/1] (short) (narrow) %v1787_v62, 16 }
 0x683   : > { %1857 = vxpose.xlu0.c.b16.start.end [1/1] (short) (narrow) %v1791_v3, 16 }
 0x685   : > { %1873 = vxpose.xlu1.c.b16.start.end [1/1] (short) (narrow) %v1795_v51, 16 }
 0x687   : > { %1889 = vxpose.xlu0.c.b16.start.end [1/1] (short) (narrow) %v1799_v36, 16 }
 0x692   : > { %1550 = vadd.xlane.f32.xlu1 %v1549_v22 }
 0x694   : > { %1553 = vadd.xlane.f32.xlu0 %v1552_v43 }
 0x696   : > { %1556 = vadd.xlane.f32.xlu1 %v1555_v26 }
 0x698   : > { %1559 = vadd.xlane.f32.xlu0 %v1558_v12 }
 0x6c3   : > { %1905 = vxpose.xlu1.c.b16.start.end [1/1] (short) (narrow) %v1803_v16, 16 }
 0x6c5   : > { %1921 = vxpose.xlu0.c.b16.start.end [1/1] (short) (narrow) %v1807_v18, 16 }
 0x6e3   : > { %v1817_v19 = vpop.trf.xlu1 }
 0x6e5   : > { %v1833_v20 = vpop.trf.xlu0 }
 0x6e7   : > { %v1849_v21 = vpop.trf.xlu1 }
 0x6e9   : > { %v1865_v24 = vpop.trf.xlu0 }
 0x6eb   : > { %v1881_v25 = vpop.trf.xlu1 }
 0x6ec   : > { %v1937_v34 = vcombine.low %v1817_v19, %v1881_v25 }
 0x6ed   : > { %v1897_v29 = vpop.trf.xlu0 }
 0x6ee   : > { %v1962_v39 = vcombine.low %v1833_v20, %v1897_v29  ;;  %v1944_v48 = vrot.slane %v1937_v34, %v3236_v40 }
 0x6f0   : > { %v1969_v56 = vrot.slane %v1962_v39, %v3236_v40 }
 0x71f   : > { %v1551_v32 = vpop.xlane.xlu1 %1550 }
 0x720   : > { %3054 = vrcp.f32 %v1551_v32 }
 0x721   : > { %v1554_v30 = vpop.xlane.xlu0 %1553 }
 0x722   : > { %3056 = vrcp.f32 %v1554_v30 }
 0x723   : > { %v1557_v31 = vpop.xlane.xlu1 %1556 }
 0x724   : > { %3058 = vrcp.f32 %v1557_v31 }
 0x725   : > { %v1560_v33 = vpop.xlane.xlu0 %1559 }
 0x726   : > { %3060 = vrcp.f32 %v1560_v33 }
 0x729   : > { %v1913_v37 = vpop.trf.xlu1 }
 0x72a   : > { %v3055_v38 = vpop.eup %3054  ;;  %v1945_v41 = vcombine.low %v1849_v21, %v1913_v37 }
 0x72b   : > { %v1929_v42 = vpop.trf.xlu0  ;;  %v1565_v45 = vmul.f32 %v3055_v38, %v3047_v10 }
 0x72c   : > { %v3057_v47 = vpop.eup %3056  ;;  %v1952_v50 = vrot.slane %v1945_v41, %v3236_v40  ;;  %v1970_v52 = vcombine.low %v1865_v24, %v1929_v42 }
 0x72d   : > { %v1569_v53 = vpack.c.bf16 %v1565_v45, %v1565_v45  ;;  %v1566_v54 = vmul.f32 %v3057_v47, %v3049_v46 }
 0x72e   : > { %v3059_v55 = vpop.eup %3058  ;;  %v1953_v57 = vcombine.low %v1944_v48, %v1952_v50  ;;  %v1977_v28 = vrot.slane %v1970_v52, %v3236_v40 }
 0x72f   : > { %v2003_v35 = vsel %vm1324_vm3, %v1569_v53, 0  ;;  %v1570_v58 = vpack.c.bf16 %v1566_v54, %v1566_v54  ;;  %v1567_v59 = vmul.f32 %v3059_v55, %v3051_v27  ;;  %v3032_v53 = vld [vmem:[%s3530_s5] sm:$0xff]  }
 0x730   : > { %v3061_v60 = vpop.eup %3060  ;;  %v1960_v61 = vrot.slane %v1953_v57, %v3242_v49  ;;  %v1978_v62 = vcombine.low %v1969_v56, %v1977_v28  ;;  %2950 = vmatpush3.bf16.xpose.msra.mxu0 %v2003_v35 }
 0x731   : > { %v2049_v63 = vsel %vm1324_vm3, %v1570_v58, 0  ;;  %2961 = vmatprep.subr.bf16.mxu0 %v3077_v8  ;;  %v1568_v0 = vmul.f32 %v3061_v60, %v3053_v11  ;;  %v1571_v2 = vpack.c.bf16 %v1567_v59, %v1567_v59  ;;  %v3033_v60 = vld [vmem:[%s3530_s5 + $0x8] sm:$0xff]  }
 0x732   : > { %v1985_v1 = vrot.slane %v1978_v62, %v3242_v49  ;;  %2956 = vmatpush3.bf16.xpose.msra.mxu1 %v2049_v63  ;;  %v1990_v3 = vshrl.u32 %v1960_v61, 16  ;;  %v1961_v36 = vcombine.high %v1960_v61, %v3085_v44 }
 0x733   : > { %2967 = vmatprep.subr.bf16.mxu1 %v3077_v8  ;;  %v1572_v23 = vpack.c.bf16 %v1568_v0, %v1568_v0  ;;  %v2095_v7 = vsel %vm1324_vm3, %v1571_v2, 0 }
 0x734   : > { %v1989_v4 = vpack.i.b16 %v1985_v1, %v1960_v61  ;;  %v1991_v5 = vshrl.u32 %v1985_v1, 16  ;;  %v1986_v6 = vcombine.high %v1985_v1, %v3085_v44  ;;  %v1996_v46 = vshrl.u32 %v1961_v36, 16 }
 0x735   : > { %v2141_v9 = vsel %vm1324_vm3, %v1572_v23, 0 }
 0x736   : > { %v1992_v51 = vpack.i.b16 %v1991_v5, %v1990_v3  ;;  %v1997_v10 = vshrl.u32 %v1986_v6, 16  ;;  %v1995_v22 = vpack.i.b16 %v1986_v6, %v1961_v36 }
 0x737   : > { %2952 = vmatmul.mubr.msk.bf16.vlgmr.msra.gmra.mrb[4].mxu0 %vm1324_vm3, %v1989_v4 }
 0x738   : > { %2962 = vmatpush3.bf16.xpose.msra.mxu0 %v2095_v7  ;;  %2963 = vmatprep.mubr.msk.bf16.mxu0 %vm3078_vm1, %v3077_v8  ;;  %v1998_v27 = vpack.i.b16 %v1997_v10, %v1996_v46 }
 0x739   : > { %2958 = vmatmul.mubr.msk.bf16.vlgmr.msra.gmra.mrb[16].mxu1 %vm1324_vm3, %v1992_v51  ;;  %2973 = vmatprep.subr.bf16.mxu0 %v3077_v8 }
 0x73a   : > { %2968 = vmatpush3.bf16.xpose.msra.mxu1 %v2141_v9  ;;  %2969 = vmatprep.mubr.msk.bf16.mxu1 %vm3078_vm1, %v3077_v8 }
 0x73b   : > { %2981 = vmatprep.subr.bf16.mxu1 %v3077_v8 }
 0x73f   : > { %2964 = vmatmul.mubr.msk.bf16.vlgmr.msra.gmra.mrb[8].mxu0 %vm1324_vm3, %v1995_v22 }
 0x740   : > { %2977 = vmatprep.mubr.msk.bf16.mxu0 %vm3078_vm1, %v3077_v8  ;;  %2974 = vmatpush3.bf16.msra.mxu0 %v3032_v53  ;;  %v3040_v53 = vld [vmem:[%s3536_s11 + $0x20] sm:$0xff]  }
 0x741   : > { %2970 = vmatmul.mubr.msk.bf16.vlgmr.msra.gmra.mrb[20].mxu1 %vm1324_vm3, %v1998_v27  ;;  %2975 = vmatprep.subr.bf16.mxu0 %v3077_v8 }
 0x742   : > { %2985 = vmatprep.mubr.msk.bf16.mxu1 %vm3078_vm1, %v3077_v8 }
 0x744   : > { %2976 = vmatpush3.bf16.msra.mxu0 %v3033_v60 }
 0x745   : > { %2989 = vmatprep.subr.bf16.mxu0 %v3077_v8 }
 0x80a   : > { %v2039_v44 = vpop.f32.mrb[4].mxu0 }
 0x80b   : > { %2183 = vxpose.xlu1.b32.start.end [1/1] (short) (narrow) %v2039_v44, 8  ;;  %v2953_v43 = vpop.f32.mrb[5].mxu0 }
 0x80c   : > { %v2042_v11 = vpop.f32.mrb[6].mxu0  ;;  %v2085_v26 = vpop.f32.mrb[16].mxu1 }
 0x80d   : > { %v2954_v12 = vpop.f32.mrb[7].mxu0  ;;  %2215 = vxpose.xlu0.b32.start.end [1/1] (short) (narrow) %v2085_v26, 8  ;;  %v2959_v13 = vpop.f32.mrb[17].mxu1  ;;  %v2860_v11 = vld [vmem:[%s3531_s6] ss:$0 sm:$0xff] }
 0x80e   : > { %v2088_v14 = vpop.f32.mrb[18].mxu1 }
 0x80f   : > { %v2960_v15 = vpop.f32.mrb[19].mxu1 }
 0x810   : > { %v3068_v15 = vld [vmem:[%s3186_s23] sm:$0xff] }
 0x812   : > { %v2131_v16 = vpop.f32.mrb[8].mxu0 }
 0x813   : > { %v2965_v17 = vpop.f32.mrb[9].mxu0  ;;  %2247 = vxpose.xlu0.b32.start.end [1/1] (short) (narrow) %v2131_v16, 8 }
 0x814   : > { %v2134_v18 = vpop.f32.mrb[10].mxu0  ;;  %v2177_v19 = vpop.f32.mrb[20].mxu1 }
 0x815   : > { %v2966_v20 = vpop.f32.mrb[11].mxu0  ;;  %v2971_v21 = vpop.f32.mrb[21].mxu1 }
 0x816   : > { %v2180_v24 = vpop.f32.mrb[22].mxu1 }
 0x817   : > { %2279 = vxpose.xlu0.b32.start.end [1/1] (short) (narrow) %v2177_v19, 8  ;;  %v2972_v25 = vpop.f32.mrb[23].mxu1 }
 0x88b   : > { %v2199_v30 = vpop.trf.xlu1 }
 0x88d   : > { %v2231_v29 = vpop.trf.xlu0 }
 0x893   : > { %v2263_v32 = vpop.trf.xlu0 }
 0x894   : > { %v2311_v31 = vcombine.low %v2199_v30, %v2263_v32  ;;  %v2312_v33 = vcombine.high %v2199_v30, %v2263_v32  ;;  %v3035_v32 = vld [vmem:[%s3534_s9 + $0x8] sm:$0xff]   ;;  %v3036_v30 = vld [vmem:[%s3536_s11] sm:$0xff]  }
 0x896   : > { %v2319_v39 = vrot.slane %v2311_v31, %v3236_v40  ;;  %v2326_v41 = vrot.slane %v2312_v33, %v3236_v40 }
 0x897   : > { %v2295_v34 = vpop.trf.xlu0 }
 0x898   : > { %v2327_v37 = vcombine.low %v2231_v29, %v2295_v34  ;;  %v2328_v38 = vcombine.high %v2231_v29, %v2295_v34  ;;  %v3034_v29 = vld [vmem:[%s3534_s9] sm:$0xff]  }
 0x899   : > { %2982 = vmatpush3.bf16.msra.mxu1 %v3034_v29 }
 0x89a   : > { %v2335_v42 = vrot.slane %v2327_v37, %v3236_v40  ;;  %v2342_v45 = vrot.slane %v2328_v38, %v3236_v40  ;;  %2983 = vmatprep.subr.bf16.mxu1 %v3077_v8  ;;  %v2864_v38 = vld [vmem:[%s3532_s7] ss:$0 sm:$0xff] }
 0x89c   : > { %v2343_v47 = vcombine.low %v2319_v39, %v2335_v42  ;;  %v2344_v48 = vcombine.high %v2319_v39, %v2335_v42  ;;  %v2359_v50 = vcombine.low %v2326_v41, %v2342_v45  ;;  %v2360_v52 = vcombine.high %v2326_v41, %v2342_v45  ;;  %v2865_v41 = vld [vmem:[%s3533_s8] ss:$0 sm:$0xff] }
 0x89d   : > { %2984 = vmatpush3.bf16.msra.mxu1 %v3035_v32 }
 0x89e   : > { %v2351_v54 = vrot.slane %v2343_v47, %v3242_v49  ;;  %v2358_v55 = vrot.slane %v2344_v48, %v3242_v49  ;;  %v2367_v56 = vrot.slane %v2359_v50, %v3242_v49  ;;  %v2374_v57 = vrot.slane %v2360_v52, %v3242_v49  ;;  %v3037_v48 = vld [vmem:[%s3536_s11 + $0x8] sm:$0xff]   ;;  %v3038_v50 = vld [vmem:[%s3536_s11 + $0x10] sm:$0xff]   ;;  %v3039_v52 = vld [vmem:[%s3536_s11 + $0x18] sm:$0xff]  }
 0x8a0   : > { %v2379_v28 = vcombine.low %v2351_v54, %v2358_v55  ;;  %v2858_v35 = vcombine.high %v2351_v54, %v2358_v55  ;;  %v2395_v58 = vcombine.low %v2367_v56, %v2374_v57  ;;  %v2859_v59 = vcombine.high %v2367_v56, %v2374_v57  ;;  %v3041_v54 = vld [vmem:[%s3536_s11 + $0x28] sm:$0xff]   ;;  %v3042_v55 = vld [vmem:[%s3536_s11 + $0x30] sm:$0xff]   ;;  %v3043_v56 = vld [vmem:[%s3536_s11 + $0x38] sm:$0xff]  }
 0x8a1   : > { %v2866_v57 = vld [vmem:[%s3535_s10] ss:$0 sm:$0xff] }
 0x8a2   : > { %v2386_v61 = vrot.slane %v2379_v28, %v3236_v40  ;;  %v2394_v62 = vrot.slane %v2858_v35, %v3236_v40  ;;  %v2402_v63 = vrot.slane %v2395_v58, %v3236_v40  ;;  %v2410_v0 = vrot.slane %v2859_v59, %v3236_v40 }
 0x8a4   : > { %v2412_v1 = vcombine.high %v2386_v61, %v2394_v62  ;;  %v2428_v2 = vcombine.high %v2402_v63, %v2410_v0  ;;  %v2411_v3 = vcombine.low %v2386_v61, %v2394_v62  ;;  %v2427_v4 = vcombine.low %v2402_v63, %v2410_v0 }
 0x8a6   : > { %v2426_v5 = vrot.slane %v2412_v1, %v3242_v49  ;;  %v2442_v23 = vrot.slane %v2428_v2, %v3242_v49  ;;  %v2419_v51 = vrot.slane %v2411_v3, %v3242_v49  ;;  %v2435_v6 = vrot.slane %v2427_v4, %v3242_v49 }
 0x8a8   : > { %v2445_v7 = vcombine.low %v2426_v5, %v2442_v23  ;;  %v2444_v36 = vcombine.high %v2419_v51, %v2435_v6  ;;  %v2443_v9 = vcombine.low %v2419_v51, %v2435_v6  ;;  %v2446_v40 = vcombine.high %v2426_v5, %v2442_v23  ;;  %v2870_v23 = vld [vmem:[%s3537_s12] ss:$0 sm:$0xff] }
 0x8aa   : > { %2452 = vrot.lane.b32.xlu0 %v2445_v7, %s3087_s17  ;;  %2448 = vrot.lane.b32.xlu1 %v2444_v36, %s3088_s21 }
 0x8ae   : > { %2456 = vrot.lane.b32.xlu1 %v2446_v40, %s3089_s22 }
 0x91c   : > { %v2449_v10 = vpop.permute.xlu1 %2448  ;;  %v2453_v46 = vpop.permute.xlu0 %2452 }
 0x91d   : > { %v2459_v22 = vsel %vm1324_vm3, %v2443_v9, %v2449_v10 }
 0x91e   : > { %v2461_v44 = vsel %vm2460_vm5, %v2459_v22, %v2453_v46 }
 0x920   : > { %v2457_v27 = vpop.permute.xlu1 %2456 }
 0x921   : > { %v2463_v49 = vsel %vm2462_vm6, %v2461_v44, %v2457_v27 }
 0x922   : > { %v2464_v43 = vpack.c.bf16 %v2463_v49, %v2463_v49 }
 0x924   : > { %2978 = vmatmul.mubr.msk.bf16.vlgmr.msra.gmra.mrb[12].mxu0 %vm494_vm0, %v2464_v43 }
 0x925   : > { %3005 = vmatprep.mubr.msk.bf16.mxu0 %vm3078_vm1, %v3077_v8  ;;  %2990 = vmatpush3.bf16.msra.mxu0 %v3036_v30 }
 0x926   : > { %2991 = vmatprep.subr.bf16.mxu0 %v3077_v8 }
 0x929   : > { %2992 = vmatpush3.bf16.msra.mxu0 %v3037_v48 }
 0x92a   : > { %2993 = vmatprep.subr.bf16.mxu0 %v3077_v8 }
 0x92d   : > { %2994 = vmatpush3.bf16.msra.mxu0 %v3038_v50 }
 0x92e   : > { %2995 = vmatprep.subr.bf16.mxu0 %v3077_v8 }
 0x931   : > { %2996 = vmatpush3.bf16.msra.mxu0 %v3039_v52 }
 0x932   : > { %2997 = vmatprep.subr.bf16.mxu0 %v3077_v8 }
 0x935   : > { %2998 = vmatpush3.bf16.msra.mxu0 %v3040_v53 }
 0x936   : > { %2999 = vmatprep.subr.bf16.mxu0 %v3077_v8 }
 0x939   : > { %3000 = vmatpush3.bf16.msra.mxu0 %v3041_v54 }
 0x93a   : > { %3001 = vmatprep.subr.bf16.mxu0 %v3077_v8 }
 0x93d   : > { %3002 = vmatpush3.bf16.msra.mxu0 %v3042_v55 }
 0x93e   : > { %3003 = vmatprep.subr.bf16.mxu0 %v3077_v8 }
 0x941   : > { %3004 = vmatpush3.bf16.msra.mxu0 %v3043_v56 }
 0x9f7   : > { %v2525_v26 = vpop.f32.mrb[12].mxu0 }
 0x9f8   : > { %v2526_v12 = vadd.f32 %v2860_v11, %v2525_v26  ;;  %v2979_v13 = vpop.f32.mrb[13].mxu0 }
 0x9f9   : > { %v2528_v14 = vpop.f32.mrb[14].mxu0  ;;  %v2879_v13 = vld [vmem:[%s3538_s13] ss:$0 sm:$0xff] }
 0x9fa   : > { %v3450_v16 = vadd.f32 %v3068_v15, %v2526_v12  ;;  %v2980_v17 = vpop.f32.mrb[15].mxu0  ;;  %v2880_v15 = vld [vmem:[%s3539_s14] ss:$0 sm:$0xff] }
 0x9fc   : > { %v2534_v18 = vsel %vm494_vm0, %v3450_v16, 0.0 }
 0x9fd   : > { %2535 = vadd.xlane.f32.xlu1 %v2534_v18 }
 0xa8a   : > { %v2536_v19 = vpop.xlane.xlu1 %2535 }
 0xa8b   : > { %v2537_v20 = vmul.f32 0.03125, %v2536_v19 }
 0xa8d   : > { %v2538_v21 = vsub.f32 %v3450_v16, %v2537_v20 }
 0xa8f   : > { %v2539_v24 = vmul.f32 %v2538_v21, %v2538_v21 }
 0xa91   : > { %v2540_v25 = vsel %vm494_vm0, %v2539_v24, 0.0 }
 0xa92   : > { %2541 = vadd.xlane.f32.xlu0 %v2540_v25 }
 0xb1f   : > { %v2542_v31 = vpop.xlane.xlu0 %2541 }
 0xb20   : > { %v2543_v33 = vmul.f32 0.03125, %v2542_v31 }
 0xb22   : > { %v2544_v34 = vadd.f32 1e-05, %v2543_v33 }
 0xb24   : > { %3062 = vrsqrt.f32 %v2544_v34 }
 0xb2e   : > { %v3063_v37 = vpop.eup %3062 }
 0xb2f   : > { %v2546_v39 = vmul.f32 %v3063_v37, %v2538_v21 }
 0xb31   : > { %v2553_v42 = vmul.f32 %v2864_v38, %v2546_v39 }
 0xb33   : > { %v2560_v45 = vadd.f32 %v2865_v41, %v2553_v42 }
 0xb35   : > { %v2561_v47 = vpack.c.bf16 %v2560_v45, %v2560_v45 }
 0xb37   : > { %2986 = vmatmul.mubr.msk.bf16.vlgmr.msra.gmra.mrb[24].mxu1 %vm494_vm0, %v2561_v47 }
 0xc0a   : > { %v2622_v28 = vpop.f32.mrb[24].mxu1 }
 0xc0b   : > { %v2623_v35 = vadd.f32 %v2866_v57, %v2622_v28  ;;  %v2987_v58 = vpop.f32.mrb[25].mxu1 }
 0xc0c   : > { %v2625_v59 = vpop.f32.mrb[26].mxu1 }
 0xc0d   : > { %v2629_v60 = vmul.f32 %v2623_v35, %v2623_v35  ;;  %v2988_v61 = vpop.f32.mrb[27].mxu1  ;;  %v2628_v3 = vmul.f32 0.5, %v2623_v35 }
 0xc0f   : > { %v2630_v62 = vmul.f32 %v2629_v60, %v2623_v35 }
 0xc11   : > { %v2631_v63 = vmul.f32 0.044715, %v2630_v62 }
 0xc13   : > { %v2632_v0 = vadd.f32 %v2631_v63, %v2623_v35 }
 0xc15   : > { %v2633_v1 = vmul.f32 0.7978846, %v2632_v0 }
 0xc17   : > { %3064 = vtanh.f32 %v2633_v1 }
 0xc21   : > { %v3065_v2 = vpop.eup %3064 }
 0xc22   : > { %v2635_v4 = vadd.f32 1.0, %v3065_v2 }
 0xc24   : > { %v2636_v8 = vmul.f32 %v2635_v4, %v2628_v3 }
 0xc26   : > { %v2637_v5 = vpack.c.bf16 %v2636_v8, %v2636_v8 }
 0xc28   : > { %3006 = vmatmul.mubr.bf16.vlgmr.msra.gmra.mrb[16].mxu0 %v2637_v5 }
 0xcfb   : > { %v2743_v51 = vpop.f32.mrb[16].mxu0 }
 0xcfc   : > { %v2744_v6 = vadd.f32 %v2870_v23, %v2743_v51  ;;  %v3007_v7 = vpop.f32.mrb[17].mxu0 }
 0xcfd   : > { %v2746_v36 = vpop.f32.mrb[18].mxu0 }
 0xcfe   : > { %v3008_v9 = vpop.f32.mrb[19].mxu0  ;;  %v2749_v40 = vadd.f32 %v2744_v6, %v3450_v16 }
 0xd00   : > { %v2752_v10 = vsel %vm494_vm0, %v2749_v40, 0.0 }
 0xd01   : > { %2753 = vadd.xlane.f32.xlu1 %v2752_v10 }
 0xd8e   : > { %v2754_v46 = vpop.xlane.xlu1 %2753 }
 0xd8f   : > { %v2755_v22 = vmul.f32 0.03125, %v2754_v46 }
 0xd91   : > { %v2756_v27 = vsub.f32 %v2749_v40, %v2755_v22 }
 0xd93   : > { %v2757_v44 = vmul.f32 %v2756_v27, %v2756_v27 }
 0xd95   : > { %v2758_v49 = vsel %vm494_vm0, %v2757_v44, 0.0 }
 0xd96   : > { %2759 = vadd.xlane.f32.xlu1 %v2758_v49 }
 0xe23   : > { %v2760_v43 = vpop.xlane.xlu1 %2759 }
 0xe24   : > { %v2761_v11 = vmul.f32 0.03125, %v2760_v43 }
 0xe26   : > { %v2762_v26 = vadd.f32 1e-05, %v2761_v11 }
 0xe28   : > { %3066 = vrsqrt.f32 %v2762_v26 }
 0xe32   : > { %v3067_v12 = vpop.eup %3066 }
 0xe33   : > { %v2764_v14 = vmul.f32 %v3067_v12, %v2756_v27 }
 0xe35   : > { %v2771_v16 = vmul.f32 %v2879_v13, %v2764_v14 }
 0xe37   : > { %v2778_v17 = vadd.f32 %v2880_v15, %v2771_v16 }
 0xe39   : > { %2779 = vst.msk [vmem:[%s489_s24] sm:$0xff] %vm494_vm0, %v2778_v17 }
 0xe3a PF: > { %s25_s18 = sadd.s32 1, %s3075_s18  }
 0xe3b   : > { %p22_p4 = scmp.ge.s32.totalorder %s25_s18, 4  }
 0xe3d   :  { %24 = sbr.rel (!%p22_p4) target bundleno = 1 (0x1), region = 110 }

// kernel: gpt_forward.3
= control target key start
LH: loop header
LB: loop body
LE: loop exit
PB: predicated region body
PF: predicated region fallthrough
CT: control target
= control target key end

     0   :  { %s3137_s18 = smov 0   ;;  %s3484_s0 = inlined_call_operand.vmem [shape: f32[2,8,32], index: 0, kind: input, shape index: {}]   ;;  %s3485_s1 = inlined_call_operand.vmem [shape: f32[1,32], index: 1, kind: input, shape index: {}]   ;;  %s3486_s2 = inlined_call_operand.vmem [shape: f32[1,32], index: 2, kind: input, shape index: {}]   ;;  %s3487_s3 = inlined_call_operand.vmem [shape: bf16[32,96], index: 3, kind: input, shape index: {}]   ;;  %s3488_s4 = inlined_call_operand.vmem [shape: f32[1,96], index: 4, kind: input, shape index: {}]   ;;  %s3489_s5 = inlined_call_operand.vmem [shape: bf16[32,32], index: 5, kind: input, shape index: {}]   ;;  %s3490_s6 = inlined_call_operand.vmem [shape: f32[1,32], index: 6, kind: input, shape index: {}]   ;;  %s3491_s7 = inlined_call_operand.vmem [shape: f32[1,32], index: 7, kind: input, shape index: {}]   ;;  %s3492_s8 = inlined_call_operand.vmem [shape: f32[1,32], index: 8, kind: input, shape index: {}]   ;;  %s3493_s9 = inlined_call_operand.vmem [shape: bf16[32,128], index: 9, kind: input, shape index: {}]   ;;  %s3494_s10 = inlined_call_operand.vmem [shape: f32[1,128], index: 10, kind: input, shape index: {}]   ;;  %s3495_s11 = inlined_call_operand.vmem [shape: bf16[128,32], index: 11, kind: input, shape index: {}]   ;;  %s3496_s12 = inlined_call_operand.vmem [shape: f32[1,32], index: 12, kind: input, shape index: {}]   ;;  %s3497_s13 = inlined_call_operand.vmem [shape: f32[1,32], index: 13, kind: input, shape index: {}]   ;;  %s3498_s14 = inlined_call_operand.vmem [shape: f32[1,32], index: 14, kind: input, shape index: {}]   ;;  %s3499_s15 = inlined_call_operand.vmem [shape: f32[2,8,32], index: 15, kind: output, shape index: {}]  }
   0x1 LB: > { %s2804_s19 = sadd.s32 4294967295, %s3042_s18   ;;  %p2808_p0 = scmp.ge.s32.totalorder %s3042_s18, 1  ;;  %s3042_s18 = sphi %s3137_s18, %s25_s18  }
   0x2   : > { %p436_p1 = scmp.lt.s32.totalorder %s3042_s18, 3 }
   0x4   : > { %p437_p2 = pnand %p2808_p0, %p436_p1 }
   0x5   : > { %p482_p3 = scmp.lt.s32.totalorder (!%p437_p2), %s2804_s19, 1  ;;  %vm494_vm0 = vcmask (!%p437_p2), 261120   ;;  %v2999_v7 = vld [vmem:[%s3487_s3] sm:$0xff] (!%p437_p2)   ;;  %v3044_v8 = vmov (!%p437_p2), 0.0   ;;  %vm3045_vm1 = vmmov (!%p437_p2), 0   ;;  %v3000_v9 = vld [vmem:[%s3487_s3 + $0x8] sm:$0xff] (!%p437_p2)   ;;  %v605_v32 = vlaneseq (!%p437_p2) }
   0x6   : > { %440 = sbr.rel (%p437_p2) target bundleno = 3329 (0xd01), region = 80  ;;  %2886 = vmatprep.subr.bf16.mxu1 (!%p437_p2), %v3044_v8  ;;  %2890 = vmatprep.mubr.msk.bf16.mxu1 (!%p437_p2), %vm3045_vm1, %v3044_v8  ;;  %v2811_v14 = vld [vmem:[%s3485_s1] ss:$0 sm:$0xff] (!%p437_p2)  ;;  %s3046_s17 = smov (!%p437_p2), 104   ;;  %v3050_v30 = vmov (!%p437_p2), 1983009808  }
   0x7   : > { %2887 = vmatpush3.bf16.msra.mxu1 (!%p437_p2), %v2999_v7  ;;  %2906 = vmatprep.subr.bf16.mxu0 (!%p437_p2), %v3044_v8  ;;  %v2812_v16 = vld [vmem:[%s3486_s2] ss:$0 sm:$0xff] (!%p437_p2)  ;;  %s3047_s14 = smov (!%p437_p2), 120   ;;  %s3048_s20 = smov (!%p437_p2), 112   ;;  %v603_v31 = vunpack.c.l.s4 (!%p437_p2), %v3050_v30  ;;  %v3200_v35 = vshrl.u32 (!%p437_p2), %v605_v32, 7  ;;  %vm1328_vm2 = vcmask (!%p437_p2), 1043456  }
   0x8   : > { %2888 = vmatprep.subr.bf16.mxu1 (!%p437_p2), %v3044_v8  ;;  %2908 = vmatprep.mubr.msk.bf16.mxu0 (!%p437_p2), %vm3045_vm1, %v3044_v8  ;;  %v2813_v20 = vld [vmem:[%s3488_s4] ss:$0 sm:$0xff] (!%p437_p2)  ;;  %s3049_s22 = smov (!%p437_p2), 96   ;;  %v3051_v37 = vmov (!%p437_p2), 1934713408   ;;  %s3053_s23 = smov (!%p437_p2), 64  }
   0x9   : > { %v604_v34 = vunpack.c.0.s8 (!%p437_p2), %v603_v31  ;;  %v635_v38 = vunpack.c.l.s4 (!%p437_p2), %v3051_v37  ;;  %vm1324_vm3 = vcmask (!%p437_p2), 64512   ;;  %s3054_s28 = smov (!%p437_p2), 16   ;;  %s3055_s29 = smov (!%p437_p2), 8   ;;  %vm2460_vm5 = vcmask (!%p437_p2), 130048  }
   0xa   : > { %s3056_s30 = smov (!%p437_p2), 24   ;;  %vm2462_vm6 = vcmask (!%p437_p2), 195584  }
   0xb   : > { %2889 = vmatpush3.bf16.msra.mxu1 (!%p437_p2), %v3000_v9  ;;  %v3203_v40 = vsub.s32 (!%p437_p2), %v604_v34, %v3200_v35  ;;  %v636_v42 = vunpack.c.0.s8 (!%p437_p2), %v635_v38 }
   0xc   : > { %2894 = vmatprep.subr.bf16.mxu1 (!%p437_p2), %v3044_v8 }
   0xd   : > { %s3501_s19 = smov (!%p482_p3, %s2804_s19), 1  ;;  %v3209_v49 = vsub.s32 %v636_v42, %v3200_v35 }
   0xe   : > { %s2809_s13 = sshll.u32 %s3501_s19, 3 }
   0xf   : > { %s3153_s21 = scalar_lea.vmem %s3484_s0, %s2809_s13 }
  0x10   : > { %v491_v0 = vld [vmem:[%s3153_s21] sm:$0xff] }
  0x11   : > { %v495_v1 = vsel %vm494_vm0, %v491_v0, 0.0 }
  0x12   : > { %496 = vadd.xlane.f32.xlu0 %v495_v1 }
  0x9f   : > { %v497_v2 = vpop.xlane.xlu0 %496 }
  0xa0   : > { %v499_v3 = vmul.f32 0.03125, %v497_v2 }
  0xa2   : > { %v500_v4 = vsub.f32 %v491_v0, %v499_v3 }
  0xa4   : > { %v501_v5 = vmul.f32 %v500_v4, %v500_v4 }
  0xa6   : > { %v502_v6 = vsel %vm494_vm0, %v501_v5, 0.0 }
  0xa7   : > { %503 = vadd.xlane.f32.xlu0 %v502_v6 }
 0x134   : > { %v504_v10 = vpop.xlane.xlu0 %503 }
 0x135   : > { %v505_v11 = vmul.f32 0.03125, %v504_v10 }
 0x137   : > { %v506_v12 = vadd.f32 1e-05, %v505_v11 }
 0x139   : > { %3013 = vrsqrt.f32 %v506_v12 }
 0x143   : > { %v3014_v13 = vpop.eup %3013 }
 0x144   : > { %v508_v15 = vmul.f32 %v3014_v13, %v500_v4 }
 0x146   : > { %v515_v17 = vmul.f32 %v2811_v14, %v508_v15 }
 0x148   : > { %v522_v18 = vadd.f32 %v2812_v16, %v515_v17 }
 0x14a   : > { %v523_v19 = vpack.c.bf16 %v522_v18, %v522_v18 }
 0x14c   : > { %2891 = vmatmul.mubr.msk.bf16.vlgmr.msra.gmra.mrb[0].mxu1 %vm494_vm0, %v523_v19 }
 0x14d   : > { %2896 = vmatprep.mubr.msk.bf16.mxu1 %vm3045_vm1, %v3044_v8 }
 0x21f   : > { %v584_v21 = vpop.f32.mrb[0].mxu1 }
 0x220   : > { %v3184_v22 = vadd.f32 %v2813_v20, %v584_v21  ;;  %v2892_v23 = vpop.f32.mrb[1].mxu1 }
 0x221   : > { %v587_v24 = vpop.f32.mrb[2].mxu1 }
 0x222   : > { %597 = vrot.lane.b32.xlu0 %v3184_v22, %s3046_s17  ;;  %591 = vrot.lane.b32.xlu1 %v3184_v22, %s3047_s14  ;;  %v2893_v25 = vpop.f32.mrb[3].mxu1 }
 0x226   : > { %594 = vrot.lane.b32.xlu1 %v3184_v22, %s3048_s20 }
 0x22a   : > { %668 = vrot.lane.b32.xlu1 %v3184_v22, %s3049_s22 }
 0x294   : > { %v3190_v26 = vpop.permute.xlu1 %591  ;;  %v3196_v28 = vpop.permute.xlu0 %597 }
 0x295   : > { %670 = vrot.lane.b32.xlu1 %v3190_v26, %s3049_s22 }
 0x298   : > { %v3193_v27 = vpop.permute.xlu1 %594 }
 0x299   : > { %672 = vrot.lane.b32.xlu1 %v3193_v27, %s3049_s22 }
 0x29c   : > { %v669_v29 = vpop.permute.xlu1 %668 }
 0x29d   : > { %674 = vrot.lane.b32.xlu1 %v3196_v28, %s3049_s22 }
 0x307   : > { %v671_v33 = vpop.permute.xlu1 %670 }
 0x30b   : > { %v673_v36 = vpop.permute.xlu1 %672 }
 0x30c   : > { %v680_v39 = vcombine.low %v669_v29, %v673_v36  ;;  %v681_v43 = vcombine.high %v669_v29, %v673_v36 }
 0x30e   : > { %v688_v46 = vrot.slane %v680_v39, %v3203_v40  ;;  %v695_v50 = vrot.slane %v681_v43, %v3203_v40 }
 0x30f   : > { %v675_v41 = vpop.permute.xlu1 %674 }
 0x310   : > { %v696_v44 = vcombine.low %v671_v33, %v675_v41  ;;  %v697_v45 = vcombine.high %v671_v33, %v675_v41 }
 0x312   : > { %v704_v47 = vrot.slane %v696_v44, %v3203_v40  ;;  %v711_v48 = vrot.slane %v697_v45, %v3203_v40  ;;  %v3052_v44 = vmov 0  }
 0x314   : > { %v712_v51 = vcombine.low %v688_v46, %v704_v47  ;;  %v713_v52 = vcombine.high %v688_v46, %v704_v47  ;;  %v728_v55 = vcombine.low %v695_v50, %v711_v48  ;;  %v729_v61 = vcombine.high %v695_v50, %v711_v48 }
 0x316   : > { %v720_v53 = vrot.slane %v712_v51, %v3209_v49  ;;  %v727_v54 = vrot.slane %v713_v52, %v3209_v49  ;;  %v736_v60 = vrot.slane %v728_v55, %v3209_v49  ;;  %v743_v1 = vrot.slane %v729_v61, %v3209_v49 }
 0x317   : > { %v600_v61 = vcombine.low %v3184_v22, %v3193_v27 }
 0x318   : > { %v836_v56 = vpack.c.bf16 %v720_v53, %v720_v53  ;;  %v744_v57 = vcombine.high %v720_v53, %v3044_v8  ;;  %v745_v59 = vcombine.high %v727_v54, %v3044_v8  ;;  %v838_v62 = vpack.c.bf16 %v727_v54, %v727_v54 }
 0x319   : > { %v746_v0 = vcombine.high %v736_v60, %v3044_v8  ;;  %v840_v2 = vpack.c.bf16 %v736_v60, %v736_v60  ;;  %v747_v4 = vcombine.high %v743_v1, %v3044_v8  ;;  %v842_v5 = vpack.c.bf16 %v743_v1, %v743_v1 }
 0x31a   : > { %906 = vxpose.xlu1.c.b16.start.end [1/1] (short) (narrow) %v836_v56, 16  ;;  %v837_v58 = vpack.c.bf16 %v744_v57, %v744_v57  ;;  %v839_v63 = vpack.c.bf16 %v745_v59, %v745_v59  ;;  %v608_v1 = vrot.slane %v600_v61, %v3203_v40 }
 0x31b   : > { %v841_v3 = vpack.c.bf16 %v746_v0, %v746_v0  ;;  %v843_v6 = vpack.c.bf16 %v747_v4, %v747_v4  ;;  %v617_v0 = vcombine.high %v3190_v26, %v3196_v28 }
 0x31c   : > { %922 = vxpose.xlu0.c.b16.start.end [1/1] (short) (narrow) %v837_v58, 16 }
 0x31d   : > { %v631_v4 = vrot.slane %v617_v0, %v3203_v40 }
 0x31e   : > { %938 = vxpose.xlu1.c.b16.start.end [1/1] (short) (narrow) %v838_v62, 16  ;;  %v601_v62 = vcombine.high %v3184_v22, %v3193_v27 }
 0x320   : > { %954 = vxpose.xlu0.c.b16.start.end [1/1] (short) (narrow) %v839_v63, 16  ;;  %v616_v63 = vcombine.low %v3190_v26, %v3196_v28 }
 0x322   : > { %970 = vxpose.xlu1.c.b16.start.end [1/1] (short) (narrow) %v840_v2, 16  ;;  %v615_v2 = vrot.slane %v601_v62, %v3203_v40 }
 0x324   : > { %986 = vxpose.xlu0.c.b16.start.end [1/1] (short) (narrow) %v841_v3, 16  ;;  %v624_v3 = vrot.slane %v616_v63, %v3203_v40 }
 0x326   : > { %1002 = vxpose.xlu1.c.b16.start.end [1/1] (short) (narrow) %v842_v5, 16  ;;  %v632_v5 = vcombine.low %v608_v1, %v624_v3 }
 0x328   : > { %1018 = vxpose.xlu0.c.b16.start.end [1/1] (short) (narrow) %v843_v6, 16  ;;  %v633_v6 = vcombine.high %v608_v1, %v624_v3 }
 0x380   : > { %v914_v7 = vpop.trf.xlu1 }
 0x382   : > { %v930_v9 = vpop.trf.xlu0 }
 0x384   : > { %v946_v10 = vpop.trf.xlu1 }
 0x386   : > { %v962_v11 = vpop.trf.xlu0 }
 0x388   : > { %v978_v12 = vpop.trf.xlu1 }
 0x389   : > { %v1034_v14 = vcombine.low %v914_v7, %v978_v12  ;;  %v648_v7 = vcombine.low %v615_v2, %v631_v4 }
 0x38a   : > { %v994_v13 = vpop.trf.xlu0 }
 0x38b   : > { %v1068_v16 = vcombine.low %v930_v9, %v994_v13  ;;  %v1041_v19 = vrot.slane %v1034_v14, %v3203_v40  ;;  %v649_v9 = vcombine.high %v615_v2, %v631_v4 }
 0x38c   : > { %v1010_v15 = vpop.trf.xlu1 }
 0x38d   : > { %v1042_v17 = vcombine.low %v946_v10, %v1010_v15  ;;  %v1075_v23 = vrot.slane %v1068_v16, %v3203_v40 }
 0x38e   : > { %v1026_v18 = vpop.trf.xlu0 }
 0x38f   : > { %v1049_v20 = vrot.slane %v1042_v17, %v3203_v40  ;;  %v1076_v21 = vcombine.low %v962_v11, %v1026_v18  ;;  %v656_v11 = vrot.slane %v648_v7, %v3209_v49 }
 0x391   : > { %v1050_v24 = vcombine.low %v1041_v19, %v1049_v20  ;;  %v1083_v25 = vrot.slane %v1076_v21, %v3203_v40  ;;  %v1051_v29 = vcombine.high %v1041_v19, %v1049_v20  ;;  %v666_v16 = vcombine.high %v656_v11, %v3044_v8 }
 0x393   : > { %v1084_v30 = vcombine.low %v1075_v23, %v1083_v25  ;;  %v1085_v31 = vcombine.high %v1075_v23, %v1083_v25  ;;  %v1058_v33 = vrot.slane %v1050_v24, %v3209_v49  ;;  %v1065_v41 = vrot.slane %v1051_v29, %v3209_v49 }
 0x395   : > { %v1092_v34 = vrot.slane %v1084_v30, %v3209_v49  ;;  %v1099_v36 = vrot.slane %v1085_v31, %v3209_v49  ;;  %v1106_v38 = vshrl.u32 %v1058_v33, 16  ;;  %v1122_v47 = vshrl.u32 %v1065_v41, 16 }
 0x396   : > { %v1066_v48 = vcombine.high %v1058_v33, %v3052_v44  ;;  %v1067_v55 = vcombine.high %v1065_v41, %v3052_v44 }
 0x397   : > { %v1104_v37 = vpack.i.b16 %v1092_v34, %v1058_v33  ;;  %v1107_v39 = vshrl.u32 %v1092_v34, 16  ;;  %v1123_v43 = vshrl.u32 %v1099_v36, 16  ;;  %v1100_v45 = vcombine.high %v1092_v34, %v3052_v44 }
 0x398   : > { %v1120_v46 = vpack.i.b16 %v1099_v36, %v1065_v41  ;;  %v1101_v52 = vcombine.high %v1099_v36, %v3052_v44  ;;  %v1114_v54 = vshrl.u32 %v1066_v48, 16  ;;  %v1130_v59 = vshrl.u32 %v1067_v55, 16 }
 0x399   : > { %1134 = vxpose.xlu1.c.b16.start.end [1/1] (short) (narrow) %v1104_v37, 16  ;;  %v1108_v42 = vpack.i.b16 %v1107_v39, %v1106_v38  ;;  %v1124_v50 = vpack.i.b16 %v1123_v43, %v1122_v47  ;;  %v1115_v51 = vshrl.u32 %v1100_v45, 16  ;;  %v1112_v53 = vpack.i.b16 %v1100_v45, %v1066_v48 }
 0x39a   : > { %v1131_v57 = vshrl.u32 %v1101_v52, 16  ;;  %v1128_v58 = vpack.i.b16 %v1101_v52, %v1067_v55 }
 0x39b   : > { %1150 = vxpose.xlu0.c.b16.start.end [1/1] (short) (narrow) %v1108_v42, 16  ;;  %v1116_v56 = vpack.i.b16 %v1115_v51, %v1114_v54 }
 0x39c   : > { %v1132_v60 = vpack.i.b16 %v1131_v57, %v1130_v59 }
 0x39d   : > { %1198 = vxpose.xlu1.c.b16.start.end [1/1] (short) (narrow) %v1120_v46, 16 }
 0x39f   : > { %1214 = vxpose.xlu0.c.b16.start.end [1/1] (short) (narrow) %v1124_v50, 16 }
 0x3a1   : > { %1166 = vxpose.xlu1.c.b16.start.end [1/1] (short) (narrow) %v1112_v53, 16 }
 0x3a3   : > { %1182 = vxpose.xlu0.c.b16.start.end [1/1] (short) (narrow) %v1116_v56, 16 }
 0x3a5   : > { %1230 = vxpose.xlu1.c.b16.start.end [1/1] (short) (narrow) %v1128_v58, 16 }
 0x3a7   : > { %1246 = vxpose.xlu0.c.b16.start.end [1/1] (short) (narrow) %v1132_v60, 16 }
 0x3a9   : > { %748 = vrot.lane.b32.xlu1 %v3184_v22, %s3053_s23  ;;  %v640_v22 = vrot.slane %v632_v5, %v3209_v49 }
 0x3ab   : > { %v664_v14 = vcombine.high %v640_v22, %v3044_v8  ;;  %v2817_v23 = vpack.c.bf16 %v656_v11, %v640_v22 }
 0x3ad   : > { %752 = vrot.lane.b32.xlu1 %v3193_v27, %s3053_s23  ;;  %v647_v27 = vrot.slane %v633_v6, %v3209_v49  ;;  %v2819_v20 = vpack.c.bf16 %v666_v16, %v664_v14  ;;  %v851_v37 = vrot.slane %v2817_v23, %v3203_v40  ;;  %v1517_v14 = vand.u32 127, %v605_v32 }
 0x3af   : > { %v665_v15 = vcombine.high %v647_v27, %v3044_v8  ;;  %v876_v31 = vrot.slane %v2819_v20, %v3203_v40  ;;  %vm1518_vm4 = vcmp.le.s32.totalorder %v1517_v14, %v3200_v35 }
 0x3b0   : > { %750 = vrot.lane.b32.xlu0 %v3190_v26, %s3053_s23  ;;  %v663_v26 = vrot.slane %v649_v9, %v3209_v49 }
 0x3b2   : > { %v667_v17 = vcombine.high %v663_v26, %v3044_v8  ;;  %v2818_v24 = vpack.c.bf16 %v663_v26, %v647_v27 }
 0x3b4   : > { %v2820_v21 = vpack.c.bf16 %v667_v17, %v665_v15  ;;  %v859_v38 = vrot.slane %v2818_v24, %v3203_v40 }
 0x3b6   : > { %v884_v33 = vrot.slane %v2820_v21, %v3203_v40  ;;  %v860_v50 = vcombine.low %v851_v37, %v859_v38 }
 0x3b8   : > { %v885_v48 = vcombine.low %v876_v31, %v884_v33  ;;  %v867_v56 = vrot.slane %v860_v50, %v3209_v49 }
 0x3ba   : > { %v892_v54 = vrot.slane %v885_v48, %v3209_v49  ;;  %v868_v3 = vcombine.high %v867_v56, %v3052_v44 }
 0x3bc   : > { %v893_v0 = vcombine.high %v892_v54, %v3052_v44  ;;  %v896_v2 = vpack.i.b16 %v892_v54, %v867_v56  ;;  %v898_v9 = vshrl.u32 %v892_v54, 16 }
 0x3be   : > { %v902_v6 = vpack.i.b16 %v893_v0, %v868_v3  ;;  %v904_v26 = vshrl.u32 %v893_v0, 16 }
 0x3ff   : > { %v1142_v10 = vpop.trf.xlu1 }
 0x401   : > { %v1158_v12 = vpop.trf.xlu0 }
 0x403   : > { %v1206_v13 = vpop.trf.xlu1 }
 0x404   : > { %v1262_v29 = vcombine.low %v1142_v10, %v1206_v13  ;;  %v897_v10 = vshrl.u32 %v867_v56, 16 }
 0x405   : > { %v1222_v18 = vpop.trf.xlu0 }
 0x406   : > { %v1287_v34 = vcombine.low %v1158_v12, %v1222_v18  ;;  %v1269_v41 = vrot.slane %v1262_v29, %v3203_v40  ;;  %v899_v27 = vpack.i.b16 %v898_v9, %v897_v10  ;;  %v903_v12 = vshrl.u32 %v868_v3, 16 }
 0x407   : > { %v1174_v19 = vpop.trf.xlu1 }
 0x408   : > { %v1294_v45 = vrot.slane %v1287_v34, %v3203_v40  ;;  %v905_v13 = vpack.i.b16 %v904_v26, %v903_v12 }
 0x409   : > { %v1190_v25 = vpop.trf.xlu0 }
 0x40b   : > { %v1238_v30 = vpop.trf.xlu1 }
 0x40c   : > { %v1270_v36 = vcombine.low %v1174_v19, %v1238_v30 }
 0x40d   : > { %v1254_v39 = vpop.trf.xlu0 }
 0x40e   : > { %v1277_v42 = vrot.slane %v1270_v36, %v3203_v40  ;;  %v1295_v43 = vcombine.low %v1190_v25, %v1254_v39 }
 0x410   : > { %v1278_v46 = vcombine.low %v1269_v41, %v1277_v42  ;;  %v1302_v47 = vrot.slane %v1295_v43, %v3203_v40 }
 0x412   : > { %v1285_v51 = vrot.slane %v1278_v46, %v3209_v49  ;;  %v1303_v52 = vcombine.low %v1294_v45, %v1302_v47 }
 0x414   : > { %v1310_v53 = vrot.slane %v1303_v52, %v3209_v49  ;;  %v1286_v55 = vcombine.high %v1285_v51, %v3052_v44  ;;  %v1315_v59 = vshrl.u32 %v1285_v51, 16 }
 0x416   : > { %v1314_v57 = vpack.i.b16 %v1310_v53, %v1285_v51  ;;  %v1311_v58 = vcombine.high %v1310_v53, %v3052_v44  ;;  %v1316_v60 = vshrl.u32 %v1310_v53, 16  ;;  %v1321_v7 = vshrl.u32 %v1286_v55, 16 }
 0x418   : > { %v1330_v61 = vsel %vm1328_vm2, %v1314_v57, 0  ;;  %v1320_v62 = vpack.i.b16 %v1311_v58, %v1286_v55  ;;  %v1317_v63 = vpack.i.b16 %v1316_v60, %v1315_v59  ;;  %v1322_v4 = vshrl.u32 %v1311_v58, 16 }
 0x419   : > { %2895 = vmatpush3.bf16.msra.mxu1 %v1330_v61 }
 0x41a   : > { %v1422_v1 = vsel %vm1328_vm2, %v1320_v62, 0  ;;  %2900 = vmatprep.subr.bf16.mxu1 %v3044_v8  ;;  %v1376_v5 = vsel %vm1328_vm2, %v1317_v63, 0  ;;  %v1323_v22 = vpack.i.b16 %v1322_v4, %v1321_v7 }
 0x41b   : > { %2907 = vmatpush3.bf16.msra.mxu0 %v1422_v1  ;;  %v749_v48 = vpop.permute.xlu1 %748 }
 0x41c   : > { %2897 = vmatmul.mubr.msk.bf16.vlgmr.msra.gmra.mrb[4].mxu1 %vm1324_vm3, %v896_v2  ;;  %2918 = vmatprep.subr.bf16.mxu0 %v3044_v8  ;;  %v1468_v11 = vsel %vm1328_vm2, %v1323_v22, 0 }
 0x41d   : > { %2901 = vmatpush3.bf16.msra.mxu1 %v1376_v5  ;;  %2902 = vmatprep.mubr.msk.bf16.mxu1 %vm3045_vm1, %v3044_v8 }
 0x41e   : > { %2909 = vmatmul.mubr.msk.bf16.vlgmr.msra.gmra.mrb[0].mxu0 %vm1324_vm3, %v902_v6  ;;  %2912 = vmatprep.subr.bf16.mxu1 %v3044_v8 }
 0x41f   : > { %2920 = vmatprep.mubr.msk.bf16.mxu0 %vm3045_vm1, %v3044_v8  ;;  %v753_v50 = vpop.permute.xlu1 %752 }
 0x420   : > { %v760_v52 = vcombine.low %v749_v48, %v753_v50  ;;  %v761_v55 = vcombine.high %v749_v48, %v753_v50 }
 0x422   : > { %v751_v53 = vpop.permute.xlu0 %750  ;;  %v775_v59 = vrot.slane %v761_v55, %v3203_v40 }
 0x424   : > { %2903 = vmatmul.mubr.msk.bf16.vlgmr.msra.gmra.mrb[8].mxu1 %vm1324_vm3, %v899_v27 }
 0x425   : > { %2913 = vmatpush3.bf16.msra.mxu1 %v1468_v11  ;;  %2914 = vmatprep.mubr.msk.bf16.mxu1 %vm3045_vm1, %v3044_v8 }
 0x426   : > { %2924 = vmatprep.subr.bf16.mxu1 %v3044_v8 }
 0x42c   : > { %2915 = vmatmul.mubr.msk.bf16.vlgmr.msra.gmra.mrb[12].mxu1 %vm1324_vm3, %v905_v13 }
 0x42d   : > { %2926 = vmatprep.mubr.msk.bf16.mxu1 %vm3045_vm1, %v3044_v8 }
 0x4ef   : > { %v1366_v15 = vpop.f32.mrb[4].mxu1 }
 0x4f0   : > { %v1510_v16 = vmul.f32 0.35355338, %v1366_v15  ;;  %v2898_v17 = vpop.f32.mrb[5].mxu1 }
 0x4f1   : > { %v1369_v18 = vpop.f32.mrb[6].mxu1  ;;  %v1458_v19 = vpop.f32.mrb[0].mxu0 }
 0x4f2   : > { %v2899_v20 = vpop.f32.mrb[7].mxu1  ;;  %v2910_v21 = vpop.f32.mrb[1].mxu0  ;;  %v3298_v23 = vsel %vm1518_vm4, %v1510_v16, -1e+30  ;;  %v1512_v45 = vmul.f32 0.35355338, %v1458_v19 }
 0x4f3   : > { %v1461_v24 = vpop.f32.mrb[2].mxu0  ;;  %v1525_v25 = vsel %vm1324_vm3, %v3298_v23, -inf }
 0x4f4   : > { %v2911_v29 = vpop.f32.mrb[3].mxu0  ;;  %1526 = vmax.xlane.f32.xlu1 %v1525_v25  ;;  %v3314_v46 = vsel %vm1518_vm4, %v1512_v45, -1e+30 }
 0x4f5   : > { %v1531_v47 = vsel %vm1324_vm3, %v3314_v46, -inf }
 0x4f7   : > { %v1412_v32 = vpop.f32.mrb[8].mxu1 }
 0x4f8   : > { %v1511_v30 = vmul.f32 0.35355338, %v1412_v32  ;;  %v2904_v31 = vpop.f32.mrb[9].mxu1 }
 0x4f9   : > { %v1415_v33 = vpop.f32.mrb[10].mxu1 }
 0x4fa   : > { %v2905_v34 = vpop.f32.mrb[11].mxu1  ;;  %v3304_v36 = vsel %vm1518_vm4, %v1511_v30, -1e+30 }
 0x4fb   : > { %v1528_v7 = vsel %vm1324_vm3, %v3304_v36, -inf }
 0x4ff   : > { %v1504_v37 = vpop.f32.mrb[12].mxu1 }
 0x500   : > { %v1513_v38 = vmul.f32 0.35355338, %v1504_v37  ;;  %v2916_v39 = vpop.f32.mrb[13].mxu1 }
 0x501   : > { %v1507_v41 = vpop.f32.mrb[14].mxu1 }
 0x502   : > { %v2917_v42 = vpop.f32.mrb[15].mxu1  ;;  %v3308_v43 = vsel %vm1518_vm4, %v1513_v38, -1e+30 }
 0x503   : > { %v1534_v27 = vsel %vm1324_vm3, %v3308_v43, -inf }
 0x505   : > { %754 = vrot.lane.b32.xlu1 %v3196_v28, %s3053_s23  ;;  %v768_v28 = vrot.slane %v760_v52, %v3203_v40 }
 0x529   : > { %1532 = vmax.xlane.f32.xlu1 %v1531_v47 }
 0x581   : > { %v3318_v51 = vpop.xlane.xlu1 %1526 }
 0x585   : > { %v755_v54 = vpop.permute.xlu1 %754 }
 0x586   : > { %v776_v56 = vcombine.low %v751_v53, %v755_v54  ;;  %v777_v57 = vcombine.high %v751_v53, %v755_v54 }
 0x588   : > { %v784_v35 = vrot.slane %v776_v56, %v3203_v40  ;;  %v791_v58 = vrot.slane %v777_v57, %v3203_v40 }
 0x58a   : > { %v792_v60 = vcombine.low %v768_v28, %v784_v35  ;;  %v808_v62 = vcombine.low %v775_v59, %v791_v58  ;;  %v809_v3 = vcombine.high %v775_v59, %v791_v58  ;;  %v793_v9 = vcombine.high %v768_v28, %v784_v35 }
 0x58b   : > { %v1537_v35 = vsub.f32 %v3298_v23, %v3318_v51 }
 0x58c   : > { %v800_v61 = vrot.slane %v792_v60, %v3209_v49  ;;  %v816_v2 = vrot.slane %v808_v62, %v3209_v49  ;;  %v823_v5 = vrot.slane %v809_v3, %v3209_v49  ;;  %v807_v10 = vrot.slane %v793_v9, %v3209_v49 }
 0x58e   : > { %v1573_v63 = vpack.c.bf16 %v800_v61, %v800_v61  ;;  %v824_v0 = vcombine.high %v800_v61, %v3044_v8  ;;  %v1577_v4 = vpack.c.bf16 %v816_v2, %v816_v2  ;;  %v1579_v6 = vpack.c.bf16 %v823_v5, %v823_v5 }
 0x58f   : > { %v1575_v22 = vpack.c.bf16 %v807_v10, %v807_v10  ;;  %v825_v11 = vcombine.high %v807_v10, %v3044_v8  ;;  %v826_v12 = vcombine.high %v816_v2, %v3044_v8  ;;  %v827_v14 = vcombine.high %v823_v5, %v3044_v8 }
 0x590   : > { %1581 = vxpose.xlu0.c.b16.start.end [1/1] (short) (narrow) %v1573_v63, 16  ;;  %v1574_v1 = vpack.c.bf16 %v824_v0, %v824_v0 }
 0x591   : > { %v1576_v26 = vpack.c.bf16 %v825_v11, %v825_v11  ;;  %v1578_v13 = vpack.c.bf16 %v826_v12, %v826_v12  ;;  %v1580_v15 = vpack.c.bf16 %v827_v14, %v827_v14 }
 0x592   : > { %1597 = vxpose.xlu1.c.b16.start.end [1/1] (short) (narrow) %v1574_v1, 16  ;;  %v1541_v1 = vmul.f32 1.442695, %v1537_v35 }
 0x594   : > { %3015 = vpow2.f32 %v1541_v1 }
 0x596   : > { %1645 = vxpose.xlu1.c.b16.start.end [1/1] (short) (narrow) %v1577_v4, 16 }
 0x59a   : > { %1677 = vxpose.xlu1.c.b16.start.end [1/1] (short) (narrow) %v1579_v6, 16 }
 0x59d   : > { %1529 = vmax.xlane.f32.xlu0 %v1528_v7 }
 0x59e   : > { %v3016_v10 = vpop.eup %3015 }
 0x5b6   : > { %v1533_v16 = vpop.xlane.xlu1 %1532 }
 0x5b7   : > { %v1539_v2 = vsub.f32 %v3314_v46, %v1533_v16 }
 0x5b9   : > { %v1545_v7 = vmul.f32 1.442695, %v1539_v2 }
 0x5ca   : > { %1613 = vxpose.xlu0.c.b16.start.end [1/1] (short) (narrow) %v1575_v22, 16  ;;  %v1549_v22 = vsel %vm1324_vm3, %v3016_v10, 0.0 }
 0x5d7   : > { %1535 = vmax.xlane.f32.xlu0 %v1534_v27 }
 0x5f6   : > { %v1589_v17 = vpop.trf.xlu0 }
 0x5f8   : > { %v1605_v18 = vpop.trf.xlu1 }
 0x5fc   : > { %v1653_v20 = vpop.trf.xlu1 }
 0x5fd   : > { %v1709_v29 = vcombine.low %v1589_v17, %v1653_v20 }
 0x5ff   : > { %v1716_v31 = vrot.slane %v1709_v29, %v3203_v40 }
 0x600   : > { %v1685_v25 = vpop.trf.xlu1 }
 0x604   : > { %1629 = vxpose.xlu0.c.b16.start.end [1/1] (short) (narrow) %v1576_v26, 16 }
 0x608   : > { %1661 = vxpose.xlu0.c.b16.start.end [1/1] (short) (narrow) %v1578_v13, 16 }
 0x60c   : > { %1693 = vxpose.xlu0.c.b16.start.end [1/1] (short) (narrow) %v1580_v15, 16 }
 0x62a   : > { %v1530_v19 = vpop.xlane.xlu0 %1529 }
 0x62b   : > { %v1538_v61 = vsub.f32 %v3304_v36, %v1530_v19 }
 0x62d   : > { %v1543_v5 = vmul.f32 1.442695, %v1538_v61 }
 0x62f   : > { %3017 = vpow2.f32 %v1543_v5 }
 0x630   : > { %v1621_v21 = vpop.trf.xlu0  ;;  %3019 = vpow2.f32 %v1545_v7 }
 0x631   : > { %v1717_v32 = vcombine.low %v1621_v21, %v1685_v25 }
 0x633   : > { %v1724_v33 = vrot.slane %v1717_v32, %v3203_v40 }
 0x635   : > { %v1725_v38 = vcombine.low %v1716_v31, %v1724_v33  ;;  %v1726_v53 = vcombine.high %v1716_v31, %v1724_v33 }
 0x637   : > { %v1733_v47 = vrot.slane %v1725_v38, %v3209_v49  ;;  %v1740_v0 = vrot.slane %v1726_v53, %v3209_v49 }
 0x639   : > { %v1781_v54 = vshrl.u32 %v1733_v47, 16  ;;  %v1741_v57 = vcombine.high %v1733_v47, %v3052_v44  ;;  %v1797_v6 = vshrl.u32 %v1740_v0, 16  ;;  %v3018_v46 = vpop.eup %3017  ;;  %v1742_v14 = vcombine.high %v1740_v0, %v3052_v44 }
 0x63a   : > { %v3020_v27 = vpop.eup %3019 }
 0x63b   : > { %v1789_v63 = vshrl.u32 %v1741_v57, 16  ;;  %v1555_v26 = vsel %vm1324_vm3, %v3020_v27, 0.0  ;;  %v1805_v17 = vshrl.u32 %v1742_v14, 16 }
 0x664   : > { %v1536_v24 = vpop.xlane.xlu0 %1535 }
 0x665   : > { %v1540_v23 = vsub.f32 %v3308_v43, %v1536_v24  ;;  %v1552_v43 = vsel %vm1324_vm3, %v3018_v46, 0.0 }
 0x667   : > { %v1547_v9 = vmul.f32 1.442695, %v1540_v23 }
 0x669   : > { %3021 = vpow2.f32 %v1547_v9 }
 0x66a   : > { %v1637_v30 = vpop.trf.xlu0 }
 0x66e   : > { %v1669_v34 = vpop.trf.xlu0 }
 0x66f   : > { %v1743_v37 = vcombine.low %v1605_v18, %v1669_v34 }
 0x671   : > { %v1750_v42 = vrot.slane %v1743_v37, %v3203_v40 }
 0x672   : > { %v1701_v39 = vpop.trf.xlu0 }
 0x673   : > { %v1751_v41 = vcombine.low %v1637_v30, %v1701_v39  ;;  %v3022_v11 = vpop.eup %3021 }
 0x674   : > { %v1558_v12 = vsel %vm1324_vm3, %v3022_v11, 0.0 }
 0x675   : > { %v1758_v45 = vrot.slane %v1751_v41, %v3203_v40 }
 0x677   : > { %v1759_v48 = vcombine.low %v1750_v42, %v1758_v45  ;;  %v1760_v50 = vcombine.high %v1750_v42, %v1758_v45 }
 0x679   : > { %v1767_v52 = vrot.slane %v1759_v48, %v3209_v49  ;;  %v1774_v60 = vrot.slane %v1760_v50, %v3209_v49 }
 0x67b   : > { %v1779_v55 = vpack.i.b16 %v1767_v52, %v1733_v47  ;;  %v1782_v56 = vshrl.u32 %v1767_v52, 16  ;;  %v1775_v28 = vcombine.high %v1767_v52, %v3052_v44  ;;  %v1798_v4 = vshrl.u32 %v1774_v60, 16 }
 0x67c   : > { %v1795_v51 = vpack.i.b16 %v1774_v60, %v1740_v0  ;;  %v1776_v13 = vcombine.high %v1774_v60, %v3052_v44 }
 0x67d   : > { %1809 = vxpose.xlu1.c.b16.start.end [1/1] (short) (narrow) %v1779_v55, 16  ;;  %v1783_v58 = vpack.i.b16 %v1782_v56, %v1781_v54  ;;  %v1790_v59 = vshrl.u32 %v1775_v28, 16  ;;  %v1787_v62 = vpack.i.b16 %v1775_v28, %v1741_v57  ;;  %v1799_v36 = vpack.i.b16 %v1798_v4, %v1797_v6 }
 0x67e   : > { %v1806_v15 = vshrl.u32 %v1776_v13, 16  ;;  %v1803_v16 = vpack.i.b16 %v1776_v13, %v1742_v14 }
 0x67f   : > { %1825 = vxpose.xlu0.c.b16.start.end [1/1] (short) (narrow) %v1783_v58, 16  ;;  %v1791_v3 = vpack.i.b16 %v1790_v59, %v1789_v63 }
 0x680   : > { %v1807_v18 = vpack.i.b16 %v1806_v15, %v1805_v17 }
 0x681   : > { %1841 = vxpose.xlu1.c.b16.start.end [1/1] (short) (narrow) %v1787_v62, 16 }
 0x683   : > { %1857 = vxpose.xlu0.c.b16.start.end [1/1] (short) (narrow) %v1791_v3, 16 }
 0x685   : > { %1873 = vxpose.xlu1.c.b16.start.end [1/1] (short) (narrow) %v1795_v51, 16 }
 0x687   : > { %1889 = vxpose.xlu0.c.b16.start.end [1/1] (short) (narrow) %v1799_v36, 16 }
 0x692   : > { %1550 = vadd.xlane.f32.xlu1 %v1549_v22 }
 0x694   : > { %1553 = vadd.xlane.f32.xlu0 %v1552_v43 }
 0x696   : > { %1556 = vadd.xlane.f32.xlu1 %v1555_v26 }
 0x698   : > { %1559 = vadd.xlane.f32.xlu0 %v1558_v12 }
 0x6c3   : > { %1905 = vxpose.xlu1.c.b16.start.end [1/1] (short) (narrow) %v1803_v16, 16 }
 0x6c5   : > { %1921 = vxpose.xlu0.c.b16.start.end [1/1] (short) (narrow) %v1807_v18, 16 }
 0x6e3   : > { %v1817_v19 = vpop.trf.xlu1 }
 0x6e5   : > { %v1833_v20 = vpop.trf.xlu0 }
 0x6e7   : > { %v1849_v21 = vpop.trf.xlu1 }
 0x6e9   : > { %v1865_v24 = vpop.trf.xlu0 }
 0x6eb   : > { %v1881_v25 = vpop.trf.xlu1 }
 0x6ec   : > { %v1937_v34 = vcombine.low %v1817_v19, %v1881_v25 }
 0x6ed   : > { %v1897_v29 = vpop.trf.xlu0 }
 0x6ee   : > { %v1962_v39 = vcombine.low %v1833_v20, %v1897_v29  ;;  %v1944_v48 = vrot.slane %v1937_v34, %v3203_v40 }
 0x6f0   : > { %v1969_v56 = vrot.slane %v1962_v39, %v3203_v40 }
 0x71f   : > { %v1551_v32 = vpop.xlane.xlu1 %1550 }
 0x720   : > { %3023 = vrcp.f32 %v1551_v32 }
 0x721   : > { %v1554_v30 = vpop.xlane.xlu0 %1553 }
 0x722   : > { %3025 = vrcp.f32 %v1554_v30 }
 0x723   : > { %v1557_v31 = vpop.xlane.xlu1 %1556 }
 0x724   : > { %3027 = vrcp.f32 %v1557_v31 }
 0x725   : > { %v1560_v33 = vpop.xlane.xlu0 %1559 }
 0x726   : > { %3029 = vrcp.f32 %v1560_v33 }
 0x729   : > { %v1913_v37 = vpop.trf.xlu1 }
 0x72a   : > { %v3024_v38 = vpop.eup %3023  ;;  %v1945_v41 = vcombine.low %v1849_v21, %v1913_v37 }
 0x72b   : > { %v1929_v42 = vpop.trf.xlu0  ;;  %v1565_v45 = vmul.f32 %v3024_v38, %v3016_v10 }
 0x72c   : > { %v3026_v47 = vpop.eup %3025  ;;  %v1952_v50 = vrot.slane %v1945_v41, %v3203_v40  ;;  %v1970_v52 = vcombine.low %v1865_v24, %v1929_v42 }
 0x72d   : > { %v1569_v53 = vpack.c.bf16 %v1565_v45, %v1565_v45  ;;  %v1566_v54 = vmul.f32 %v3026_v47, %v3018_v46 }
 0x72e   : > { %v3028_v55 = vpop.eup %3027  ;;  %v1953_v57 = vcombine.low %v1944_v48, %v1952_v50  ;;  %v1977_v28 = vrot.slane %v1970_v52, %v3203_v40 }
 0x72f   : > { %v2003_v35 = vsel %vm1324_vm3, %v1569_v53, 0  ;;  %v1570_v58 = vpack.c.bf16 %v1566_v54, %v1566_v54  ;;  %v1567_v59 = vmul.f32 %v3028_v55, %v3020_v27  ;;  %v3001_v53 = vld [vmem:[%s3489_s5] sm:$0xff]  }
 0x730   : > { %v3030_v60 = vpop.eup %3029  ;;  %v1960_v61 = vrot.slane %v1953_v57, %v3209_v49  ;;  %v1978_v62 = vcombine.low %v1969_v56, %v1977_v28  ;;  %2919 = vmatpush3.bf16.xpose.msra.mxu0 %v2003_v35 }
 0x731   : > { %v2049_v63 = vsel %vm1324_vm3, %v1570_v58, 0  ;;  %2930 = vmatprep.subr.bf16.mxu0 %v3044_v8  ;;  %v1568_v0 = vmul.f32 %v3030_v60, %v3022_v11  ;;  %v1571_v2 = vpack.c.bf16 %v1567_v59, %v1567_v59  ;;  %v3002_v60 = vld [vmem:[%s3489_s5 + $0x8] sm:$0xff]  }
 0x732   : > { %v1985_v1 = vrot.slane %v1978_v62, %v3209_v49  ;;  %2925 = vmatpush3.bf16.xpose.msra.mxu1 %v2049_v63  ;;  %v1990_v3 = vshrl.u32 %v1960_v61, 16  ;;  %v1961_v36 = vcombine.high %v1960_v61, %v3052_v44 }
 0x733   : > { %2936 = vmatprep.subr.bf16.mxu1 %v3044_v8  ;;  %v1572_v23 = vpack.c.bf16 %v1568_v0, %v1568_v0  ;;  %v2095_v7 = vsel %vm1324_vm3, %v1571_v2, 0 }
 0x734   : > { %v1989_v4 = vpack.i.b16 %v1985_v1, %v1960_v61  ;;  %v1991_v5 = vshrl.u32 %v1985_v1, 16  ;;  %v1986_v6 = vcombine.high %v1985_v1, %v3052_v44  ;;  %v1996_v46 = vshrl.u32 %v1961_v36, 16 }
 0x735   : > { %v2141_v9 = vsel %vm1324_vm3, %v1572_v23, 0 }
 0x736   : > { %v1992_v51 = vpack.i.b16 %v1991_v5, %v1990_v3  ;;  %v1997_v10 = vshrl.u32 %v1986_v6, 16  ;;  %v1995_v22 = vpack.i.b16 %v1986_v6, %v1961_v36 }
 0x737   : > { %2921 = vmatmul.mubr.msk.bf16.vlgmr.msra.gmra.mrb[4].mxu0 %vm1324_vm3, %v1989_v4 }
 0x738   : > { %2931 = vmatpush3.bf16.xpose.msra.mxu0 %v2095_v7  ;;  %2932 = vmatprep.mubr.msk.bf16.mxu0 %vm3045_vm1, %v3044_v8  ;;  %v1998_v27 = vpack.i.b16 %v1997_v10, %v1996_v46 }
 0x739   : > { %2927 = vmatmul.mubr.msk.bf16.vlgmr.msra.gmra.mrb[16].mxu1 %vm1324_vm3, %v1992_v51  ;;  %2942 = vmatprep.subr.bf16.mxu0 %v3044_v8 }
 0x73a   : > { %2937 = vmatpush3.bf16.xpose.msra.mxu1 %v2141_v9  ;;  %2938 = vmatprep.mubr.msk.bf16.mxu1 %vm3045_vm1, %v3044_v8 }
 0x73b   : > { %2950 = vmatprep.subr.bf16.mxu1 %v3044_v8 }
 0x73f   : > { %2933 = vmatmul.mubr.msk.bf16.vlgmr.msra.gmra.mrb[8].mxu0 %vm1324_vm3, %v1995_v22 }
 0x740   : > { %2946 = vmatprep.mubr.msk.bf16.mxu0 %vm3045_vm1, %v3044_v8  ;;  %2943 = vmatpush3.bf16.msra.mxu0 %v3001_v53  ;;  %v3009_v53 = vld [vmem:[%s3495_s11 + $0x20] sm:$0xff]  }
 0x741   : > { %2939 = vmatmul.mubr.msk.bf16.vlgmr.msra.gmra.mrb[20].mxu1 %vm1324_vm3, %v1998_v27  ;;  %2944 = vmatprep.subr.bf16.mxu0 %v3044_v8 }
 0x742   : > { %2954 = vmatprep.mubr.msk.bf16.mxu1 %vm3045_vm1, %v3044_v8 }
 0x744   : > { %2945 = vmatpush3.bf16.msra.mxu0 %v3002_v60 }
 0x745   : > { %2958 = vmatprep.subr.bf16.mxu0 %v3044_v8 }
 0x80a   : > { %v2039_v44 = vpop.f32.mrb[4].mxu0 }
 0x80b   : > { %2183 = vxpose.xlu1.b32.start.end [1/1] (short) (narrow) %v2039_v44, 8  ;;  %v2922_v43 = vpop.f32.mrb[5].mxu0 }
 0x80c   : > { %v2042_v11 = vpop.f32.mrb[6].mxu0  ;;  %v2085_v26 = vpop.f32.mrb[16].mxu1 }
 0x80d   : > { %v2923_v12 = vpop.f32.mrb[7].mxu0  ;;  %2215 = vxpose.xlu0.b32.start.end [1/1] (short) (narrow) %v2085_v26, 8  ;;  %v2928_v13 = vpop.f32.mrb[17].mxu1  ;;  %v2831_v11 = vld [vmem:[%s3490_s6] ss:$0 sm:$0xff] }
 0x80e   : > { %v2088_v14 = vpop.f32.mrb[18].mxu1 }
 0x80f   : > { %v2929_v15 = vpop.f32.mrb[19].mxu1 }
 0x810   : > { %v3035_v15 = vld [vmem:[%s3153_s21] sm:$0xff]  ;;  %s489_s21 = scalar_lea.vmem %s3499_s15, %s2809_s13 }
 0x812   : > { %v2131_v16 = vpop.f32.mrb[8].mxu0 }
 0x813   : > { %v2934_v17 = vpop.f32.mrb[9].mxu0  ;;  %2247 = vxpose.xlu0.b32.start.end [1/1] (short) (narrow) %v2131_v16, 8 }
 0x814   : > { %v2134_v18 = vpop.f32.mrb[10].mxu0  ;;  %v2177_v19 = vpop.f32.mrb[20].mxu1 }
 0x815   : > { %v2935_v20 = vpop.f32.mrb[11].mxu0  ;;  %v2940_v21 = vpop.f32.mrb[21].mxu1 }
 0x816   : > { %v2180_v24 = vpop.f32.mrb[22].mxu1 }
 0x817   : > { %2279 = vxpose.xlu0.b32.start.end [1/1] (short) (narrow) %v2177_v19, 8  ;;  %v2941_v25 = vpop.f32.mrb[23].mxu1 }
 0x88b   : > { %v2199_v30 = vpop.trf.xlu1 }
 0x88d   : > { %v2231_v29 = vpop.trf.xlu0 }
 0x893   : > { %v2263_v32 = vpop.trf.xlu0 }
 0x894   : > { %v2311_v31 = vcombine.low %v2199_v30, %v2263_v32  ;;  %v2312_v33 = vcombine.high %v2199_v30, %v2263_v32  ;;  %v3004_v32 = vld [vmem:[%s3493_s9 + $0x8] sm:$0xff]   ;;  %v3005_v30 = vld [vmem:[%s3495_s11] sm:$0xff]  }
 0x896   : > { %v2319_v39 = vrot.slane %v2311_v31, %v3203_v40  ;;  %v2326_v41 = vrot.slane %v2312_v33, %v3203_v40 }
 0x897   : > { %v2295_v34 = vpop.trf.xlu0 }
 0x898   : > { %v2327_v37 = vcombine.low %v2231_v29, %v2295_v34  ;;  %v2328_v38 = vcombine.high %v2231_v29, %v2295_v34  ;;  %v3003_v29 = vld [vmem:[%s3493_s9] sm:$0xff]  }
 0x899   : > { %2951 = vmatpush3.bf16.msra.mxu1 %v3003_v29 }
 0x89a   : > { %v2335_v42 = vrot.slane %v2327_v37, %v3203_v40  ;;  %v2342_v45 = vrot.slane %v2328_v38, %v3203_v40  ;;  %2952 = vmatprep.subr.bf16.mxu1 %v3044_v8  ;;  %v2835_v38 = vld [vmem:[%s3491_s7] ss:$0 sm:$0xff] }
 0x89c   : > { %v2343_v47 = vcombine.low %v2319_v39, %v2335_v42  ;;  %v2344_v48 = vcombine.high %v2319_v39, %v2335_v42  ;;  %v2359_v50 = vcombine.low %v2326_v41, %v2342_v45  ;;  %v2360_v52 = vcombine.high %v2326_v41, %v2342_v45  ;;  %v2836_v41 = vld [vmem:[%s3492_s8] ss:$0 sm:$0xff] }
 0x89d   : > { %2953 = vmatpush3.bf16.msra.mxu1 %v3004_v32 }
 0x89e   : > { %v2351_v54 = vrot.slane %v2343_v47, %v3209_v49  ;;  %v2358_v55 = vrot.slane %v2344_v48, %v3209_v49  ;;  %v2367_v56 = vrot.slane %v2359_v50, %v3209_v49  ;;  %v2374_v57 = vrot.slane %v2360_v52, %v3209_v49  ;;  %v3006_v48 = vld [vmem:[%s3495_s11 + $0x8] sm:$0xff]   ;;  %v3007_v50 = vld [vmem:[%s3495_s11 + $0x10] sm:$0xff]   ;;  %v3008_v52 = vld [vmem:[%s3495_s11 + $0x18] sm:$0xff]  }
 0x8a0   : > { %v2379_v28 = vcombine.low %v2351_v54, %v2358_v55  ;;  %v2829_v35 = vcombine.high %v2351_v54, %v2358_v55  ;;  %v2395_v58 = vcombine.low %v2367_v56, %v2374_v57  ;;  %v2830_v59 = vcombine.high %v2367_v56, %v2374_v57  ;;  %v3010_v54 = vld [vmem:[%s3495_s11 + $0x28] sm:$0xff]   ;;  %v3011_v55 = vld [vmem:[%s3495_s11 + $0x30] sm:$0xff]   ;;  %v3012_v56 = vld [vmem:[%s3495_s11 + $0x38] sm:$0xff]  }
 0x8a1   : > { %v2837_v57 = vld [vmem:[%s3494_s10] ss:$0 sm:$0xff] }
 0x8a2   : > { %v2386_v61 = vrot.slane %v2379_v28, %v3203_v40  ;;  %v2394_v62 = vrot.slane %v2829_v35, %v3203_v40  ;;  %v2402_v63 = vrot.slane %v2395_v58, %v3203_v40  ;;  %v2410_v0 = vrot.slane %v2830_v59, %v3203_v40 }
 0x8a4   : > { %v2412_v1 = vcombine.high %v2386_v61, %v2394_v62  ;;  %v2428_v2 = vcombine.high %v2402_v63, %v2410_v0  ;;  %v2411_v3 = vcombine.low %v2386_v61, %v2394_v62  ;;  %v2427_v4 = vcombine.low %v2402_v63, %v2410_v0 }
 0x8a6   : > { %v2426_v5 = vrot.slane %v2412_v1, %v3209_v49  ;;  %v2442_v23 = vrot.slane %v2428_v2, %v3209_v49  ;;  %v2419_v51 = vrot.slane %v2411_v3, %v3209_v49  ;;  %v2435_v6 = vrot.slane %v2427_v4, %v3209_v49 }
 0x8a8   : > { %v2445_v7 = vcombine.low %v2426_v5, %v2442_v23  ;;  %v2444_v36 = vcombine.high %v2419_v51, %v2435_v6  ;;  %v2443_v9 = vcombine.low %v2419_v51, %v2435_v6  ;;  %v2446_v40 = vcombine.high %v2426_v5, %v2442_v23  ;;  %v2841_v23 = vld [vmem:[%s3496_s12] ss:$0 sm:$0xff] }
 0x8aa   : > { %2452 = vrot.lane.b32.xlu0 %v2445_v7, %s3054_s28  ;;  %2448 = vrot.lane.b32.xlu1 %v2444_v36, %s3055_s29 }
 0x8ae   : > { %2456 = vrot.lane.b32.xlu1 %v2446_v40, %s3056_s30 }
 0x91c   : > { %v2449_v10 = vpop.permute.xlu1 %2448  ;;  %v2453_v46 = vpop.permute.xlu0 %2452 }
 0x91d   : > { %v2459_v22 = vsel %vm1324_vm3, %v2443_v9, %v2449_v10 }
 0x91e   : > { %v2461_v44 = vsel %vm2460_vm5, %v2459_v22, %v2453_v46 }
 0x920   : > { %v2457_v27 = vpop.permute.xlu1 %2456 }
 0x921   : > { %v2463_v49 = vsel %vm2462_vm6, %v2461_v44, %v2457_v27 }
 0x922   : > { %v2464_v43 = vpack.c.bf16 %v2463_v49, %v2463_v49 }
 0x924   : > { %2947 = vmatmul.mubr.msk.bf16.vlgmr.msra.gmra.mrb[12].mxu0 %vm494_vm0, %v2464_v43 }
 0x925   : > { %2974 = vmatprep.mubr.msk.bf16.mxu0 %vm3045_vm1, %v3044_v8  ;;  %2959 = vmatpush3.bf16.msra.mxu0 %v3005_v30 }
 0x926   : > { %2960 = vmatprep.subr.bf16.mxu0 %v3044_v8 }
 0x929   : > { %2961 = vmatpush3.bf16.msra.mxu0 %v3006_v48 }
 0x92a   : > { %2962 = vmatprep.subr.bf16.mxu0 %v3044_v8 }
 0x92d   : > { %2963 = vmatpush3.bf16.msra.mxu0 %v3007_v50 }
 0x92e   : > { %2964 = vmatprep.subr.bf16.mxu0 %v3044_v8 }
 0x931   : > { %2965 = vmatpush3.bf16.msra.mxu0 %v3008_v52 }
 0x932   : > { %2966 = vmatprep.subr.bf16.mxu0 %v3044_v8 }
 0x935   : > { %2967 = vmatpush3.bf16.msra.mxu0 %v3009_v53 }
 0x936   : > { %2968 = vmatprep.subr.bf16.mxu0 %v3044_v8 }
 0x939   : > { %2969 = vmatpush3.bf16.msra.mxu0 %v3010_v54 }
 0x93a   : > { %2970 = vmatprep.subr.bf16.mxu0 %v3044_v8 }
 0x93d   : > { %2971 = vmatpush3.bf16.msra.mxu0 %v3011_v55 }
 0x93e   : > { %2972 = vmatprep.subr.bf16.mxu0 %v3044_v8 }
 0x941   : > { %2973 = vmatpush3.bf16.msra.mxu0 %v3012_v56 }
 0x9f7   : > { %v2525_v26 = vpop.f32.mrb[12].mxu0 }
 0x9f8   : > { %v2526_v12 = vadd.f32 %v2831_v11, %v2525_v26  ;;  %v2948_v13 = vpop.f32.mrb[13].mxu0 }
 0x9f9   : > { %v2528_v14 = vpop.f32.mrb[14].mxu0 }
 0x9fa   : > { %v3417_v16 = vadd.f32 %v3035_v15, %v2526_v12  ;;  %v2949_v17 = vpop.f32.mrb[15].mxu0 }
 0x9fc   : > { %v2534_v18 = vsel %vm494_vm0, %v3417_v16, 0.0 }
 0x9fd   : > { %2535 = vadd.xlane.f32.xlu1 %v2534_v18 }
 0xa8a   : > { %v2536_v19 = vpop.xlane.xlu1 %2535 }
 0xa8b   : > { %v2537_v20 = vmul.f32 0.03125, %v2536_v19 }
 0xa8d   : > { %v2538_v21 = vsub.f32 %v3417_v16, %v2537_v20 }
 0xa8f   : > { %v2539_v24 = vmul.f32 %v2538_v21, %v2538_v21 }
 0xa91   : > { %v2540_v25 = vsel %vm494_vm0, %v2539_v24, 0.0 }
 0xa92   : > { %2541 = vadd.xlane.f32.xlu0 %v2540_v25 }
 0xb1f   : > { %v2542_v31 = vpop.xlane.xlu0 %2541 }
 0xb20   : > { %v2543_v33 = vmul.f32 0.03125, %v2542_v31 }
 0xb22   : > { %v2544_v34 = vadd.f32 1e-05, %v2543_v33 }
 0xb24   : > { %3031 = vrsqrt.f32 %v2544_v34 }
 0xb2e   : > { %v3032_v37 = vpop.eup %3031 }
 0xb2f   : > { %v2546_v39 = vmul.f32 %v3032_v37, %v2538_v21 }
 0xb31   : > { %v2553_v42 = vmul.f32 %v2835_v38, %v2546_v39 }
 0xb33   : > { %v2560_v45 = vadd.f32 %v2836_v41, %v2553_v42 }
 0xb35   : > { %v2561_v47 = vpack.c.bf16 %v2560_v45, %v2560_v45 }
 0xb37   : > { %2955 = vmatmul.mubr.msk.bf16.vlgmr.msra.gmra.mrb[24].mxu1 %vm494_vm0, %v2561_v47 }
 0xc0a   : > { %v2622_v28 = vpop.f32.mrb[24].mxu1 }
 0xc0b   : > { %v2623_v35 = vadd.f32 %v2837_v57, %v2622_v28  ;;  %v2956_v58 = vpop.f32.mrb[25].mxu1 }
 0xc0c   : > { %v2625_v59 = vpop.f32.mrb[26].mxu1 }
 0xc0d   : > { %v2629_v60 = vmul.f32 %v2623_v35, %v2623_v35  ;;  %v2957_v61 = vpop.f32.mrb[27].mxu1  ;;  %v2628_v3 = vmul.f32 0.5, %v2623_v35 }
 0xc0f   : > { %v2630_v62 = vmul.f32 %v2629_v60, %v2623_v35 }
 0xc11   : > { %v2631_v63 = vmul.f32 0.044715, %v2630_v62 }
 0xc13   : > { %v2632_v0 = vadd.f32 %v2631_v63, %v2623_v35 }
 0xc15   : > { %v2633_v1 = vmul.f32 0.7978846, %v2632_v0 }
 0xc17   : > { %3033 = vtanh.f32 %v2633_v1 }
 0xc21   : > { %v3034_v2 = vpop.eup %3033 }
 0xc22   : > { %v2635_v8 = vadd.f32 1.0, %v3034_v2 }
 0xc24   : > { %v2636_v4 = vmul.f32 %v2635_v8, %v2628_v3 }
 0xc26   : > { %v2637_v5 = vpack.c.bf16 %v2636_v4, %v2636_v4 }
 0xc28   : > { %2975 = vmatmul.mubr.bf16.vlgmr.msra.gmra.mrb[16].mxu0 %v2637_v5 }
 0xcfb   : > { %v2743_v51 = vpop.f32.mrb[16].mxu0 }
 0xcfc   : > { %v2744_v6 = vadd.f32 %v2841_v23, %v2743_v51  ;;  %v2976_v7 = vpop.f32.mrb[17].mxu0 }
 0xcfd   : > { %v2746_v36 = vpop.f32.mrb[18].mxu0 }
 0xcfe   : > { %v2749_v9 = vadd.f32 %v2744_v6, %v3417_v16  ;;  %v2977_v40 = vpop.f32.mrb[19].mxu0 }
 0xd00   : > { %2750 = vst.msk [vmem:[%s489_s21] sm:$0xff] %vm494_vm0, %v2749_v9 }
 0xd01 PF: > { %s25_s18 = sadd.s32 1, %s3042_s18  }
 0xd02   : > { %p22_p4 = scmp.ge.s32.totalorder %s25_s18, 4  }
 0xd04   :  { %24 = sbr.rel (!%p22_p4) target bundleno = 1 (0x1), region = 110 }

</bundles_post_ra>
